<compile_context>
chip_gen: v5e
topology: v5e:2x2
jax: 0.10.0
libtpu: 0.0.40
codegen_flags: <defaults>
</compile_context>

<pallas_src>
import functools

import jax
import jax.numpy as jnp
from jax import lax
from jax.experimental import pallas as pl
from jax.experimental.pallas import tpu as pltpu

OUT_H, OUT_W = 288, 384  # fixed by F.interpolate(x, [288, 384], mode='nearest')


def _pick_cm_tile(c_mid, batch, x_block_bytes, budget_bytes=12 << 20, min_steps=4):
    """Largest divisor of c_mid whose per-step VMEM footprint fits the budget
    while (preferably) leaving >= min_steps grid steps for writeback overlap
    and v7x megacore utilisation."""
    divs = [d for d in range(1, c_mid + 1) if c_mid % d == 0]

    def fits(d):
        out_block = d * OUT_H * OUT_W * 4
        # 2x double-buffered output block + ~0.5 block of in-kernel temps
        # + double-buffered x block + 1 MiB slack for the small operands.
        return (5 * out_block) // 2 + 2 * x_block_bytes + (1 << 20) <= budget_bytes

    fit = [d for d in divs if fits(d)] or [divs[0]]
    good = [d for d in fit if batch * (c_mid // d) >= min_steps]
    return max(good) if good else max(fit)


def _i2t_kernel(x_ref, w_ref, b_ref, o_ref, *, H, W):
    # x_ref : (1, c_in, H*W)        lane-dense input block (one batch element)
    # w_ref : (1, cm, c_in)         1x1-conv weight tile
    # b_ref : (1, cm, 1)            conv bias tile (tiny, no lane-padded slab)
    # o_ref : (1, cm, 288, 384)     lane-dense output block
    cm = w_ref.shape[1]

    # 1x1 conv as a single lane-dense MXU matmul, f32 accumulation.
    # (HIGHEST keeps full f32 semantics; the kernel is store-bound so the extra
    #  MXU passes are free.  For max MXU throughput this could be relaxed to
    #  bf16 operands, per the perf review.)
    y = jnp.dot(w_ref[0].astype(jnp.float32), x_ref[0].astype(jnp.float32),
                preferred_element_type=jnp.float32,
                precision=lax.Precision.HIGHEST)          # (cm, H*W)
    y = y + b_ref[0].astype(jnp.float32)                  # (cm, 1) broadcast

    # Exact one-hot column selector for PyTorch legacy 'nearest':
    #   csel[w, ow] = 1  iff  floor(ow * W / 384) == w
    # built from iota compares only (no integer division, no HBM operand).
    ow_scaled = lax.broadcasted_iota(jnp.int32, (W, OUT_W), 1) * W
    w_scaled = lax.broadcasted_iota(jnp.int32, (W, OUT_W), 0) * OUT_W
    csel = ((ow_scaled >= w_scaled) &
            (ow_scaled < w_scaled + OUT_W)).astype(jnp.float32)   # (W, 384)

    # Row upsample at store time: input row h owns the statically-known,
    # contiguous output-row range [r0, r1) (floor(oh*H/288) is monotone).
    # For each input row: column-upsample all cm channels with one tiny MXU
    # matmul, then broadcast-store the lane-dense (cm, r1-r0, 384) slab.
    for h in range(H):
        r0 = -(-(h * OUT_H) // H)          # ceil(h*288/H)
        r1 = -(-((h + 1) * OUT_H) // H)    # ceil((h+1)*288/H)
        if r1 <= r0:
            continue
        y_h = y[:, h * W:(h + 1) * W]                             # (cm, W)
        z_h = jnp.dot(y_h, csel,
                      preferred_element_type=jnp.float32,
                      precision=lax.Precision.HIGHEST)            # (cm, 384)
        o_ref[0, :, r0:r1, :] = jnp.broadcast_to(
            z_h[:, None, :], (cm, r1 - r0, OUT_W)).astype(o_ref.dtype)


def imagefeature2textfeature_forward(x, weight, bias, hidden_dim):
    """x: (B, C_in, H, W); weight: (C_mid, C_in, 1, 1); bias: (C_mid,)."""
    B, c_in, H, W = x.shape
    c_mid = weight.shape[0]
    assert (c_mid * OUT_H * OUT_W) % hidden_dim == 0, (
        "hidden_dim must divide c_mid*288*384 (same constraint as torch .view)")

    cm_tile = _pick_cm_tile(c_mid, B, c_in * H * W * 4)
    n_cm = c_mid // cm_tile

    # Lane-dense conv layout for x; tiny conv operands pre-tiled by c_mid.
    x3 = x.reshape(B, c_in, H * W)
    w3 = weight.reshape(c_mid, c_in).astype(jnp.float32).reshape(n_cm, cm_tile, c_in)
    b3 = bias.astype(jnp.float32).reshape(n_cm, cm_tile, 1)

    kernel = functools.partial(_i2t_kernel, H=H, W=W)

    out = pl.pallas_call(
        kernel,
        out_shape=jax.ShapeDtypeStruct((B, c_mid, OUT_H, OUT_W), x.dtype),
        grid_spec=pltpu.PrefetchScalarGridSpec(
            num_scalar_prefetch=0,
            grid=(B, n_cm),   # inner axis = c_mid tiles -> x block stays resident
            in_specs=[
                pl.BlockSpec((1, c_in, H * W), lambda b, j: (b, 0, 0)),
                pl.BlockSpec((1, cm_tile, c_in), lambda b, j: (j, 0, 0)),
                pl.BlockSpec((1, cm_tile, 1), lambda b, j: (j, 0, 0)),
            ],
            out_specs=pl.BlockSpec((1, cm_tile, OUT_H, OUT_W),
                                   lambda b, j: (b, j, 0, 0)),
        ),
        compiler_params=pltpu.CompilerParams(
            dimension_semantics=("parallel", "parallel")),
    )(x3, w3, b3)

    seq = (c_mid * OUT_H * OUT_W) // hidden_dim
    # `out` is the row-major NCHW (B, c_mid, 288, 384) slab; torch's
    # .contiguous().view(...) is exactly the same flattening.
    return out.reshape(B, seq, hidden_dim)


def _reference(x, weight, bias, hidden_dim):
    B, c_in, H, W = x.shape
    c_mid = weight.shape[0]
    y = jnp.einsum("mc,bchw->bmhw", weight.reshape(c_mid, c_in), x,
                   precision=lax.Precision.HIGHEST)
    y = y + bias[None, :, None, None]
    row_idx = (jnp.arange(OUT_H) * H) // OUT_H      # PyTorch legacy 'nearest'
    col_idx = (jnp.arange(OUT_W) * W) // OUT_W
    y = y[:, :, row_idx, :][:, :, :, col_idx]
    return y.reshape(B, (c_mid * OUT_H * OUT_W) // hidden_dim, hidden_dim)


if __name__ == "__main__":
    key = jax.random.PRNGKey(0)
    k1, k2, k3 = jax.random.split(key, 3)

    B, c_in, H, W = 2, 4, 16, 16          # small NCHW input
    c_mid, hidden_dim = 8, 32             # mid_channel, hidden_dim

    x = jax.random.normal(k1, (B, c_in, H, W), jnp.float32)
    weight = jax.random.normal(k2, (c_mid, c_in, 1, 1), jnp.float32) * 0.1
    bias = jax.random.normal(k3, (c_mid,), jnp.float32) * 0.1

    out = imagefeature2textfeature_forward(x, weight, bias, hidden_dim)
    out = jax.block_until_ready(out)

    ref = _reference(x, weight, bias, hidden_dim)
    assert out.shape == (B, (c_mid * OUT_H * OUT_W) // hidden_dim, hidden_dim)
    # Tolerance leaves headroom for MXU bf16-pass arithmetic in case the
    # platform downgrades f32 matmul precision; with HIGHEST honored the
    # actual error is ~1e-6.
    assert jnp.allclose(out, ref, rtol=5e-3, atol=5e-3)
    print("KERNEL_OK")
</pallas_src>

<mosaic_0001>
module attributes {stable_mosaic.version = 11 : i64} {
  func.func @_i2t_kernel(%arg0: i32, %arg1: i32, %arg2: memref<1x4x256xf32, #tpu.memory_space<vmem>>, %arg3: memref<1x4x4xf32, #tpu.memory_space<vmem>>, %arg4: memref<1x4x1xf32, #tpu.memory_space<vmem>>, %arg5: memref<1x4x288x384xf32, #tpu.memory_space<vmem>>) attributes {dimension_semantics = [#tpu.dimension_semantics<parallel>, #tpu.dimension_semantics<parallel>], iteration_bounds = array<i64: 2, 2>, scalar_prefetch = 0 : i64, scratch_operands = 0 : i64, tpu.core_type = #tpu.core_type<tc>, window_params = [{transform_indices = @transform_0, window_bounds = array<i64: 1, 4, 256>}, {transform_indices = @transform_1, window_bounds = array<i64: 1, 4, 4>}, {transform_indices = @transform_2, window_bounds = array<i64: 1, 4, 1>}, {transform_indices = @transform_3, window_bounds = array<i64: 1, 4, 288, 384>}]} {
    %c0 = arith.constant 0 : index
    %c0_0 = arith.constant 0 : index
    %c0_1 = arith.constant 0 : index
    %0 = vector.load %arg3[%c0, %c0_0, %c0_1] : memref<1x4x4xf32, #tpu.memory_space<vmem>>, vector<1x4x4xf32>
    %1 = vector.shape_cast %0 : vector<1x4x4xf32> to vector<4x4xf32>
    %c0_2 = arith.constant 0 : index
    %c0_3 = arith.constant 0 : index
    %c0_4 = arith.constant 0 : index
    %2 = vector.load %arg2[%c0_2, %c0_3, %c0_4] : memref<1x4x256xf32, #tpu.memory_space<vmem>>, vector<1x4x256xf32>
    %3 = vector.shape_cast %2 : vector<1x4x256xf32> to vector<4x256xf32>
    %cst = arith.constant dense<0.000000e+00> : vector<4x256xf32>
    %4 = tpu.matmul %1, %3, %cst {dimension_numbers = #tpu.dot_dimension_numbers<[1], [0], [0], [1], [0, 0, 1, 1], [], []>, precision = #tpu.contract_precision<fp32>} : vector<4x4xf32>, vector<4x256xf32>, vector<4x256xf32> -> vector<4x256xf32>
    %c0_5 = arith.constant 0 : index
    %c0_6 = arith.constant 0 : index
    %c0_7 = arith.constant 0 : index
    %5 = vector.load %arg4[%c0_5, %c0_6, %c0_7] : memref<1x4x1xf32, #tpu.memory_space<vmem>>, vector<1x4x1xf32>
    %6 = vector.shape_cast %5 : vector<1x4x1xf32> to vector<4x1xf32>
    %7 = vector.broadcast %6 : vector<4x1xf32> to vector<4x256xf32>
    %8 = arith.addf %4, %7 : vector<4x256xf32>
    %9 = tpu.iota {dimensions = array<i32: 1>} : vector<16x384xi32>
    %c16_i32 = arith.constant 16 : i32
    %10 = vector.broadcast %c16_i32 : i32 to vector<16x384xi32>
    %11 = arith.muli %9, %10 : vector<16x384xi32>
    %12 = tpu.iota {dimensions = array<i32: 0>} : vector<16x384xi32>
    %c384_i32 = arith.constant 384 : i32
    %13 = vector.broadcast %c384_i32 : i32 to vector<16x384xi32>
    %14 = arith.muli %12, %13 : vector<16x384xi32>
    %15 = arith.cmpi sge, %11, %14 : vector<16x384xi32>
    %c384_i32_8 = arith.constant 384 : i32
    %16 = vector.broadcast %c384_i32_8 : i32 to vector<16x384xi32>
    %17 = arith.addi %14, %16 : vector<16x384xi32>
    %18 = arith.cmpi slt, %11, %17 : vector<16x384xi32>
    %19 = arith.andi %15, %18 : vector<16x384xi1>
    %20 = arith.extui %19 : vector<16x384xi1> to vector<16x384xi32>
    %21 = arith.sitofp %20 : vector<16x384xi32> to vector<16x384xf32>
    %22 = vector.extract_strided_slice %8 {offsets = [0, 0], sizes = [4, 16], strides = [1, 1]} : vector<4x256xf32> to vector<4x16xf32>
    %cst_9 = arith.constant dense<0.000000e+00> : vector<4x384xf32>
    %23 = tpu.matmul %22, %21, %cst_9 {dimension_numbers = #tpu.dot_dimension_numbers<[1], [0], [0], [1], [0, 0, 1, 1], [], []>, precision = #tpu.contract_precision<fp32>} : vector<4x16xf32>, vector<16x384xf32>, vector<4x384xf32> -> vector<4x384xf32>
    %24 = vector.shape_cast %23 : vector<4x384xf32> to vector<4x1x384xf32>
    %25 = vector.shape_cast %24 : vector<4x1x384xf32> to vector<4x1x384xf32>
    %26 = vector.broadcast %25 : vector<4x1x384xf32> to vector<4x18x384xf32>
    %c0_10 = arith.constant 0 : index
    %c0_11 = arith.constant 0 : index
    %c0_12 = arith.constant 0 : index
    %c0_13 = arith.constant 0 : index
    %27 = vector.load %arg5[%c0_10, %c0_11, %c0_12, %c0_13] : memref<1x4x288x384xf32, #tpu.memory_space<vmem>>, vector<1x4x18x384xf32>
    %28 = vector.shape_cast %27 : vector<1x4x18x384xf32> to vector<4x18x384xf32>
    %29 = vector.shape_cast %26 : vector<4x18x384xf32> to vector<1x4x18x384xf32>
    tpu.vector_store %arg5[%c0_10, %c0_11, %c0_12, %c0_13], %29 {strides = array<i32>} : memref<1x4x288x384xf32, #tpu.memory_space<vmem>>, vector<1x4x18x384xf32>,
    %30 = vector.extract_strided_slice %8 {offsets = [0, 16], sizes = [4, 16], strides = [1, 1]} : vector<4x256xf32> to vector<4x16xf32>
    %cst_14 = arith.constant dense<0.000000e+00> : vector<4x384xf32>
    %31 = tpu.matmul %30, %21, %cst_14 {dimension_numbers = #tpu.dot_dimension_numbers<[1], [0], [0], [1], [0, 0, 1, 1], [], []>, precision = #tpu.contract_precision<fp32>} : vector<4x16xf32>, vector<16x384xf32>, vector<4x384xf32> -> vector<4x384xf32>
    %32 = vector.shape_cast %31 : vector<4x384xf32> to vector<4x1x384xf32>
    %33 = vector.shape_cast %32 : vector<4x1x384xf32> to vector<4x1x384xf32>
    %34 = vector.broadcast %33 : vector<4x1x384xf32> to vector<4x18x384xf32>
    %c0_15 = arith.constant 0 : index
    %c0_16 = arith.constant 0 : index
    %c18 = arith.constant 18 : index
    %c0_17 = arith.constant 0 : index
    %35 = vector.load %arg5[%c0_15, %c0_16, %c18, %c0_17] : memref<1x4x288x384xf32, #tpu.memory_space<vmem>>, vector<1x4x18x384xf32>
    %36 = vector.shape_cast %35 : vector<1x4x18x384xf32> to vector<4x18x384xf32>
    %37 = vector.shape_cast %34 : vector<4x18x384xf32> to vector<1x4x18x384xf32>
    tpu.vector_store %arg5[%c0_15, %c0_16, %c18, %c0_17], %37 {strides = array<i32>} : memref<1x4x288x384xf32, #tpu.memory_space<vmem>>, vector<1x4x18x384xf32>,
    %38 = vector.extract_strided_slice %8 {offsets = [0, 32], sizes = [4, 16], strides = [1, 1]} : vector<4x256xf32> to vector<4x16xf32>
    %cst_18 = arith.constant dense<0.000000e+00> : vector<4x384xf32>
    %39 = tpu.matmul %38, %21, %cst_18 {dimension_numbers = #tpu.dot_dimension_numbers<[1], [0], [0], [1], [0, 0, 1, 1], [], []>, precision = #tpu.contract_precision<fp32>} : vector<4x16xf32>, vector<16x384xf32>, vector<4x384xf32> -> vector<4x384xf32>
    %40 = vector.shape_cast %39 : vector<4x384xf32> to vector<4x1x384xf32>
    %41 = vector.shape_cast %40 : vector<4x1x384xf32> to vector<4x1x384xf32>
    %42 = vector.broadcast %41 : vector<4x1x384xf32> to vector<4x18x384xf32>
    %c0_19 = arith.constant 0 : index
    %c0_20 = arith.constant 0 : index
    %c36 = arith.constant 36 : index
    %c0_21 = arith.constant 0 : index
    %43 = vector.load %arg5[%c0_19, %c0_20, %c36, %c0_21] : memref<1x4x288x384xf32, #tpu.memory_space<vmem>>, vector<1x4x18x384xf32>
    %44 = vector.shape_cast %43 : vector<1x4x18x384xf32> to vector<4x18x384xf32>
    %45 = vector.shape_cast %42 : vector<4x18x384xf32> to vector<1x4x18x384xf32>
    tpu.vector_store %arg5[%c0_19, %c0_20, %c36, %c0_21], %45 {strides = array<i32>} : memref<1x4x288x384xf32, #tpu.memory_space<vmem>>, vector<1x4x18x384xf32>,
    %46 = vector.extract_strided_slice %8 {offsets = [0, 48], sizes = [4, 16], strides = [1, 1]} : vector<4x256xf32> to vector<4x16xf32>
    %cst_22 = arith.constant dense<0.000000e+00> : vector<4x384xf32>
    %47 = tpu.matmul %46, %21, %cst_22 {dimension_numbers = #tpu.dot_dimension_numbers<[1], [0], [0], [1], [0, 0, 1, 1], [], []>, precision = #tpu.contract_precision<fp32>} : vector<4x16xf32>, vector<16x384xf32>, vector<4x384xf32> -> vector<4x384xf32>
    %48 = vector.shape_cast %47 : vector<4x384xf32> to vector<4x1x384xf32>
    %49 = vector.shape_cast %48 : vector<4x1x384xf32> to vector<4x1x384xf32>
    %50 = vector.broadcast %49 : vector<4x1x384xf32> to vector<4x18x384xf32>
    %c0_23 = arith.constant 0 : index
    %c0_24 = arith.constant 0 : index
    %c54 = arith.constant 54 : index
    %c0_25 = arith.constant 0 : index
    %51 = vector.load %arg5[%c0_23, %c0_24, %c54, %c0_25] : memref<1x4x288x384xf32, #tpu.memory_space<vmem>>, vector<1x4x18x384xf32>
    %52 = vector.shape_cast %51 : vector<1x4x18x384xf32> to vector<4x18x384xf32>
    %53 = vector.shape_cast %50 : vector<4x18x384xf32> to vector<1x4x18x384xf32>
    tpu.vector_store %arg5[%c0_23, %c0_24, %c54, %c0_25], %53 {strides = array<i32>} : memref<1x4x288x384xf32, #tpu.memory_space<vmem>>, vector<1x4x18x384xf32>,
    %54 = vector.extract_strided_slice %8 {offsets = [0, 64], sizes = [4, 16], strides = [1, 1]} : vector<4x256xf32> to vector<4x16xf32>
    %cst_26 = arith.constant dense<0.000000e+00> : vector<4x384xf32>
    %55 = tpu.matmul %54, %21, %cst_26 {dimension_numbers = #tpu.dot_dimension_numbers<[1], [0], [0], [1], [0, 0, 1, 1], [], []>, precision = #tpu.contract_precision<fp32>} : vector<4x16xf32>, vector<16x384xf32>, vector<4x384xf32> -> vector<4x384xf32>
    %56 = vector.shape_cast %55 : vector<4x384xf32> to vector<4x1x384xf32>
    %57 = vector.shape_cast %56 : vector<4x1x384xf32> to vector<4x1x384xf32>
    %58 = vector.broadcast %57 : vector<4x1x384xf32> to vector<4x18x384xf32>
    %c0_27 = arith.constant 0 : index
    %c0_28 = arith.constant 0 : index
    %c72 = arith.constant 72 : index
    %c0_29 = arith.constant 0 : index
    %59 = vector.load %arg5[%c0_27, %c0_28, %c72, %c0_29] : memref<1x4x288x384xf32, #tpu.memory_space<vmem>>, vector<1x4x18x384xf32>
    %60 = vector.shape_cast %59 : vector<1x4x18x384xf32> to vector<4x18x384xf32>
    %61 = vector.shape_cast %58 : vector<4x18x384xf32> to vector<1x4x18x384xf32>
    tpu.vector_store %arg5[%c0_27, %c0_28, %c72, %c0_29], %61 {strides = array<i32>} : memref<1x4x288x384xf32, #tpu.memory_space<vmem>>, vector<1x4x18x384xf32>,
    %62 = vector.extract_strided_slice %8 {offsets = [0, 80], sizes = [4, 16], strides = [1, 1]} : vector<4x256xf32> to vector<4x16xf32>
    %cst_30 = arith.constant dense<0.000000e+00> : vector<4x384xf32>
    %63 = tpu.matmul %62, %21, %cst_30 {dimension_numbers = #tpu.dot_dimension_numbers<[1], [0], [0], [1], [0, 0, 1, 1], [], []>, precision = #tpu.contract_precision<fp32>} : vector<4x16xf32>, vector<16x384xf32>, vector<4x384xf32> -> vector<4x384xf32>
    %64 = vector.shape_cast %63 : vector<4x384xf32> to vector<4x1x384xf32>
    %65 = vector.shape_cast %64 : vector<4x1x384xf32> to vector<4x1x384xf32>
    %66 = vector.broadcast %65 : vector<4x1x384xf32> to vector<4x18x384xf32>
    %c0_31 = arith.constant 0 : index
    %c0_32 = arith.constant 0 : index
    %c90 = arith.constant 90 : index
    %c0_33 = arith.constant 0 : index
    %67 = vector.load %arg5[%c0_31, %c0_32, %c90, %c0_33] : memref<1x4x288x384xf32, #tpu.memory_space<vmem>>, vector<1x4x18x384xf32>
    %68 = vector.shape_cast %67 : vector<1x4x18x384xf32> to vector<4x18x384xf32>
    %69 = vector.shape_cast %66 : vector<4x18x384xf32> to vector<1x4x18x384xf32>
    tpu.vector_store %arg5[%c0_31, %c0_32, %c90, %c0_33], %69 {strides = array<i32>} : memref<1x4x288x384xf32, #tpu.memory_space<vmem>>, vector<1x4x18x384xf32>,
    %70 = vector.extract_strided_slice %8 {offsets = [0, 96], sizes = [4, 16], strides = [1, 1]} : vector<4x256xf32> to vector<4x16xf32>
    %cst_34 = arith.constant dense<0.000000e+00> : vector<4x384xf32>
    %71 = tpu.matmul %70, %21, %cst_34 {dimension_numbers = #tpu.dot_dimension_numbers<[1], [0], [0], [1], [0, 0, 1, 1], [], []>, precision = #tpu.contract_precision<fp32>} : vector<4x16xf32>, vector<16x384xf32>, vector<4x384xf32> -> vector<4x384xf32>
    %72 = vector.shape_cast %71 : vector<4x384xf32> to vector<4x1x384xf32>
    %73 = vector.shape_cast %72 : vector<4x1x384xf32> to vector<4x1x384xf32>
    %74 = vector.broadcast %73 : vector<4x1x384xf32> to vector<4x18x384xf32>
    %c0_35 = arith.constant 0 : index
    %c0_36 = arith.constant 0 : index
    %c108 = arith.constant 108 : index
    %c0_37 = arith.constant 0 : index
    %75 = vector.load %arg5[%c0_35, %c0_36, %c108, %c0_37] : memref<1x4x288x384xf32, #tpu.memory_space<vmem>>, vector<1x4x18x384xf32>
    %76 = vector.shape_cast %75 : vector<1x4x18x384xf32> to vector<4x18x384xf32>
    %77 = vector.shape_cast %74 : vector<4x18x384xf32> to vector<1x4x18x384xf32>
    tpu.vector_store %arg5[%c0_35, %c0_36, %c108, %c0_37], %77 {strides = array<i32>} : memref<1x4x288x384xf32, #tpu.memory_space<vmem>>, vector<1x4x18x384xf32>,
    %78 = vector.extract_strided_slice %8 {offsets = [0, 112], sizes = [4, 16], strides = [1, 1]} : vector<4x256xf32> to vector<4x16xf32>
    %cst_38 = arith.constant dense<0.000000e+00> : vector<4x384xf32>
    %79 = tpu.matmul %78, %21, %cst_38 {dimension_numbers = #tpu.dot_dimension_numbers<[1], [0], [0], [1], [0, 0, 1, 1], [], []>, precision = #tpu.contract_precision<fp32>} : vector<4x16xf32>, vector<16x384xf32>, vector<4x384xf32> -> vector<4x384xf32>
    %80 = vector.shape_cast %79 : vector<4x384xf32> to vector<4x1x384xf32>
    %81 = vector.shape_cast %80 : vector<4x1x384xf32> to vector<4x1x384xf32>
    %82 = vector.broadcast %81 : vector<4x1x384xf32> to vector<4x18x384xf32>
    %c0_39 = arith.constant 0 : index
    %c0_40 = arith.constant 0 : index
    %c126 = arith.constant 126 : index
    %c0_41 = arith.constant 0 : index
    %83 = vector.load %arg5[%c0_39, %c0_40, %c126, %c0_41] : memref<1x4x288x384xf32, #tpu.memory_space<vmem>>, vector<1x4x18x384xf32>
    %84 = vector.shape_cast %83 : vector<1x4x18x384xf32> to vector<4x18x384xf32>
    %85 = vector.shape_cast %82 : vector<4x18x384xf32> to vector<1x4x18x384xf32>
    tpu.vector_store %arg5[%c0_39, %c0_40, %c126, %c0_41], %85 {strides = array<i32>} : memref<1x4x288x384xf32, #tpu.memory_space<vmem>>, vector<1x4x18x384xf32>,
    %86 = vector.extract_strided_slice %8 {offsets = [0, 128], sizes = [4, 16], strides = [1, 1]} : vector<4x256xf32> to vector<4x16xf32>
    %cst_42 = arith.constant dense<0.000000e+00> : vector<4x384xf32>
    %87 = tpu.matmul %86, %21, %cst_42 {dimension_numbers = #tpu.dot_dimension_numbers<[1], [0], [0], [1], [0, 0, 1, 1], [], []>, precision = #tpu.contract_precision<fp32>} : vector<4x16xf32>, vector<16x384xf32>, vector<4x384xf32> -> vector<4x384xf32>
    %88 = vector.shape_cast %87 : vector<4x384xf32> to vector<4x1x384xf32>
    %89 = vector.shape_cast %88 : vector<4x1x384xf32> to vector<4x1x384xf32>
    %90 = vector.broadcast %89 : vector<4x1x384xf32> to vector<4x18x384xf32>
    %c0_43 = arith.constant 0 : index
    %c0_44 = arith.constant 0 : index
    %c144 = arith.constant 144 : index
    %c0_45 = arith.constant 0 : index
    %91 = vector.load %arg5[%c0_43, %c0_44, %c144, %c0_45] : memref<1x4x288x384xf32, #tpu.memory_space<vmem>>, vector<1x4x18x384xf32>
    %92 = vector.shape_cast %91 : vector<1x4x18x384xf32> to vector<4x18x384xf32>
    %93 = vector.shape_cast %90 : vector<4x18x384xf32> to vector<1x4x18x384xf32>
    tpu.vector_store %arg5[%c0_43, %c0_44, %c144, %c0_45], %93 {strides = array<i32>} : memref<1x4x288x384xf32, #tpu.memory_space<vmem>>, vector<1x4x18x384xf32>,
    %94 = vector.extract_strided_slice %8 {offsets = [0, 144], sizes = [4, 16], strides = [1, 1]} : vector<4x256xf32> to vector<4x16xf32>
    %cst_46 = arith.constant dense<0.000000e+00> : vector<4x384xf32>
    %95 = tpu.matmul %94, %21, %cst_46 {dimension_numbers = #tpu.dot_dimension_numbers<[1], [0], [0], [1], [0, 0, 1, 1], [], []>, precision = #tpu.contract_precision<fp32>} : vector<4x16xf32>, vector<16x384xf32>, vector<4x384xf32> -> vector<4x384xf32>
    %96 = vector.shape_cast %95 : vector<4x384xf32> to vector<4x1x384xf32>
    %97 = vector.shape_cast %96 : vector<4x1x384xf32> to vector<4x1x384xf32>
    %98 = vector.broadcast %97 : vector<4x1x384xf32> to vector<4x18x384xf32>
    %c0_47 = arith.constant 0 : index
    %c0_48 = arith.constant 0 : index
    %c162 = arith.constant 162 : index
    %c0_49 = arith.constant 0 : index
    %99 = vector.load %arg5[%c0_47, %c0_48, %c162, %c0_49] : memref<1x4x288x384xf32, #tpu.memory_space<vmem>>, vector<1x4x18x384xf32>
    %100 = vector.shape_cast %99 : vector<1x4x18x384xf32> to vector<4x18x384xf32>
    %101 = vector.shape_cast %98 : vector<4x18x384xf32> to vector<1x4x18x384xf32>
    tpu.vector_store %arg5[%c0_47, %c0_48, %c162, %c0_49], %101 {strides = array<i32>} : memref<1x4x288x384xf32, #tpu.memory_space<vmem>>, vector<1x4x18x384xf32>,
    %102 = vector.extract_strided_slice %8 {offsets = [0, 160], sizes = [4, 16], strides = [1, 1]} : vector<4x256xf32> to vector<4x16xf32>
    %cst_50 = arith.constant dense<0.000000e+00> : vector<4x384xf32>
    %103 = tpu.matmul %102, %21, %cst_50 {dimension_numbers = #tpu.dot_dimension_numbers<[1], [0], [0], [1], [0, 0, 1, 1], [], []>, precision = #tpu.contract_precision<fp32>} : vector<4x16xf32>, vector<16x384xf32>, vector<4x384xf32> -> vector<4x384xf32>
    %104 = vector.shape_cast %103 : vector<4x384xf32> to vector<4x1x384xf32>
    %105 = vector.shape_cast %104 : vector<4x1x384xf32> to vector<4x1x384xf32>
    %106 = vector.broadcast %105 : vector<4x1x384xf32> to vector<4x18x384xf32>
    %c0_51 = arith.constant 0 : index
    %c0_52 = arith.constant 0 : index
    %c180 = arith.constant 180 : index
    %c0_53 = arith.constant 0 : index
    %107 = vector.load %arg5[%c0_51, %c0_52, %c180, %c0_53] : memref<1x4x288x384xf32, #tpu.memory_space<vmem>>, vector<1x4x18x384xf32>
    %108 = vector.shape_cast %107 : vector<1x4x18x384xf32> to vector<4x18x384xf32>
    %109 = vector.shape_cast %106 : vector<4x18x384xf32> to vector<1x4x18x384xf32>
    tpu.vector_store %arg5[%c0_51, %c0_52, %c180, %c0_53], %109 {strides = array<i32>} : memref<1x4x288x384xf32, #tpu.memory_space<vmem>>, vector<1x4x18x384xf32>,
    %110 = vector.extract_strided_slice %8 {offsets = [0, 176], sizes = [4, 16], strides = [1, 1]} : vector<4x256xf32> to vector<4x16xf32>
    %cst_54 = arith.constant dense<0.000000e+00> : vector<4x384xf32>
    %111 = tpu.matmul %110, %21, %cst_54 {dimension_numbers = #tpu.dot_dimension_numbers<[1], [0], [0], [1], [0, 0, 1, 1], [], []>, precision = #tpu.contract_precision<fp32>} : vector<4x16xf32>, vector<16x384xf32>, vector<4x384xf32> -> vector<4x384xf32>
    %112 = vector.shape_cast %111 : vector<4x384xf32> to vector<4x1x384xf32>
    %113 = vector.shape_cast %112 : vector<4x1x384xf32> to vector<4x1x384xf32>
    %114 = vector.broadcast %113 : vector<4x1x384xf32> to vector<4x18x384xf32>
    %c0_55 = arith.constant 0 : index
    %c0_56 = arith.constant 0 : index
    %c198 = arith.constant 198 : index
    %c0_57 = arith.constant 0 : index
    %115 = vector.load %arg5[%c0_55, %c0_56, %c198, %c0_57] : memref<1x4x288x384xf32, #tpu.memory_space<vmem>>, vector<1x4x18x384xf32>
    %116 = vector.shape_cast %115 : vector<1x4x18x384xf32> to vector<4x18x384xf32>
    %117 = vector.shape_cast %114 : vector<4x18x384xf32> to vector<1x4x18x384xf32>
    tpu.vector_store %arg5[%c0_55, %c0_56, %c198, %c0_57], %117 {strides = array<i32>} : memref<1x4x288x384xf32, #tpu.memory_space<vmem>>, vector<1x4x18x384xf32>,
    %118 = vector.extract_strided_slice %8 {offsets = [0, 192], sizes = [4, 16], strides = [1, 1]} : vector<4x256xf32> to vector<4x16xf32>
    %cst_58 = arith.constant dense<0.000000e+00> : vector<4x384xf32>
    %119 = tpu.matmul %118, %21, %cst_58 {dimension_numbers = #tpu.dot_dimension_numbers<[1], [0], [0], [1], [0, 0, 1, 1], [], []>, precision = #tpu.contract_precision<fp32>} : vector<4x16xf32>, vector<16x384xf32>, vector<4x384xf32> -> vector<4x384xf32>
    %120 = vector.shape_cast %119 : vector<4x384xf32> to vector<4x1x384xf32>
    %121 = vector.shape_cast %120 : vector<4x1x384xf32> to vector<4x1x384xf32>
    %122 = vector.broadcast %121 : vector<4x1x384xf32> to vector<4x18x384xf32>
    %c0_59 = arith.constant 0 : index
    %c0_60 = arith.constant 0 : index
    %c216 = arith.constant 216 : index
    %c0_61 = arith.constant 0 : index
    %123 = vector.load %arg5[%c0_59, %c0_60, %c216, %c0_61] : memref<1x4x288x384xf32, #tpu.memory_space<vmem>>, vector<1x4x18x384xf32>
    %124 = vector.shape_cast %123 : vector<1x4x18x384xf32> to vector<4x18x384xf32>
    %125 = vector.shape_cast %122 : vector<4x18x384xf32> to vector<1x4x18x384xf32>
    tpu.vector_store %arg5[%c0_59, %c0_60, %c216, %c0_61], %125 {strides = array<i32>} : memref<1x4x288x384xf32, #tpu.memory_space<vmem>>, vector<1x4x18x384xf32>,
    %126 = vector.extract_strided_slice %8 {offsets = [0, 208], sizes = [4, 16], strides = [1, 1]} : vector<4x256xf32> to vector<4x16xf32>
    %cst_62 = arith.constant dense<0.000000e+00> : vector<4x384xf32>
    %127 = tpu.matmul %126, %21, %cst_62 {dimension_numbers = #tpu.dot_dimension_numbers<[1], [0], [0], [1], [0, 0, 1, 1], [], []>, precision = #tpu.contract_precision<fp32>} : vector<4x16xf32>, vector<16x384xf32>, vector<4x384xf32> -> vector<4x384xf32>
    %128 = vector.shape_cast %127 : vector<4x384xf32> to vector<4x1x384xf32>
    %129 = vector.shape_cast %128 : vector<4x1x384xf32> to vector<4x1x384xf32>
    %130 = vector.broadcast %129 : vector<4x1x384xf32> to vector<4x18x384xf32>
    %c0_63 = arith.constant 0 : index
    %c0_64 = arith.constant 0 : index
    %c234 = arith.constant 234 : index
    %c0_65 = arith.constant 0 : index
    %131 = vector.load %arg5[%c0_63, %c0_64, %c234, %c0_65] : memref<1x4x288x384xf32, #tpu.memory_space<vmem>>, vector<1x4x18x384xf32>
    %132 = vector.shape_cast %131 : vector<1x4x18x384xf32> to vector<4x18x384xf32>
    %133 = vector.shape_cast %130 : vector<4x18x384xf32> to vector<1x4x18x384xf32>
    tpu.vector_store %arg5[%c0_63, %c0_64, %c234, %c0_65], %133 {strides = array<i32>} : memref<1x4x288x384xf32, #tpu.memory_space<vmem>>, vector<1x4x18x384xf32>,
    %134 = vector.extract_strided_slice %8 {offsets = [0, 224], sizes = [4, 16], strides = [1, 1]} : vector<4x256xf32> to vector<4x16xf32>
    %cst_66 = arith.constant dense<0.000000e+00> : vector<4x384xf32>
    %135 = tpu.matmul %134, %21, %cst_66 {dimension_numbers = #tpu.dot_dimension_numbers<[1], [0], [0], [1], [0, 0, 1, 1], [], []>, precision = #tpu.contract_precision<fp32>} : vector<4x16xf32>, vector<16x384xf32>, vector<4x384xf32> -> vector<4x384xf32>
    %136 = vector.shape_cast %135 : vector<4x384xf32> to vector<4x1x384xf32>
    %137 = vector.shape_cast %136 : vector<4x1x384xf32> to vector<4x1x384xf32>
    %138 = vector.broadcast %137 : vector<4x1x384xf32> to vector<4x18x384xf32>
    %c0_67 = arith.constant 0 : index
    %c0_68 = arith.constant 0 : index
    %c252 = arith.constant 252 : index
    %c0_69 = arith.constant 0 : index
    %139 = vector.load %arg5[%c0_67, %c0_68, %c252, %c0_69] : memref<1x4x288x384xf32, #tpu.memory_space<vmem>>, vector<1x4x18x384xf32>
    %140 = vector.shape_cast %139 : vector<1x4x18x384xf32> to vector<4x18x384xf32>
    %141 = vector.shape_cast %138 : vector<4x18x384xf32> to vector<1x4x18x384xf32>
    tpu.vector_store %arg5[%c0_67, %c0_68, %c252, %c0_69], %141 {strides = array<i32>} : memref<1x4x288x384xf32, #tpu.memory_space<vmem>>, vector<1x4x18x384xf32>,
    %142 = vector.extract_strided_slice %8 {offsets = [0, 240], sizes = [4, 16], strides = [1, 1]} : vector<4x256xf32> to vector<4x16xf32>
    %cst_70 = arith.constant dense<0.000000e+00> : vector<4x384xf32>
    %143 = tpu.matmul %142, %21, %cst_70 {dimension_numbers = #tpu.dot_dimension_numbers<[1], [0], [0], [1], [0, 0, 1, 1], [], []>, precision = #tpu.contract_precision<fp32>} : vector<4x16xf32>, vector<16x384xf32>, vector<4x384xf32> -> vector<4x384xf32>
    %144 = vector.shape_cast %143 : vector<4x384xf32> to vector<4x1x384xf32>
    %145 = vector.shape_cast %144 : vector<4x1x384xf32> to vector<4x1x384xf32>
    %146 = vector.broadcast %145 : vector<4x1x384xf32> to vector<4x18x384xf32>
    %c0_71 = arith.constant 0 : index
    %c0_72 = arith.constant 0 : index
    %c270 = arith.constant 270 : index
    %c0_73 = arith.constant 0 : index
    %147 = vector.load %arg5[%c0_71, %c0_72, %c270, %c0_73] : memref<1x4x288x384xf32, #tpu.memory_space<vmem>>, vector<1x4x18x384xf32>
    %148 = vector.shape_cast %147 : vector<1x4x18x384xf32> to vector<4x18x384xf32>
    %149 = vector.shape_cast %146 : vector<4x18x384xf32> to vector<1x4x18x384xf32>
    tpu.vector_store %arg5[%c0_71, %c0_72, %c270, %c0_73], %149 {strides = array<i32>} : memref<1x4x288x384xf32, #tpu.memory_space<vmem>>, vector<1x4x18x384xf32>,
    return
  }
  func.func @transform_0(%arg0: i32, %arg1: i32) -> (i32, i32, i32) {
    %c0_i32 = arith.constant 0 : i32
    %c0_i32_0 = arith.constant 0 : i32
    %c0_i32_1 = arith.constant 0 : i32
    return %arg0, %c0_i32, %c0_i32_0 : i32, i32, i32
  }
  func.func @transform_1(%arg0: i32, %arg1: i32) -> (i32, i32, i32) {
    %c0_i32 = arith.constant 0 : i32
    %c0_i32_0 = arith.constant 0 : i32
    %c0_i32_1 = arith.constant 0 : i32
    return %arg1, %c0_i32, %c0_i32_0 : i32, i32, i32
  }
  func.func @transform_2(%arg0: i32, %arg1: i32) -> (i32, i32, i32) {
    %c0_i32 = arith.constant 0 : i32
    %c0_i32_0 = arith.constant 0 : i32
    %c0_i32_1 = arith.constant 0 : i32
    return %arg1, %c0_i32, %c0_i32_0 : i32, i32, i32
  }
  func.func @transform_3(%arg0: i32, %arg1: i32) -> (i32, i32, i32, i32) {
    %c0_i32 = arith.constant 0 : i32
    %c0_i32_0 = arith.constant 0 : i32
    %c0_i32_1 = arith.constant 0 : i32
    return %arg0, %arg1, %c0_i32, %c0_i32_0 : i32, i32, i32, i32
  }
}

</mosaic_0001>

<bundles_post_ra>
// kernel: tpu_custom_call.1
= control target key start
LH: loop header
LB: loop body
LE: loop exit
PB: predicated region body
PF: predicated region fallthrough
CT: control target
= control target key end

     0   :  { %s13743_s0 = inlined_call_operand.hbm [shape: f32[2,4,256], index: 0, kind: input, shape index: {}]   ;;  %s13744_s1 = inlined_call_operand.hbm [shape: f32[2,4,4], index: 1, kind: input, shape index: {}]   ;;  %s13745_s2 = inlined_call_operand.vmem [shape: f32[2,4,1], index: 2, kind: input, shape index: {}]   ;;  %s13746_s3 = inlined_call_operand.hbm [shape: f32[2,8,288,384], index: 3, kind: output, shape index: {}]  }
   0x1   :  { %13753 = sst [smem:[#allocation17_spill]] %s13743_s0 }
   0x2   :  { %13754 = sst [smem:[#allocation18_spill]] %s13745_s2 }
   0x3   :  { %13755 = sst [smem:[#allocation19_spill]] %s13746_s3 }
   0x4   :  { %8 = vsyncpa [#allocation3], 0 }
   0x5   :  { %10 = vsyncpa [#allocation3 + $0x1], 0 }
   0x6   :  { %11 = vsyncpa [#allocation6], 0 }
   0x7   :  { %13 = vsyncpa [#allocation6 + $0x1], 0 }
   0x8   :  { %14 = vsyncpa [#allocation4], 0 }
   0x9   :  { %16 = vsyncpa [#allocation4 + $0x1], 0  ;;  %s10381_s12 = smov 0   ;;  %s10383_s13 = smov 0  }
   0xa   :  { %s10385_s14 = smov 0   ;;  %s10387_s15 = smov 0  }
   0xb   :  { %s10389_s16 = smov 0   ;;  %s10391_s17 = smov 0  }
   0xc   :  { %s10393_s18 = smov 0   ;;  %s10395_s19 = smov 0  }
   0xd   :  { %s10397_s20 = smov 0   ;;  %s10399_s21 = smov 0  }
   0xe   :  { %s10401_s22 = smov 0   ;;  %s10403_s23 = smov 0  }
   0xf   :  { %s10405_s24 = smov 0   ;;  %s10407_s25 = smov 0  }
  0x10 LB: > { %13756 = sst [smem:[#allocation11_spill]] %s10335_s22  ;;  %s9677_s26 = sadd.s32 4294967295, %s10347_s25   ;;  %s10347_s25 = sphi %s10407_s25, %s22_s25   ;;  %s10343_s24 = sphi %s10405_s24, %s13792_s24   ;;  %s10339_s23 = sphi %s10403_s23, %s13803_s23   ;;  %s10335_s22 = sphi %s10401_s22, %s13790_s22   ;;  %s10331_s21 = sphi %s10399_s21, %s13802_s21   ;;  %s10327_s20 = sphi %s10397_s20, %s13801_s20   ;;  %s10323_s19 = sphi %s10395_s19, %s13800_s19   ;;  %s10319_s18 = sphi %s10393_s18, %s13799_s18   ;;  %s10315_s17 = sphi %s10391_s17, %s13798_s17   ;;  %s10311_s16 = sphi %s10389_s16, %s13797_s16   ;;  %s10307_s15 = sphi %s10387_s15, %s13796_s15   ;;  %s10303_s14 = sphi %s10385_s14, %s13795_s14   ;;  %s10299_s13 = sphi %s10383_s13, %s13794_s13   ;;  %s10295_s12 = sphi %s10381_s12, %s13793_s12  }
  0x11   : > { %13757 = sst [smem:[#allocation12_spill]] %s10343_s24  ;;  %s34_s27 = sadd.s32 1, %s10343_s24 }
  0x12   : > { %p48_p0 = scmp.ne.s32.totalorder %s10327_s20, %s10323_s19  ;;  %p49_p1 = scmp.eq.s32.totalorder %s10347_s25, 0 }
  0x13   : > { %p54_p2 = scmp.ne.s32.totalorder %s10323_s19, %s10319_s18  ;;  %p10456_p3 = scmp.eq.s32.totalorder %s9677_s26, 0 }
  0x14   : > { %p10460_p4 = scmp.eq.s32.totalorder %s9677_s26, 3  ;;  %p50_p5 = por %p49_p1, %p48_p0 }
  0x15   : > { %p10468_p6 = por %p10456_p3, %p54_p2  ;;  %p10010_p7 = scmp.lt.s32.totalorder %s10347_s25, 4 }
  0x16   : > { %s158_s5 = sand.u32 1, %s10327_s20   ;;  %s9989_s6 = sshll.u32 %s10343_s24, 3 }
  0x17   : > { %s9681_s7 = sshll.u32 %s158_s5, 3  ;;  %s13761_s0 = sld [smem:[#allocation17_spill]] }
  0x18   : > { %s162_s18 = scalar_lea.vmem [#allocation2], %s9681_s7  ;;  %p10000_p8 = pnand %p10010_p7, %p50_p5 }
  0x19   : > { %s171_s26 = sshll.u32 %s162_s18, 4  ;;  %p9686_p9 = scmp.ge.s32.totalorder %s10347_s25, 1  ;;  %s172_s26 = int_to_ptr.vmem [resolvable:$true] %s171_s26 }
  0x1a   : > { %p202_p10 = scmp.lt.s32.totalorder %s10347_s25, 5  ;;  %s159_s8 = scalar_lea.sflag [#allocation3], %s158_s5 }
  0x1b   : > { %s9678_s7 = sadd.s32 4294967294, %s10347_s25   ;;  %s31_s9 = sadd.s32 1, %s10339_s23 }
  0x1c   : > { %p10482_p11 = pnand %p9686_p9, %p202_p10  ;;  %p32_p12 = scmp.ge.s32.totalorder %s31_s9, 2 }
  0x1d   : > { %s167_s10 = scalar_lea.hbm %s13761_s0, %s9989_s6  ;;  %p74_p13 = scmp.ne.s32.totalorder %s10315_s17, %s10311_s16 }
  0x1e   : > { %s169_s11 = sshll.u32 %s167_s10, 4  ;;  %s67_s10 = sadd.s32 1, %s10315_s17  ;;  %s170_s11 = int_to_ptr.hbm [resolvable:$true] %s169_s11 }
  0x1f   : > { %10002 = dma.hbm_to_vmem [thread:$0]  (!%p10000_p8), %s170_s11, 128, %s172_s26, %s159_s8  }
  0x20   : > { %p80_p0 = scmp.ne.s32.totalorder %s10311_s16, %s10307_s15  ;;  %s121_s18 = sadd.s32 1, %s10303_s14 }
  0x21   : > { %s13805_s9 = smov (%p32_p12, %s31_s9), 0  ;;  %s13807_s27 = smov (!%p32_p12, %s34_s27), %s10343_s24 }
  0x22   : > { %13763 = sst [smem:[#allocation13_spill]] %s13805_s9  ;;  %s64_s5 = ssub.s32 %s10339_s23, %s13805_s9 }
  0x23   : > { %p10503_p2 = por %p74_p13, %p49_p1  ;;  %p36_p5 = scmp.ge.s32.totalorder %s13807_s27, 2 }
  0x24   : > { %p65_p8 = scmp.eq.s32.totalorder %s64_s5, 0  ;;  %p10509_p9 = por %p80_p0, %p10456_p3 }
  0x25   : > { %p131_p10 = scmp.ne.s32.totalorder %s10303_s14, %s10299_s13  ;;  %s13809_s27 = smov (%p36_p5, %s13807_s27), 0 }
  0x26   : > { %13766 = sst [smem:[#allocation14_spill]] %s13809_s27  ;;  %s38_s8 = ssub.s32 %s10343_s24, %s13809_s27 }
  0x27   : > { %s10518_s26 = scalar_select %p65_p8, %s10315_s17, %s67_s10  }
  0x28   : > { %p10524_p1 = por %p10460_p4, %p131_p10  ;;  %p39_p12 = scmp.eq.s32.totalorder %s38_s8, 0 }
  0x29   : > { %13767 = sst [smem:[#allocation15_spill]] %s10518_s26  ;;  %s118_s29 = sor.u32 %s64_s5, %s38_s8 }
  0x2a   : > { %s13768_s28 = scalar_select %p10524_p1, 1, 0 }
  0x2b   : > { %p119_p3 = scmp.eq.s32.totalorder %s118_s29, 0  ;;  %p137_p13 = scmp.ne.s32.totalorder %s10299_s13, %s10295_s12 }
  0x2c   : > { %13769 = sst [smem:[#allocation16_spill]] %s13768_s28  ;;  %s13770_s0 = sadd.s32 1, %s10327_s20 }
  0x2d   : > { %s10533_s9 = scalar_select %p39_p12, %s10327_s20, %s13770_s0  }
  0x2e   : > { %s10536_s3 = scalar_select %p119_p3, %s10303_s14, %s121_s18  }
  0x2f   : > { %p138_p0 = scmp.eq.s32.totalorder %s9678_s7, 3  ;;  %s178_s10 = sand.u32 1, %s10315_s17  }
  0x30   : > { %s9684_s26 = sshll.u32 %s178_s10, 2  ;;  %s9685_s27 = sshll.u32 %s10339_s23, 2 }
  0x31   : > { %p10539_p5 = por %p138_p0, %p137_p13  ;;  %s182_s24 = scalar_lea.vmem [#allocation5], %s9684_s26 }
  0x32   : > { %s190_s28 = sshll.u32 %s182_s24, 4  ;;  %s186_s5 = scalar_lea.hbm %s13744_s1, %s9685_s27  ;;  %s191_s28 = int_to_ptr.vmem [resolvable:$true] %s190_s28 }
  0x33   : > { %s188_s8 = sshll.u32 %s186_s5, 4  ;;  %p10003_p4 = pnand %p10010_p7, %p10503_p2  ;;  %s189_s8 = int_to_ptr.hbm [resolvable:$true] %s188_s8 }
  0x34   : > { %s179_s0 = scalar_lea.sflag [#allocation6], %s178_s10  ;;  %206 = sbr.rel (%p10482_p11) target bundleno = 1064 (0x428), region = 32 }
  0x35   : > { %10005 = dma.hbm_to_vmem [thread:$0]  (!%p10003_p4), %s189_s8, 64, %s191_s28, %s179_s0  }
  0x36   : > { %s208_s7 = sand.u32 (!%p10482_p11), 1, %s10323_s19  }
  0x37   : > { %s9687_s18 = sshll.u32 (!%p10482_p11), %s208_s7, 3  ;;  %s209_s24 = scalar_lea.sflag (!%p10482_p11), [#allocation3], %s208_s7 }
  0x38   : > { %s212_s26 = scalar_lea.vmem (!%p10482_p11), [#allocation2], %s9687_s18 }
  0x39   : > { %10282 = dma.done.wait (%p10468_p6), %s209_s24, 128  }
  0x3a   : > { %10284 = vsyncadd (%p10468_p6), %s209_s24, 4294967168  ;;  %s218_s2 = sand.u32 1, %s10311_s16  }
  0x3b   : > { %s9688_s22 = sshll.u32 %s218_s2, 2  ;;  %s219_s27 = scalar_lea.sflag [#allocation6], %s218_s2 }
  0x3c   : > { %s222_s28 = scalar_lea.vmem [#allocation5], %s9688_s22 }
  0x3d   : > { %10286 = dma.done.wait (%p10509_p9), %s219_s27, 64  }
  0x3e   : > { %10288 = vsyncadd (%p10509_p9), %s219_s27, 4294967232  ;;  %p255_p7 = scmp.lt.s32.totalorder %s10331_s21, 1  ;;  %v10349_v0 = vmov 0   ;;  %vm272_vm0 = vcmask 31744   ;;  %s13772_s10 = sld [smem:[#allocation18_spill]]  ;;  %v261_v1 = vld [vmem:[%s212_s26] sm:$0xff]  ;;  %v573_v24 = vlaneseq }
  0x3f   : > { %10136 = vset.pattern.permute.xlu0 %v10349_v0  ;;  %v260_v2 = vld [vmem:[%s222_s28] sm:$0xf]  ;;  %269 = vst [vmem:[#allocation1] ss:$2 sm:$0xff] %v261_v1  ;;  %vm276_vm1 = vcmask 1043456   ;;  %v10350_v34 = vmov 0.0  }
  0x40   : > { %s256_s6 = scalar_select %p255_p7, %s10331_s21, 1  ;;  %v274_v4 = vsel %vm272_vm0, %v260_v2, 0  ;;  %v581_v25 = vshrl.u32 %v573_v24, 7  ;;  %v574_v27 = vand.u32 127, %v573_v24  ;;  %v10351_v49 = vmov 1.0  }
  0x41   : > { %v298_v5 = vand.u32 4294901760, %v274_v4  ;;  %s10352_s15 = smov 64   ;;  %s10353_s8 = smov 96  }
  0x42   : > { %s9689_s11 = sshll.u32 %s256_s6, 2  ;;  %v582_v26 = vadd.s32 8, %v581_v25  ;;  %v577_v29 = vmul.u32 16, %v574_v27  ;;  %v10573_v31 = vmul.u32 384, %v581_v25  ;;  %v575_v44 = vadd.s32 128, %v574_v27  ;;  %s10354_s0 = smov 112  }
  0x43   : > { %v299_v6 = vsub.f32 %v274_v4, %v298_v5  ;;  %v576_v60 = vadd.s32 256, %v574_v27  ;;  %s10355_s7 = smov 48   ;;  %s10356_s18 = smov 80  }
  0x44   : > { %s258_s5 = scalar_lea.vmem %s13772_s10, %s9689_s11  ;;  %v10568_v28 = vmul.u32 384, %v582_v26  ;;  %v10582_v33 = vadd.s32 384, %v10573_v31  ;;  %vm585_vm5 = vcmp.ge.s32.totalorder %v577_v29, %v10573_v31  ;;  %v578_v46 = vmul.u32 16, %v575_v44  ;;  %s10357_s24 = smov 32  }
  0x45   : > { %v262_v3 = vld [vmem:[%s258_s5] sm:$0xf]  ;;  %v300_v7 = vand.u32 4294901760, %v299_v6  ;;  %v579_v0 = vmul.u32 16, %v576_v60  ;;  %s10358_s26 = smov 16   ;;  %s252_s2 = sand.u32 1, %s10299_s13  }
  0x46   : > { %265 = vperm.xlu0 %10136, %v262_v3   ;;  %v270_v8 = vld.sshfl [vmem:[#allocation1] sm:$0xff pattern:$0x75316420]  ;;  %v271_v9 = vld.sshfl [vmem:[#allocation1 + $0x8] sm:$0xff pattern:$0x75316420]  ;;  %vm588_vm2 = vcmp.ge.s32.totalorder %v577_v29, %v10568_v28  ;;  %vm593_vm6 = vcmp.lt.s32.totalorder %v577_v29, %v10582_v33  ;;  %vm589_vm8 = vcmp.ge.s32.totalorder %v578_v46, %v10568_v28  ;;  %vm586_vm11 = vcmp.ge.s32.totalorder %v578_v46, %v10573_v31 }
  0x47   : > { %v301_v10 = vsub.f32 %v299_v6, %v300_v7  ;;  %v277_v11 = vsel %vm276_vm1, %v270_v8, 0  ;;  %v279_v12 = vsel %vm276_vm1, %v271_v9, 0  ;;  %v10571_v30 = vadd.s32 384, %v10568_v28  ;;  %vm10591_vm7 = vmand %vm585_vm5, %vm593_vm6  ;;  %s9990_s22 = smul.u32 3456, %s252_s2  ;;  %s13785_s28 = sld [smem:[#allocation11_spill]] }
  0x48   : > { %v296_v13 = vand.u32 4294901760, %v277_v11  ;;  %v442_v15 = vand.u32 4294901760, %v279_v12  ;;  %v9690_v39 = vsel %vm10591_vm7, 1.0, %v10350_v34  ;;  %vm594_vm12 = vcmp.lt.s32.totalorder %v578_v46, %v10582_v33  ;;  %s9991_s6 = smul.u32 432, %s10331_s21  ;;  %s13786_s5 = sld [smem:[#allocation19_spill]] }
  0x49   : > { %v302_v14 = vand.u32 4294901760, %v301_v10  ;;  %vm596_vm3 = vcmp.lt.s32.totalorder %v577_v29, %v10571_v30  ;;  %v10602_v40 = vsub.f32 %v9690_v39, %v9690_v39  ;;  %vm597_vm9 = vcmp.lt.s32.totalorder %v578_v46, %v10571_v30  ;;  %vm10641_vm13 = vmand %vm586_vm11, %vm594_vm12  ;;  %s11007_s27 = scalar_lea.vmem [#allocation7], %s9990_s22 }
  0x4a   : > { %v323_v16 = vsub.f32 %v277_v11, %v296_v13  ;;  %297 = vmatpush.msra.mxu0 %v296_v13  ;;  %373 = vmatpush.msra.mxu3 %v296_v13  ;;  %v469_v17 = vsub.f32 %v279_v12, %v442_v15  ;;  %vm10577_vm4 = vmand %vm588_vm2, %vm596_vm3  ;;  %v9691_v53 = vsel %vm10641_vm13, 1.0, %v10350_v34  ;;  %vm590_vm14 = vcmp.ge.s32.totalorder %v579_v0, %v10568_v28 }
  0x4b   : > { %303 = vmatmul.f32.vlgmr.msra.gmra.mxu0 %v302_v14  ;;  %377 = vmatmul.f32.vlgmr.msra.gmra.mxu3 %v300_v7  ;;  %v9693_v35 = vsel %vm10577_vm4, 1.0, %v10350_v34  ;;  %v10607_v42 = vand.u32 4294901760, %v10602_v40  ;;  %vm10620_vm10 = vmand %vm589_vm8, %vm597_vm9  ;;  %v10665_v55 = vsub.f32 %v9691_v53, %v9691_v53  ;;  %vm598_vm15 = vcmp.lt.s32.totalorder %v579_v0, %v10571_v30 }
  0x4c   : > { %350 = vmatpush.msra.mxu2 %v323_v16  ;;  %v324_v18 = vand.u32 4294901760, %v323_v16  ;;  %v470_v19 = vand.u32 4294901760, %v469_v17  ;;  %v10587_v36 = vsub.f32 %v9693_v35, %v9693_v35  ;;  %v9694_v50 = vsel %vm10620_vm10, 1.0, %v10350_v34  ;;  %vm10686_vm2 = vmand %vm590_vm14, %vm598_vm15 }
  0x4d   : > { %353 = vmatmul.f32.vlgmr.msra.gmra.mxu2 %v299_v6  ;;  %v671_v45 = vsub.f32 %v10602_v40, %v10607_v42  ;;  %v10645_v52 = vsub.f32 %v9694_v50, %v9694_v50  ;;  %v10671_v57 = vand.u32 4294901760, %v10665_v55  ;;  %vm587_vm0 = vcmp.ge.s32.totalorder %v579_v0, %v10573_v31  ;;  %s9992_s11 = smul.u32 864, %s13785_s28 }
  0x4e   : > { %399 = vmatpush.msrb.mxu0 %v324_v18  ;;  %v325_v20 = vsub.f32 %v323_v16, %v324_v18  ;;  %443 = vmatpush.msrb.mxu2 %v442_v15  ;;  %v471_v21 = vsub.f32 %v469_v17, %v470_v19  ;;  %v10596_v38 = vand.u32 4294901760, %v10587_v36  ;;  %vm595_vm1 = vcmp.lt.s32.totalorder %v579_v0, %v10582_v33 }
  0x4f   : > { %v10615_v47 = vand.u32 4294901760, %v671_v45  ;;  %v10663_v54 = vand.u32 4294901760, %v10645_v52  ;;  %v830_v59 = vsub.f32 %v10665_v55, %v10671_v57  ;;  %vm10690_vm3 = vmand %vm587_vm0, %vm595_vm1  ;;  %v9695_v11 = vsel %vm10686_vm2, 1.0, %v10350_v34  ;;  %s9549_s4 = sadd.s32 %s9992_s11, %s9991_s6  ;;  %s10217_s6 = scalar_lea.hbm %s13786_s5, 13824 }
  0x50   : > { %496 = vmatpush.msra.mxu0 %v469_v17  ;;  %545 = vmatpush.msra.mxu2 %v470_v19  ;;  %v326_v22 = vand.u32 4294901760, %v325_v20  ;;  %v472_v23 = vand.u32 4294901760, %v471_v21  ;;  %v665_v41 = vsub.f32 %v10587_v36, %v10596_v38  ;;  %vm617_vm5 = vcmask 130048   ;;  %s9986_s21 = sshll.u32 %s9549_s4, 3 }
  0x51   : > { %v824_v56 = vsub.f32 %v10645_v52, %v10663_v54  ;;  %v10679_v62 = vand.u32 4294901760, %v830_v59  ;;  %v10700_v17 = vsub.f32 %v9695_v11, %v9695_v11  ;;  %vm1103_vm6 = vcmask 1040384  }
  0x52   : > { %327 = vmatpush.msra.mxu1 %v326_v22  ;;  %473 = vmatpush.msrb.mxu3 %v472_v23  ;;  %v10610_v43 = vand.u32 4294901760, %v665_v41  ;;  %vm1107_vm8 = vcmask 1041409   ;;  %vm1105_vm9 = vcmask 1041408   ;;  %vm1109_vm11 = vcmask 1042433  }
  0x53   : > { %329 = vmatmul.f32.vlgmr.msra.gmra.mxu1 %v298_v5  ;;  %401 = vmatmul.f32.vlgmr.msrb.gmra.mxu0 %v298_v5  ;;  %v10674_v58 = vand.u32 4294901760, %v824_v56  ;;  %v10711_v25 = vand.u32 4294901760, %v10700_v17  ;;  %vm1112_vm12 = vcmask 1042434   ;;  %vm1114_vm14 = vcmask 1043458  }
  0x54   : > { %421 = vmatpush.msrb.mxu1 %v296_v13  ;;  %475 = vmatmul.f32.vlgmr.msrb.gmra.mxu3 %v298_v5  ;;  %vm1117_vm15 = vcmask 1043459   ;;  %vm1119_vm0 = vcmask 1044483  }
  0x55   : > { %449 = vmatmul.f32.vlgmr.msrb.gmra.mxu2 %v302_v14  ;;  %567 = vmatpush.msra.mxu3 %v442_v15  ;;  %v9692_v14 = vsel %vm10690_vm3, 1.0, %v10350_v34  ;;  %v983_v31 = vsub.f32 %v10700_v17, %v10711_v25 }
  0x56   : > { %519 = vmatpush.msra.mxu1 %v442_v15  ;;  %695 = vmatpush.msrb.mxu2 %v10587_v36  ;;  %v10702_v20 = vsub.f32 %v9692_v14, %v9692_v14 }
  0x57   : > { %9698 = vmatpush.msk.msrb.mxu3 %vm10577_vm4, %v10351_v49  ;;  %9696 = vmatpush.msk.msrb.mxu0 %vm10577_vm4, %v10351_v49  ;;  %v10738_v44 = vand.u32 4294901760, %v983_v31 }
  0x58   : > { %698 = vmatpush.msrb.mxu2 %v10602_v40  ;;  %v10718_v27 = vand.u32 4294901760, %v10702_v20 }
  0x59   : > { %9699 = vmatpush.msk.msrb.mxu3 %vm10591_vm7, %v10351_v49  ;;  %9697 = vmatpush.msk.msrb.mxu0 %vm10591_vm7, %v10351_v49 }
  0x5a   : > { %v989_v39 = vsub.f32 %v10702_v20, %v10718_v27 }
  0x5b   : > { %423 = vmatmul.f32.vlgmr.msrb.gmra.mxu1 %v298_v5  ;;  %499 = vmatmul.f32.vlgmr.msra.gmra.mxu0 %v299_v6 }
  0x5c   : > { %569 = vmatmul.f32.vlgmr.msra.gmra.mxu3 %v298_v5  ;;  %667 = vmatpush.msrb.mxu1 %v10610_v43  ;;  %v10744_v50 = vand.u32 4294901760, %v989_v39 }
  0x5d   : > { %547 = vmatmul.f32.vlgmr.msra.gmra.mxu2 %v298_v5  ;;  %747 = vmatpush.msra.mxu0 %v10596_v38 }
  0x5e   : > { %673 = vmatpush.msrb.mxu1 %v10615_v47  ;;  %9702 = vmatpush.msk.msra.mxu2 %vm10620_vm10, %v10351_v49 }
  0x5f   : > { %751 = vmatpush.msra.mxu0 %v10607_v42  ;;  %826 = vmatpush.msra.mxu3 %v10674_v58 }
  0x60   : > { %9703 = vmatpush.msk.msra.mxu2 %vm10641_vm13, %v10351_v49 }
  0x61   : > { %832 = vmatpush.msra.mxu3 %v10679_v62 }
  0x63   : > { %523 = vmatmul.f32.vlgmr.msra.gmra.mxu1 %v300_v7 }
  0x64   : > { %9700 = vmatpush.msk.msra.mxu1 %vm10577_vm4, %v10351_v49 }
  0x66   : > { %9701 = vmatpush.msk.msra.mxu1 %vm10591_vm7, %v10351_v49 }
  0xb8   : > { %v266_v63 = vpop.permute.xlu0 %265 }
  0xc8   : > { %v304_v61 = vpop.f32.mrf.mxu0 }
  0xc9   : > { %v305_v1 = vadd.f32 %v304_v61, %v266_v63 }
  0xce   : > { %v378_v2 = vpop.f32.mrf.mxu3 }
  0xd0   : > { %v330_v3 = vpop.f32.mrf.mxu1  ;;  %v354_v4 = vpop.f32.mrf.mxu2 }
  0xd1   : > { %v331_v5 = vadd.f32 %v330_v3, %v305_v1  ;;  %v402_v6 = vpop.f32.mrf.mxu0 }
  0xd3   : > { %v355_v8 = vadd.f32 %v354_v4, %v331_v5 }
  0xd5   : > { %v379_v10 = vadd.f32 %v378_v2, %v355_v8 }
  0xd7   : > { %v403_v12 = vadd.f32 %v402_v6, %v379_v10  ;;  %v476_v13 = vpop.f32.mrf.mxu3 }
  0xd8   : > { %v424_v15 = vpop.f32.mrf.mxu1  ;;  %v450_v16 = vpop.f32.mrf.mxu2 }
  0xd9   : > { %v425_v18 = vadd.f32 %v424_v15, %v403_v12  ;;  %v451_v19 = vadd.f32 %v450_v16, %v266_v63  ;;  %v500_v24 = vpop.f32.mrf.mxu0 }
  0xdb   : > { %v619_v21 = vsel %vm617_vm5, %v425_v18, 0  ;;  %v477_v22 = vadd.f32 %v476_v13, %v451_v19  ;;  %2853 = vrot.lane.b32.xlu2 %v425_v18, %s10352_s15  ;;  %1739 = vrot.lane.b32.xlu1 %v425_v18, %s10353_s8 }
  0xdc   : > { %v10707_v23 = vand.u32 4294901760, %v619_v21  ;;  %1182 = vrot.lane.b32.xlu0 %v425_v18, %s10354_s0 }
  0xdd   : > { %v501_v28 = vadd.f32 %v500_v24, %v477_v22 }
  0xde   : > { %675 = vmatmul.f32.vlgmr.msrb.gmra.mxu1 %v10707_v23  ;;  %v10715_v26 = vsub.f32 %v619_v21, %v10707_v23 }
  0xdf   : > { %9704 = vmatpush.msk.msrb.mxu1 %vm10620_vm10, %v10351_v49  ;;  %v570_v46 = vpop.f32.mrf.mxu3 }
  0xe0   : > { %v524_v29 = vpop.f32.mrf.mxu1  ;;  %701 = vmatmul.f32.vlgmr.msrb.gmra.mxu2 %v10715_v26  ;;  %v641_v30 = vand.u32 4294901760, %v10715_v26  ;;  %v548_v34 = vpop.f32.mrf.mxu2 }
  0xe1   : > { %v525_v33 = vadd.f32 %v524_v29, %v501_v28  ;;  %9705 = vmatpush.msk.msrb.mxu1 %vm10641_vm13, %v10351_v49  ;;  %906 = vmatpush.msrb.mxu2 %v10663_v54 }
  0xe2   : > { %726 = vmatmul.f32.vlgmr.msrb.gmra.mxu3 %v641_v30  ;;  %v642_v35 = vsub.f32 %v10715_v26, %v641_v30 }
  0xe3   : > { %3410 = vrot.lane.b32.xlu2 %v425_v18, %s10355_s7  ;;  %2296 = vrot.lane.b32.xlu1 %v425_v18, %s10356_s18  ;;  %v549_v45 = vadd.f32 %v548_v34, %v525_v33 }
  0xe4   : > { %3967 = vrot.lane.b32.xlu0 %v425_v18, %s10357_s24  ;;  %v643_v41 = vand.u32 4294901760, %v642_v35  ;;  %910 = vmatpush.msrb.mxu2 %v10671_v57 }
  0xe5   : > { %9706 = vmatpush.msk.msrb.mxu3 %vm10620_vm10, %v10351_v49  ;;  %v10751_v53 = vadd.f32 %v570_v46, %v549_v45 }
  0xe6   : > { %644 = vmatmul.f32.vlgmr.msrb.gmra.mxu0 %v643_v41  ;;  %776 = vmatmul.f32.vlgmr.msra.gmra.mxu1 %v10707_v23 }
  0xe7   : > { %9707 = vmatpush.msk.msrb.mxu3 %vm10641_vm13, %v10351_v49  ;;  %854 = vmatpush.msrb.mxu0 %v10645_v52 }
  0xe8   : > { %803 = vmatmul.f32.vlgmr.msra.gmra.mxu2 %v643_v41  ;;  %985 = vmatpush.msra.mxu1 %v10738_v44 }
  0xe9   : > { %857 = vmatpush.msrb.mxu0 %v10665_v55  ;;  %1013 = vmatpush.msra.mxu2 %v10700_v17 }
  0xea   : > { %834 = vmatmul.f32.vlgmr.msra.gmra.mxu3 %v10707_v23  ;;  %991 = vmatpush.msra.mxu1 %v10744_v50 }
  0xeb   : > { %5637 = vrot.lane.b32.xlu2 %v10751_v53, %s10354_s0  ;;  %4524 = vrot.lane.b32.xlu1 %v425_v18, %s10358_s26  ;;  %s9552_s0 = sshll.u32 %s11007_s27, 4  ;;  %s9553_s0 = int_to_ptr.vmem [resolvable:$true] %s9552_s0 }
  0xec   : > { %6194 = vrot.lane.b32.xlu0 %v10751_v53, %s10353_s8  ;;  %1016 = vmatpush.msra.mxu2 %v10702_v20 }
  0xed   : > { %9710 = vmatpush.msk.msra.mxu3 %vm10686_vm2, %v10351_v49 }
  0xee   : > { %753 = vmatmul.f32.vlgmr.msra.gmra.mxu0 %v10707_v23  ;;  %885 = vmatmul.f32.vlgmr.msrb.gmra.mxu1 %v641_v30 }
  0xef   : > { %9711 = vmatpush.msk.msra.mxu3 %vm10690_vm3, %v10351_v49  ;;  %9708 = vmatpush.msk.msra.mxu0 %vm10686_vm2, %v10351_v49 }
  0xf0   : > { %912 = vmatmul.f32.vlgmr.msrb.gmra.mxu2 %v10707_v23  ;;  %9712 = vmatpush.msk.msrb.mxu1 %vm10686_vm2, %v10351_v49 }
  0xf1   : > { %9709 = vmatpush.msk.msra.mxu0 %vm10690_vm3, %v10351_v49  ;;  %9714 = vmatpush.msk.msrb.mxu2 %vm10577_vm4, %v10351_v49 }
  0xf2   : > { %935 = vmatmul.f32.vlgmr.msrb.gmra.mxu3 %v10707_v23  ;;  %9713 = vmatpush.msk.msrb.mxu1 %vm10690_vm3, %v10351_v49 }
  0xf3   : > { %7308 = vrot.lane.b32.xlu2 %v10751_v53, %s10352_s15  ;;  %6751 = vrot.lane.b32.xlu1 %v10751_v53, %s10356_s18  ;;  %s9551_s15 = scalar_lea.hbm %s13786_s5, %s9986_s21  ;;  %s9537_s18 = scalar_lea.sflag [#allocation4], %s252_s2 }
  0xf4   : > { %7865 = vrot.lane.b32.xlu0 %v10751_v53, %s10355_s7  ;;  %1232 = vmatpush.msrb.mxu3 %v10610_v43  ;;  %s9554_s7 = sshll.u32 %s9551_s15, 4  ;;  %s9555_s7 = int_to_ptr.hbm [resolvable:$true] %s9554_s7 }
  0xf5   : > { %9715 = vmatpush.msk.msrb.mxu2 %vm10591_vm7, %v10351_v49 }
  0xf6   : > { %860 = vmatmul.f32.vlgmr.msrb.gmra.mxu0 %v10715_v26  ;;  %993 = vmatmul.f32.vlgmr.msra.gmra.mxu1 %v10707_v23 }
  0xf7   : > { %1065 = vmatpush.msrb.mxu0 %v10711_v25  ;;  %1238 = vmatpush.msrb.mxu3 %v10615_v47 }
  0xf8   : > { %1019 = vmatmul.f32.vlgmr.msra.gmra.mxu2 %v10715_v26  ;;  %9716 = vmatpush.msk.msra.mxu1 %vm10577_vm4, %v10351_v49 }
  0xf9   : > { %1069 = vmatpush.msrb.mxu0 %v10718_v27  ;;  %1312 = vmatpush.msra.mxu2 %v10596_v38 }
  0xfa   : > { %1044 = vmatmul.f32.vlgmr.msra.gmra.mxu3 %v641_v30  ;;  %9717 = vmatpush.msk.msra.mxu1 %vm10591_vm7, %v10351_v49 }
  0xfb   : > { %8979 = vrot.lane.b32.xlu2 %v10751_v53, %s10358_s26  ;;  %8422 = vrot.lane.b32.xlu1 %v10751_v53, %s10357_s24  ;;  %s10211_s24 = sshra.s32 %s9555_s7, 4  ;;  %s10212_s24 = int_to_ptr.hbm [resolvable:$true] %s10211_s24 }
  0xfc   : > { %9718 = vmatpush.msk.msra.mxu3 %vm10577_vm4, %v10351_v49  ;;  %1316 = vmatpush.msra.mxu2 %v10607_v42  ;;  %s10213_s26 = scalar_lea.hbm %s10212_s24, 3456  ;;  %p10218_p8 = scmp.lt.s32.totalorder %s10212_s24, %s13786_s5 }
  0xfd   : > { %p10214_p6 = scmp.ne.s32.totalorder %s10212_s24, %s10213_s26  ;;  %p10219_p9 = scmp.lt.s32.totalorder %s10217_s6, %s10213_s26 }
  0xfe   : > { %962 = vmatmul.f32.vlgmr.msra.gmra.mxu0 %v643_v41  ;;  %1094 = vmatmul.f32.vlgmr.msrb.gmra.mxu1 %v10707_v23 }
  0xff   : > { %1260 = vmatpush.msra.mxu0 %v10587_v36  ;;  %9719 = vmatpush.msk.msra.mxu3 %vm10591_vm7, %v10351_v49  ;;  %p10215_p11 = pnand %p10214_p6, %p10524_p1  ;;  %p10220_p10 = por %p10219_p9, %p10218_p8 }
 0x100   : > { %1391 = vmatpush.msrb.mxu1 %v10674_v58 }
 0x101   : > { %1263 = vmatpush.msra.mxu0 %v10602_v40  ;;  %p10216_p2 = pneg %p10215_p11 }
 0x102   : > { %1397 = vmatpush.msrb.mxu1 %v10679_v62 }
 0x103   : > { %p10221_p12 = pnand %p10220_p10, %p10216_p2 }
 0x106   : > { %1071 = vmatmul.f32.vlgmr.msrb.gmra.mxu0 %v10707_v23 }
 0x107   : > { %9720 = vmatpush.msk.msrb.mxu0 %vm10620_vm10, %v10351_v49 }
 0x109   : > { %9721 = vmatpush.msk.msrb.mxu0 %vm10641_vm13, %v10351_v49 }
 0x14d   : > { %v1740_v2 = vpop.permute.xlu1 %1739 }
 0x14e   : > { %v1183_v56 = vpop.permute.xlu0 %1182  ;;  %v1741_v4 = vsel %vm617_vm5, %v1740_v2, 0 }
 0x14f   : > { %v1184_v59 = vsel %vm617_vm5, %v1183_v56, 0  ;;  %v10865_v5 = vand.u32 4294901760, %v1741_v4 }
 0x150   : > { %v10832_v60 = vand.u32 4294901760, %v1184_v59 }
 0x151   : > { %v10884_v11 = vsub.f32 %v1741_v4, %v10865_v5 }
 0x152   : > { %v1205_v61 = vsub.f32 %v1184_v59, %v10832_v60  ;;  %1240 = vmatmul.f32.vlgmr.msrb.gmra.mxu3 %v10832_v60 }
 0x153   : > { %9722 = vmatpush.msk.msrb.mxu3 %vm10620_vm10, %v10351_v49  ;;  %v10898_v13 = vand.u32 4294901760, %v10884_v11 }
 0x154   : > { %1266 = vmatmul.f32.vlgmr.msra.gmra.mxu0 %v1205_v61  ;;  %v1206_v63 = vand.u32 4294901760, %v1205_v61 }
 0x155   : > { %9723 = vmatpush.msk.msrb.mxu3 %vm10641_vm13, %v10351_v49  ;;  %1471 = vmatpush.msra.mxu0 %v10663_v54  ;;  %v1764_v18 = vsub.f32 %v10884_v11, %v10898_v13 }
 0x156   : > { %1291 = vmatmul.f32.vlgmr.msra.gmra.mxu1 %v1206_v63  ;;  %v1207_v0 = vsub.f32 %v1205_v61, %v1206_v63 }
 0x157   : > { %1475 = vmatpush.msra.mxu0 %v10671_v57  ;;  %9724 = vmatpush.msk.msra.mxu1 %vm10620_vm10, %v10351_v49  ;;  %v10920_v21 = vand.u32 4294901760, %v1764_v18 }
 0x158   : > { %v1208_v1 = vand.u32 4294901760, %v1207_v0 }
 0x159   : > { %9725 = vmatpush.msk.msra.mxu1 %vm10641_vm13, %v10351_v49 }
 0x15a   : > { %1209 = vmatmul.f32.vlgmr.msrb.gmra.mxu2 %v1208_v1  ;;  %1341 = vmatmul.f32.vlgmr.msra.gmra.mxu3 %v10832_v60 }
 0x15b   : > { %1419 = vmatpush.msrb.mxu2 %v10645_v52  ;;  %1550 = vmatpush.msra.mxu3 %v10738_v44  ;;  %v676_v3 = vpop.f32.mrf.mxu1 }
 0x15c   : > { %1368 = vmatmul.f32.vlgmr.msrb.gmra.mxu0 %v1208_v1 }
 0x15d   : > { %1422 = vmatpush.msrb.mxu2 %v10665_v55  ;;  %1556 = vmatpush.msra.mxu3 %v10744_v50 }
 0x15e   : > { %1399 = vmatmul.f32.vlgmr.msrb.gmra.mxu1 %v10832_v60  ;;  %1578 = vmatpush.msrb.mxu0 %v10700_v17 }
 0x15f   : > { %9728 = vmatpush.msk.msrb.mxu1 %vm10686_vm2, %v10351_v49 }
 0x160   : > { %1581 = vmatpush.msrb.mxu0 %v10702_v20 }
 0x161   : > { %9729 = vmatpush.msk.msrb.mxu1 %vm10690_vm3, %v10351_v49 }
 0x162   : > { %1318 = vmatmul.f32.vlgmr.msra.gmra.mxu2 %v10832_v60  ;;  %1450 = vmatmul.f32.vlgmr.msrb.gmra.mxu3 %v1206_v63 }
 0x163   : > { %v645_v6 = vpop.f32.mrf.mxu0  ;;  %v702_v8 = vpop.f32.mrf.mxu2  ;;  %9726 = vmatpush.msk.msra.mxu2 %vm10686_vm2, %v10351_v49  ;;  %9730 = vmatpush.msk.msrb.mxu3 %vm10686_vm2, %v10351_v49 }
 0x164   : > { %1477 = vmatmul.f32.vlgmr.msra.gmra.mxu0 %v10832_v60  ;;  %v10890_v12 = vpop.f32.mrf.mxu1  ;;  %v677_v29 = vadd.f32 %v676_v3, %v645_v6 }
 0x165   : > { %v10875_v10 = vpop.f32.mrf.mxu3  ;;  %9727 = vmatpush.msk.msra.mxu2 %vm10690_vm3, %v10351_v49  ;;  %9731 = vmatpush.msk.msrb.mxu3 %vm10690_vm3, %v10351_v49 }
 0x166   : > { %1500 = vmatmul.f32.vlgmr.msra.gmra.mxu1 %v10832_v60  ;;  %9732 = vmatpush.msk.msra.mxu0 %vm10577_vm4, %v10351_v49  ;;  %v703_v35 = vadd.f32 %v702_v8, %v677_v29 }
 0x167   : > { %1789 = vmatpush.msra.mxu1 %v10610_v43 }
 0x168   : > { %9733 = vmatpush.msk.msra.mxu0 %vm10591_vm7, %v10351_v49  ;;  %v728_v46 = vadd.f32 %v10875_v10, %v703_v35  ;;  %v2297_v10 = vpop.permute.xlu1 %2296 }
 0x169   : > { %1795 = vmatpush.msra.mxu1 %v10615_v47 }
 0x16a   : > { %1425 = vmatmul.f32.vlgmr.msrb.gmra.mxu2 %v1205_v61  ;;  %1558 = vmatmul.f32.vlgmr.msra.gmra.mxu3 %v10832_v60 }
 0x16b   : > { %v754_v14 = vpop.f32.mrf.mxu0  ;;  %v804_v15 = vpop.f32.mrf.mxu2  ;;  %1630 = vmatpush.msrb.mxu2 %v10711_v25  ;;  %9734 = vmatpush.msk.msra.mxu3 %vm10577_vm4, %v10351_v49 }
 0x16c   : > { %1584 = vmatmul.f32.vlgmr.msrb.gmra.mxu0 %v1205_v61  ;;  %v886_v19 = vpop.f32.mrf.mxu1  ;;  %v755_v61 = vadd.f32 %v754_v14, %v728_v46 }
 0x16d   : > { %v835_v16 = vpop.f32.mrf.mxu3  ;;  %1634 = vmatpush.msrb.mxu2 %v10718_v27  ;;  %9735 = vmatpush.msk.msra.mxu3 %vm10591_vm7, %v10351_v49 }
 0x16e   : > { %1609 = vmatmul.f32.vlgmr.msrb.gmra.mxu1 %v1206_v63  ;;  %1869 = vmatpush.msrb.mxu0 %v10596_v38  ;;  %v836_v22 = vadd.f32 %v835_v16, %v804_v15  ;;  %v10980_v4 = vadd.f32 %v10890_v12, %v755_v61 }
 0x16f   : > { %9736 = vmatpush.msk.msrb.mxu1 %vm10577_vm4, %v10351_v49 }
 0x170   : > { %1873 = vmatpush.msrb.mxu0 %v10607_v42 }
 0x171   : > { %9737 = vmatpush.msk.msrb.mxu1 %vm10591_vm7, %v10351_v49 }
 0x172   : > { %1527 = vmatmul.f32.vlgmr.msra.gmra.mxu2 %v1208_v1  ;;  %1659 = vmatmul.f32.vlgmr.msrb.gmra.mxu3 %v10832_v60 }
 0x173   : > { %v861_v23 = vpop.f32.mrf.mxu0  ;;  %1817 = vmatpush.msra.mxu2 %v10587_v36  ;;  %1948 = vmatpush.msrb.mxu3 %v10674_v58  ;;  %v913_v24 = vpop.f32.mrf.mxu2 }
 0x174   : > { %1766 = vmatmul.f32.vlgmr.msra.gmra.mxu0 %v10920_v21  ;;  %v862_v26 = vadd.f32 %v861_v23, %v836_v22  ;;  %v994_v31 = vpop.f32.mrf.mxu1  ;;  %v2298_v22 = vsel %vm617_vm5, %v2297_v10, 0 }
 0x175   : > { %1820 = vmatpush.msra.mxu2 %v10602_v40  ;;  %1954 = vmatpush.msrb.mxu3 %v10679_v62  ;;  %v936_v28 = vpop.f32.mrf.mxu3 }
 0x176   : > { %1797 = vmatmul.f32.vlgmr.msra.gmra.mxu1 %v10865_v5  ;;  %1976 = vmatpush.msra.mxu0 %v10645_v52  ;;  %v887_v30 = vadd.f32 %v886_v19, %v862_v26 }
 0x177   : > { %9740 = vmatpush.msk.msra.mxu1 %vm10620_vm10, %v10351_v49 }
 0x178   : > { %1979 = vmatpush.msra.mxu0 %v10665_v55  ;;  %v914_v39 = vadd.f32 %v913_v24, %v887_v30 }
 0x179   : > { %9741 = vmatpush.msk.msra.mxu1 %vm10641_vm13, %v10351_v49 }
 0x17a   : > { %1636 = vmatmul.f32.vlgmr.msrb.gmra.mxu2 %v10832_v60  ;;  %1848 = vmatmul.f32.vlgmr.msra.gmra.mxu3 %v10898_v13  ;;  %v937_v56 = vadd.f32 %v936_v28, %v914_v39 }
 0x17b   : > { %v963_v33 = vpop.f32.mrf.mxu0  ;;  %9738 = vmatpush.msk.msrb.mxu2 %vm10620_vm10, %v10351_v49  ;;  %9742 = vmatpush.msk.msra.mxu3 %vm10620_vm10, %v10351_v49  ;;  %v1020_v41 = vpop.f32.mrf.mxu2 }
 0x17c   : > { %v995_v34 = vadd.f32 %v994_v31, %v963_v33  ;;  %1875 = vmatmul.f32.vlgmr.msrb.gmra.mxu0 %v10865_v5  ;;  %v10969_v1 = vrot.slane %v937_v56, 7  ;;  %v1095_v2 = vpop.f32.mrf.mxu1  ;;  %v2854_v56 = vpop.permute.xlu2 %2853 }
 0x17d   : > { %9739 = vmatpush.msk.msrb.mxu2 %vm10641_vm13, %v10351_v49  ;;  %9743 = vmatpush.msk.msra.mxu3 %vm10641_vm13, %v10351_v49  ;;  %v1045_v59 = vpop.f32.mrf.mxu3 }
 0x17e   : > { %1898 = vmatmul.f32.vlgmr.msrb.gmra.mxu1 %v10865_v5  ;;  %v1021_v45 = vadd.f32 %v1020_v41, %v995_v34  ;;  %9744 = vmatpush.msk.msrb.mxu0 %vm10686_vm2, %v10351_v49  ;;  %v1104_v8 = vsel %vm1103_vm6, %v10980_v4, %v10969_v1  ;;  %v1108_v12 = vsel %vm1107_vm8, %v10980_v4, %v10969_v1 }
 0x17f   : > { %2107 = vmatpush.msrb.mxu1 %v10738_v44  ;;  %v1113_v26 = vsel %vm1112_vm12, %v10980_v4, %v10969_v1  ;;  %v1118_v34 = vsel %vm1117_vm15, %v10980_v4, %v10969_v1 }
 0x180   : > { %9745 = vmatpush.msk.msrb.mxu0 %vm10690_vm3, %v10351_v49  ;;  %v1046_v60 = vadd.f32 %v1045_v59, %v1021_v45 }
 0x181   : > { %2113 = vmatpush.msrb.mxu1 %v10744_v50 }
 0x182   : > { %1823 = vmatmul.f32.vlgmr.msra.gmra.mxu2 %v10884_v11  ;;  %1956 = vmatmul.f32.vlgmr.msrb.gmra.mxu3 %v10865_v5 }
 0x183   : > { %v1072_v63 = vpop.f32.mrf.mxu0  ;;  %2028 = vmatpush.msra.mxu2 %v10663_v54  ;;  %9746 = vmatpush.msk.msrb.mxu3 %vm10686_vm2, %v10351_v49 }
 0x184   : > { %v1073_v0 = vadd.f32 %v1072_v63, %v1046_v60  ;;  %1982 = vmatmul.f32.vlgmr.msra.gmra.mxu0 %v10884_v11  ;;  %v2855_v63 = vsel %vm617_vm5, %v2854_v56, 0 }
 0x185   : > { %2032 = vmatpush.msra.mxu2 %v10671_v57  ;;  %9747 = vmatpush.msk.msrb.mxu3 %vm10690_vm3, %v10351_v49 }
 0x186   : > { %v1096_v3 = vadd.f32 %v1095_v2, %v1073_v0  ;;  %2007 = vmatmul.f32.vlgmr.msra.gmra.mxu1 %v10898_v13  ;;  %2187 = vmatpush.msra.mxu0 %v10711_v25  ;;  %v11132_v0 = vand.u32 4294901760, %v2855_v63 }
 0x187   : > { %9748 = vmatpush.msk.msra.mxu1 %vm10686_vm2, %v10351_v49 }
 0x188   : > { %v10985_v6 = vrot.slane %v1096_v3, 6  ;;  %2191 = vmatpush.msra.mxu0 %v10718_v27  ;;  %v11154_v1 = vsub.f32 %v2855_v63, %v11132_v0 }
 0x189   : > { %9749 = vmatpush.msk.msra.mxu1 %vm10690_vm3, %v10351_v49 }
 0x18a   : > { %v1106_v14 = vsel %vm1105_vm9, %v1104_v8, %v10985_v6  ;;  %1925 = vmatmul.f32.vlgmr.msrb.gmra.mxu2 %v10920_v21  ;;  %v1110_v15 = vsel %vm1109_vm11, %v1108_v12, %v10985_v6  ;;  %2057 = vmatmul.f32.vlgmr.msra.gmra.mxu3 %v10865_v5  ;;  %v1115_v30 = vsel %vm1114_vm14, %v1113_v26, %v10985_v6  ;;  %v11169_v2 = vand.u32 4294901760, %v11154_v1  ;;  %v3411_v8 = vpop.permute.xlu2 %3410 }
 0x18b   : > { %v1122_v16 = vperm.slane %v1106_v14, 0  ;;  %2135 = vmatpush.msrb.mxu2 %v10700_v17  ;;  %v1123_v18 = vperm.slane %v1106_v14, 1  ;;  %v1124_v19 = vperm.slane %v1106_v14, 2  ;;  %2346 = vmatpush.msra.mxu3 %v10610_v43  ;;  %v1111_v23 = vrot.slane %v1110_v15, 1 }
 0x18c   : > { %2084 = vmatmul.f32.vlgmr.msrb.gmra.mxu0 %v10920_v21  ;;  %v11020_v21 = vand.u32 4294901760, %v2298_v22  ;;  %v1120_v39 = vsel %vm1119_vm0, %v1118_v34, %v10985_v6  ;;  %v2878_v3 = vsub.f32 %v11154_v1, %v11169_v2  ;;  %v3412_v12 = vsel %vm617_vm5, %v3411_v8, 0 }
 0x18d   : > { %1146 = vst [vmem:[%s11007_s27] sm:$0xff] %v1122_v16  ;;  %2138 = vmatpush.msrb.mxu2 %v10702_v20  ;;  %2374 = vmatpush.msrb.mxu0 %v10587_v36  ;;  %v1125_v24 = vperm.slane %v1111_v23, 0  ;;  %v1126_v28 = vperm.slane %v1111_v23, 1  ;;  %v1127_v31 = vperm.slane %v1111_v23, 2  ;;  %v1121_v45 = vrot.slane %v1120_v39, 3 }
 0x18e   : > { %1147 = vst [vmem:[%s11007_s27 + $0x8] sm:$0xff] %v1123_v18  ;;  %2115 = vmatmul.f32.vlgmr.msrb.gmra.mxu1 %v10865_v5  ;;  %2352 = vmatpush.msra.mxu3 %v10615_v47  ;;  %v11038_v29 = vsub.f32 %v2298_v22, %v11020_v21  ;;  %v2879_v4 = vand.u32 4294901760, %v2878_v3  ;;  %v11270_v15 = vand.u32 4294901760, %v3412_v12 }
 0x18f   : > { %1148 = vst [vmem:[%s11007_s27 + $0x10] sm:$0xff] %v1124_v19  ;;  %2377 = vmatpush.msrb.mxu0 %v10602_v40  ;;  %9752 = vmatpush.msk.msrb.mxu1 %vm10577_vm4, %v10351_v49  ;;  %v1131_v59 = vperm.slane %v1121_v45, 0  ;;  %v1132_v60 = vperm.slane %v1121_v45, 1  ;;  %v1133_v61 = vperm.slane %v1121_v45, 2 }
 0x190   : > { %1149 = vst [vmem:[%s11007_s27 + $0x18] sm:$0xff] %v1122_v16  ;;  %v11066_v33 = vand.u32 4294901760, %v11038_v29 }
 0x191   : > { %1150 = vst [vmem:[%s11007_s27 + $0x20] sm:$0xff] %v1123_v18  ;;  %9753 = vmatpush.msk.msrb.mxu1 %vm10591_vm7, %v10351_v49 }
 0x192   : > { %1151 = vst [vmem:[%s11007_s27 + $0x28] sm:$0xff] %v1124_v19  ;;  %2034 = vmatmul.f32.vlgmr.msra.gmra.mxu2 %v10865_v5  ;;  %2166 = vmatmul.f32.vlgmr.msrb.gmra.mxu3 %v10898_v13  ;;  %v1116_v13 = vrot.slane %v1115_v30, 2 }
 0x193   : > { %1152 = vst [vmem:[%s11007_s27 + $0x30] sm:$0x3] %v1122_v16  ;;  %9750 = vmatpush.msk.msra.mxu2 %vm10577_vm4, %v10351_v49  ;;  %9754 = vmatpush.msk.msrb.mxu3 %vm10577_vm4, %v10351_v49 }
 0x194   : > { %1153 = vst [vmem:[%s11007_s27 + $0x38] sm:$0x3] %v1123_v18  ;;  %2193 = vmatmul.f32.vlgmr.msra.gmra.mxu0 %v10865_v5  ;;  %v1129_v35 = vperm.slane %v1116_v13, 1  ;;  %v1130_v41 = vperm.slane %v1116_v13, 2 }
 0x195   : > { %1154 = vst [vmem:[%s11007_s27 + $0x40] sm:$0x3] %v1124_v19  ;;  %9751 = vmatpush.msk.msra.mxu2 %vm10591_vm7, %v10351_v49  ;;  %9756 = vmatpush.msk.msra.mxu0 %vm10620_vm10, %v10351_v49  ;;  %v11281_v19 = vsub.f32 %v3412_v12, %v11270_v15 }
 0x196   : > { %1155 = vst [vmem:[%s11007_s27 + $0x360] sm:$0xff] %v1125_v24  ;;  %2216 = vmatmul.f32.vlgmr.msra.gmra.mxu1 %v10865_v5  ;;  %9755 = vmatpush.msk.msrb.mxu3 %vm10591_vm7, %v10351_v49  ;;  %v1128_v5 = vperm.slane %v1116_v13, 0 }
 0x197   : > { %1156 = vst [vmem:[%s11007_s27 + $0x368] sm:$0xff] %v1126_v28  ;;  %9757 = vmatpush.msk.msra.mxu0 %vm10641_vm13, %v10351_v49  ;;  %2505 = vmatpush.msra.mxu1 %v10674_v58 }
 0x198   : > { %1157 = vst [vmem:[%s11007_s27 + $0x370] sm:$0xff] %v1127_v31 }
 0x199   : > { %1158 = vst [vmem:[%s11007_s27 + $0x378] sm:$0xff] %v1125_v24  ;;  %2511 = vmatpush.msra.mxu1 %v10679_v62 }
 0x19a   : > { %1159 = vst [vmem:[%s11007_s27 + $0x380] sm:$0xff] %v1126_v28  ;;  %2141 = vmatmul.f32.vlgmr.msrb.gmra.mxu2 %v10884_v11  ;;  %2354 = vmatmul.f32.vlgmr.msra.gmra.mxu3 %v11020_v21  ;;  %v2321_v11 = vsub.f32 %v11038_v29, %v11066_v33 }
 0x19b   : > { %1160 = vst [vmem:[%s11007_s27 + $0x388] sm:$0xff] %v1127_v31  ;;  %2426 = vmatpush.msrb.mxu2 %v10596_v38  ;;  %9758 = vmatpush.msk.msra.mxu3 %vm10620_vm10, %v10351_v49 }
 0x19c   : > { %1161 = vst [vmem:[%s11007_s27 + $0x390] sm:$0x3] %v1125_v24  ;;  %2380 = vmatmul.f32.vlgmr.msrb.gmra.mxu0 %v11038_v29  ;;  %v11101_v46 = vand.u32 4294901760, %v2321_v11 }
 0x19d   : > { %1162 = vst [vmem:[%s11007_s27 + $0x398] sm:$0x3] %v1126_v28  ;;  %2430 = vmatpush.msrb.mxu2 %v10607_v42  ;;  %2585 = vmatpush.msrb.mxu0 %v10663_v54 }
 0x19e   : > { %1163 = vst [vmem:[%s11007_s27 + $0x3a0] sm:$0x3] %v1127_v31  ;;  %2405 = vmatmul.f32.vlgmr.msrb.gmra.mxu1 %v11066_v33  ;;  %9759 = vmatpush.msk.msra.mxu3 %vm10641_vm13, %v10351_v49 }
 0x19f   : > { %1164 = vst [vmem:[%s11007_s27 + $0x6c0] sm:$0xff] %v1128_v5  ;;  %2589 = vmatpush.msrb.mxu0 %v10671_v57  ;;  %9760 = vmatpush.msk.msrb.mxu1 %vm10620_vm10, %v10351_v49 }
 0x1a0   : > { %1165 = vst [vmem:[%s11007_s27 + $0x6c8] sm:$0xff] %v1129_v35 }
 0x1a1   : > { %1166 = vst [vmem:[%s11007_s27 + $0x6d0] sm:$0xff] %v1130_v41  ;;  %9761 = vmatpush.msk.msrb.mxu1 %vm10641_vm13, %v10351_v49 }
 0x1a2   : > { %1167 = vst [vmem:[%s11007_s27 + $0x6d8] sm:$0xff] %v1128_v5  ;;  %2323 = vmatmul.f32.vlgmr.msra.gmra.mxu2 %v11101_v46  ;;  %2455 = vmatmul.f32.vlgmr.msrb.gmra.mxu3 %v11020_v21 }
 0x1a3   : > { %1168 = vst [vmem:[%s11007_s27 + $0x6e0] sm:$0xff] %v1129_v35  ;;  %2533 = vmatpush.msra.mxu2 %v10645_v52  ;;  %2664 = vmatpush.msrb.mxu3 %v10738_v44 }
 0x1a4   : > { %1169 = vst [vmem:[%s11007_s27 + $0x6e8] sm:$0xff] %v1130_v41  ;;  %2482 = vmatmul.f32.vlgmr.msra.gmra.mxu0 %v11101_v46 }
 0x1a5   : > { %1170 = vst [vmem:[%s11007_s27 + $0x6f0] sm:$0x3] %v1128_v5  ;;  %2536 = vmatpush.msra.mxu2 %v10665_v55  ;;  %2692 = vmatpush.msra.mxu0 %v10700_v17  ;;  %v3968_v5 = vpop.permute.xlu0 %3967 }
 0x1a6   : > { %1171 = vst [vmem:[%s11007_s27 + $0x6f8] sm:$0x3] %v1129_v35  ;;  %2513 = vmatmul.f32.vlgmr.msra.gmra.mxu1 %v11020_v21  ;;  %2670 = vmatpush.msrb.mxu3 %v10744_v50  ;;  %v3969_v39 = vsel %vm617_vm5, %v3968_v5, 0 }
 0x1a7   : > { %1172 = vst [vmem:[%s11007_s27 + $0x700] sm:$0x3] %v1130_v41  ;;  %2695 = vmatpush.msra.mxu0 %v10702_v20  ;;  %9764 = vmatpush.msk.msra.mxu1 %vm10686_vm2, %v10351_v49 }
 0x1a8   : > { %1173 = vst [vmem:[%s11007_s27 + $0xa20] sm:$0xff] %v1131_v59 }
 0x1a9   : > { %1174 = vst [vmem:[%s11007_s27 + $0xa28] sm:$0xff] %v1132_v60  ;;  %9765 = vmatpush.msk.msra.mxu1 %vm10690_vm3, %v10351_v49 }
 0x1aa   : > { %1175 = vst [vmem:[%s11007_s27 + $0xa30] sm:$0xff] %v1133_v61  ;;  %2432 = vmatmul.f32.vlgmr.msrb.gmra.mxu2 %v11020_v21  ;;  %2564 = vmatmul.f32.vlgmr.msra.gmra.mxu3 %v11066_v33 }
 0x1ab   : > { %1176 = vst [vmem:[%s11007_s27 + $0xa38] sm:$0xff] %v1131_v59  ;;  %9762 = vmatpush.msk.msrb.mxu2 %vm10686_vm2, %v10351_v49  ;;  %9766 = vmatpush.msk.msra.mxu3 %vm10686_vm2, %v10351_v49 }
 0x1ac   : > { %1177 = vst [vmem:[%s11007_s27 + $0xa40] sm:$0xff] %v1132_v60  ;;  %2591 = vmatmul.f32.vlgmr.msrb.gmra.mxu0 %v11020_v21 }
 0x1ad   : > { %1178 = vst [vmem:[%s11007_s27 + $0xa48] sm:$0xff] %v1133_v61  ;;  %9763 = vmatpush.msk.msrb.mxu2 %vm10690_vm3, %v10351_v49  ;;  %9768 = vmatpush.msk.msrb.mxu0 %vm10577_vm4, %v10351_v49 }
 0x1ae   : > { %1179 = vst [vmem:[%s11007_s27 + $0xa50] sm:$0x3] %v1131_v59  ;;  %2614 = vmatmul.f32.vlgmr.msrb.gmra.mxu1 %v11020_v21  ;;  %9767 = vmatpush.msk.msra.mxu3 %vm10690_vm3, %v10351_v49 }
 0x1af   : > { %1180 = vst [vmem:[%s11007_s27 + $0xa58] sm:$0x3] %v1132_v60  ;;  %9769 = vmatpush.msk.msrb.mxu0 %vm10591_vm7, %v10351_v49  ;;  %2903 = vmatpush.msrb.mxu1 %v10610_v43 }
 0x1b0   : > { %1181 = vst [vmem:[%s11007_s27 + $0xa60] sm:$0x3] %v1133_v61 }
 0x1b1   : > { %2909 = vmatpush.msrb.mxu1 %v10615_v47 }
 0x1b2   : > { %2539 = vmatmul.f32.vlgmr.msra.gmra.mxu2 %v11038_v29  ;;  %2672 = vmatmul.f32.vlgmr.msrb.gmra.mxu3 %v11020_v21 }
 0x1b3   : > { %2744 = vmatpush.msra.mxu2 %v10711_v25  ;;  %9770 = vmatpush.msk.msrb.mxu3 %vm10577_vm4, %v10351_v49 }
 0x1b4   : > { %2698 = vmatmul.f32.vlgmr.msra.gmra.mxu0 %v11038_v29 }
 0x1b5   : > { %2748 = vmatpush.msra.mxu2 %v10718_v27  ;;  %2983 = vmatpush.msra.mxu0 %v10596_v38 }
 0x1b6   : > { %2723 = vmatmul.f32.vlgmr.msra.gmra.mxu1 %v11066_v33  ;;  %9771 = vmatpush.msk.msrb.mxu3 %vm10591_vm7, %v10351_v49 }
 0x1b7   : > { %2987 = vmatpush.msra.mxu0 %v10607_v42  ;;  %9772 = vmatpush.msk.msra.mxu1 %vm10577_vm4, %v10351_v49 }
 0x1b9   : > { %9773 = vmatpush.msk.msra.mxu1 %vm10591_vm7, %v10351_v49 }
 0x1ba   : > { %2641 = vmatmul.f32.vlgmr.msrb.gmra.mxu2 %v11101_v46  ;;  %2773 = vmatmul.f32.vlgmr.msra.gmra.mxu3 %v11020_v21  ;;  %v11354_v46 = vand.u32 4294901760, %v3969_v39 }
 0x1bb   : > { %2931 = vmatpush.msrb.mxu2 %v10587_v36  ;;  %3062 = vmatpush.msra.mxu3 %v10674_v58 }
 0x1bc   : > { %2880 = vmatmul.f32.vlgmr.msrb.gmra.mxu0 %v2879_v4 }
 0x1bd   : > { %2934 = vmatpush.msrb.mxu2 %v10602_v40  ;;  %3090 = vmatpush.msrb.mxu0 %v10645_v52 }
 0x1be   : > { %2911 = vmatmul.f32.vlgmr.msrb.gmra.mxu1 %v11132_v0  ;;  %3068 = vmatpush.msra.mxu3 %v10679_v62 }
 0x1bf   : > { %3093 = vmatpush.msrb.mxu0 %v10665_v55  ;;  %9776 = vmatpush.msk.msrb.mxu1 %vm10620_vm10, %v10351_v49 }
 0x1c1   : > { %9777 = vmatpush.msk.msrb.mxu1 %vm10641_vm13, %v10351_v49 }
 0x1c2   : > { %2750 = vmatmul.f32.vlgmr.msra.gmra.mxu2 %v11020_v21  ;;  %2962 = vmatmul.f32.vlgmr.msrb.gmra.mxu3 %v11169_v2  ;;  %v11304_v21 = vand.u32 4294901760, %v11281_v19 }
 0x1c3   : > { %9774 = vmatpush.msk.msra.mxu2 %vm10620_vm10, %v10351_v49  ;;  %9778 = vmatpush.msk.msrb.mxu3 %vm10620_vm10, %v10351_v49 }
 0x1c4   : > { %2989 = vmatmul.f32.vlgmr.msra.gmra.mxu0 %v11132_v0  ;;  %v3435_v28 = vsub.f32 %v11281_v19, %v11304_v21 }
 0x1c5   : > { %9775 = vmatpush.msk.msra.mxu2 %vm10641_vm13, %v10351_v49  ;;  %9780 = vmatpush.msk.msra.mxu0 %vm10686_vm2, %v10351_v49 }
 0x1c6   : > { %3012 = vmatmul.f32.vlgmr.msra.gmra.mxu1 %v11132_v0  ;;  %9779 = vmatpush.msk.msrb.mxu3 %vm10641_vm13, %v10351_v49  ;;  %v11330_v31 = vand.u32 4294901760, %v3435_v28 }
 0x1c7   : > { %9781 = vmatpush.msk.msra.mxu0 %vm10690_vm3, %v10351_v49  ;;  %3221 = vmatpush.msra.mxu1 %v10738_v44 }
 0x1c9   : > { %3227 = vmatpush.msra.mxu1 %v10744_v50 }
 0x1ca   : > { %2937 = vmatmul.f32.vlgmr.msrb.gmra.mxu2 %v11154_v1  ;;  %3070 = vmatmul.f32.vlgmr.msra.gmra.mxu3 %v11132_v0 }
 0x1cb   : > { %3142 = vmatpush.msrb.mxu2 %v10663_v54  ;;  %9782 = vmatpush.msk.msra.mxu3 %vm10686_vm2, %v10351_v49 }
 0x1cc   : > { %3096 = vmatmul.f32.vlgmr.msrb.gmra.mxu0 %v11154_v1 }
 0x1cd   : > { %3146 = vmatpush.msrb.mxu2 %v10671_v57  ;;  %3301 = vmatpush.msrb.mxu0 %v10711_v25 }
 0x1ce   : > { %3121 = vmatmul.f32.vlgmr.msrb.gmra.mxu1 %v11169_v2  ;;  %9783 = vmatpush.msk.msra.mxu3 %vm10690_vm3, %v10351_v49 }
 0x1cf   : > { %3305 = vmatpush.msrb.mxu0 %v10718_v27  ;;  %9784 = vmatpush.msk.msrb.mxu1 %vm10686_vm2, %v10351_v49 }
 0x1d1   : > { %v11249_v6 = vpop.f32.mrf.mxu0  ;;  %9785 = vmatpush.msk.msrb.mxu1 %vm10690_vm3, %v10351_v49 }
 0x1d2   : > { %3039 = vmatmul.f32.vlgmr.msra.gmra.mxu2 %v2879_v4  ;;  %3171 = vmatmul.f32.vlgmr.msrb.gmra.mxu3 %v11132_v0 }
 0x1d3   : > { %v11255_v10 = vpop.f32.mrf.mxu1  ;;  %3249 = vmatpush.msra.mxu2 %v10700_v17  ;;  %3460 = vmatpush.msrb.mxu3 %v10610_v43 }
 0x1d4   : > { %3198 = vmatmul.f32.vlgmr.msra.gmra.mxu0 %v2879_v4 }
 0x1d5   : > { %v11260_v14 = vpop.f32.mrf.mxu3  ;;  %3252 = vmatpush.msra.mxu2 %v10702_v20  ;;  %3488 = vmatpush.msra.mxu0 %v10587_v36 }
 0x1d6   : > { %3229 = vmatmul.f32.vlgmr.msra.gmra.mxu1 %v11132_v0  ;;  %3466 = vmatpush.msrb.mxu3 %v10615_v47 }
 0x1d7   : > { %3491 = vmatpush.msra.mxu0 %v10602_v40  ;;  %9788 = vmatpush.msk.msra.mxu1 %vm10577_vm4, %v10351_v49 }
 0x1d9   : > { %v1369_v16 = vpop.f32.mrf.mxu0  ;;  %9789 = vmatpush.msk.msra.mxu1 %vm10591_vm7, %v10351_v49 }
 0x1da   : > { %3148 = vmatmul.f32.vlgmr.msrb.gmra.mxu2 %v11132_v0  ;;  %3280 = vmatmul.f32.vlgmr.msra.gmra.mxu3 %v11169_v2 }
 0x1db   : > { %v1400_v18 = vpop.f32.mrf.mxu1  ;;  %9786 = vmatpush.msk.msrb.mxu2 %vm10577_vm4, %v10351_v49  ;;  %9790 = vmatpush.msk.msra.mxu3 %vm10577_vm4, %v10351_v49 }
 0x1dc   : > { %3307 = vmatmul.f32.vlgmr.msrb.gmra.mxu0 %v11132_v0  ;;  %v1401_v34 = vadd.f32 %v1400_v18, %v1369_v16 }
 0x1dd   : > { %v1210_v22 = vpop.f32.mrf.mxu2  ;;  %v11287_v23 = vpop.f32.mrf.mxu3  ;;  %9787 = vmatpush.msk.msrb.mxu2 %vm10591_vm7, %v10351_v49  ;;  %9792 = vmatpush.msk.msrb.mxu0 %vm10620_vm10, %v10351_v49 }
 0x1de   : > { %3330 = vmatmul.f32.vlgmr.msrb.gmra.mxu1 %v11132_v0  ;;  %9791 = vmatpush.msk.msra.mxu3 %vm10591_vm7, %v10351_v49  ;;  %v1242_v56 = vadd.f32 %v11260_v14, %v1210_v22  ;;  %v11375_v0 = vsub.f32 %v3969_v39, %v11354_v46 }
 0x1df   : > { %9793 = vmatpush.msk.msrb.mxu0 %vm10641_vm13, %v10351_v49  ;;  %3619 = vmatpush.msrb.mxu1 %v10674_v58 }
 0x1e0   : > { %v1268_v2 = vadd.f32 %v11249_v6, %v1242_v56  ;;  %v11390_v12 = vand.u32 4294901760, %v11375_v0 }
 0x1e1   : > { %v1478_v24 = vpop.f32.mrf.mxu0  ;;  %3625 = vmatpush.msrb.mxu1 %v10679_v62 }
 0x1e2   : > { %3255 = vmatmul.f32.vlgmr.msra.gmra.mxu2 %v11154_v1  ;;  %3468 = vmatmul.f32.vlgmr.msrb.gmra.mxu3 %v11270_v15  ;;  %v1293_v14 = vadd.f32 %v11255_v10, %v1268_v2 }
 0x1e3   : > { %v11309_v26 = vpop.f32.mrf.mxu1  ;;  %3540 = vmatpush.msra.mxu2 %v10596_v38  ;;  %9794 = vmatpush.msk.msrb.mxu3 %vm10620_vm10, %v10351_v49 }
 0x1e4   : > { %3494 = vmatmul.f32.vlgmr.msra.gmra.mxu0 %v11281_v19 }
 0x1e5   : > { %v11318_v29 = vpop.f32.mrf.mxu2  ;;  %v1451_v30 = vpop.f32.mrf.mxu3  ;;  %3544 = vmatpush.msra.mxu2 %v10607_v42  ;;  %3699 = vmatpush.msra.mxu0 %v10663_v54 }
 0x1e6   : > { %3519 = vmatmul.f32.vlgmr.msra.gmra.mxu1 %v11304_v21  ;;  %9795 = vmatpush.msk.msrb.mxu3 %vm10641_vm13, %v10351_v49  ;;  %v1320_v22 = vadd.f32 %v11318_v29, %v1293_v14 }
 0x1e7   : > { %3703 = vmatpush.msra.mxu0 %v10671_v57  ;;  %9796 = vmatpush.msk.msra.mxu1 %vm10620_vm10, %v10351_v49 }
 0x1e9   : > { %v1585_v13 = vpop.f32.mrf.mxu0  ;;  %9797 = vmatpush.msk.msra.mxu1 %vm10641_vm13, %v10351_v49 }
 0x1ea   : > { %3437 = vmatmul.f32.vlgmr.msrb.gmra.mxu2 %v11330_v31  ;;  %3569 = vmatmul.f32.vlgmr.msra.gmra.mxu3 %v11270_v15 }
 0x1eb   : > { %v1610_v33 = vpop.f32.mrf.mxu1  ;;  %3647 = vmatpush.msrb.mxu2 %v10645_v52  ;;  %3778 = vmatpush.msra.mxu3 %v10738_v44 }
 0x1ec   : > { %3596 = vmatmul.f32.vlgmr.msrb.gmra.mxu0 %v11330_v31 }
 0x1ed   : > { %v1426_v35 = vpop.f32.mrf.mxu2  ;;  %v1559_v11 = vpop.f32.mrf.mxu3  ;;  %3650 = vmatpush.msrb.mxu2 %v10665_v55  ;;  %3806 = vmatpush.msrb.mxu0 %v10700_v17 }
 0x1ee   : > { %3627 = vmatmul.f32.vlgmr.msrb.gmra.mxu1 %v11270_v15  ;;  %3784 = vmatpush.msra.mxu3 %v10744_v50  ;;  %v1427_v41 = vadd.f32 %v1426_v35, %v1401_v34 }
 0x1ef   : > { %3809 = vmatpush.msrb.mxu0 %v10702_v20  ;;  %9800 = vmatpush.msk.msrb.mxu1 %vm10686_vm2, %v10351_v49 }
 0x1f0   : > { %v1452_v59 = vadd.f32 %v1451_v30, %v1427_v41  ;;  %v11421_v30 = vadd.f32 %v11287_v23, %v1320_v22 }
 0x1f1   : > { %v11349_v45 = vpop.f32.mrf.mxu0  ;;  %9801 = vmatpush.msk.msrb.mxu1 %vm10690_vm3, %v10351_v49 }
 0x1f2   : > { %3546 = vmatmul.f32.vlgmr.msra.gmra.mxu2 %v11270_v15  ;;  %3678 = vmatmul.f32.vlgmr.msrb.gmra.mxu3 %v11304_v21  ;;  %v1479_v3 = vadd.f32 %v1478_v24, %v1452_v59 }
 0x1f3   : > { %v11359_v60 = vpop.f32.mrf.mxu1  ;;  %9798 = vmatpush.msk.msra.mxu2 %vm10686_vm2, %v10351_v49  ;;  %9802 = vmatpush.msk.msrb.mxu3 %vm10686_vm2, %v10351_v49 }
 0x1f4   : > { %3705 = vmatmul.f32.vlgmr.msra.gmra.mxu0 %v11270_v15  ;;  %v1502_v6 = vadd.f32 %v11309_v26, %v1479_v3 }
 0x1f5   : > { %v1528_v61 = vpop.f32.mrf.mxu2  ;;  %v1660_v63 = vpop.f32.mrf.mxu3  ;;  %9799 = vmatpush.msk.msra.mxu2 %vm10690_vm3, %v10351_v49  ;;  %9804 = vmatpush.msk.msra.mxu0 %vm10577_vm4, %v10351_v49 }
 0x1f6   : > { %v1560_v1 = vadd.f32 %v1559_v11, %v1528_v61  ;;  %3728 = vmatmul.f32.vlgmr.msra.gmra.mxu1 %v11270_v15  ;;  %9803 = vmatpush.msk.msrb.mxu3 %vm10690_vm3, %v10351_v49  ;;  %v11414_v28 = vrot.slane %v1502_v6, 7 }
 0x1f7   : > { %9805 = vmatpush.msk.msra.mxu0 %vm10591_vm7, %v10351_v49  ;;  %4017 = vmatpush.msra.mxu1 %v10610_v43 }
 0x1f8   : > { %v1586_v4 = vadd.f32 %v1585_v13, %v1560_v1  ;;  %v1668_v5 = vsel %vm1103_vm6, %v11421_v30, %v11414_v28  ;;  %v1670_v34 = vsel %vm1107_vm8, %v11421_v30, %v11414_v28 }
 0x1f9   : > { %v11386_v8 = vpop.f32.mrf.mxu0  ;;  %4023 = vmatpush.msra.mxu1 %v10615_v47 }
 0x1fa   : > { %3653 = vmatmul.f32.vlgmr.msrb.gmra.mxu2 %v11281_v19  ;;  %3786 = vmatmul.f32.vlgmr.msra.gmra.mxu3 %v11270_v15  ;;  %v1611_v18 = vadd.f32 %v1610_v33, %v1586_v4 }
 0x1fb   : > { %v11396_v16 = vpop.f32.mrf.mxu1  ;;  %3858 = vmatpush.msrb.mxu2 %v10711_v25  ;;  %9806 = vmatpush.msk.msra.mxu3 %vm10577_vm4, %v10351_v49 }
 0x1fc   : > { %3812 = vmatmul.f32.vlgmr.msrb.gmra.mxu0 %v11281_v19  ;;  %v3992_v19 = vsub.f32 %v11375_v0, %v11390_v12 }
 0x1fd   : > { %v1637_v24 = vpop.f32.mrf.mxu2  ;;  %3862 = vmatpush.msrb.mxu2 %v10718_v27  ;;  %4097 = vmatpush.msrb.mxu0 %v10596_v38  ;;  %v11406_v26 = vpop.f32.mrf.mxu3 }
 0x1fe   : > { %v1638_v10 = vadd.f32 %v1637_v24, %v1611_v18  ;;  %3837 = vmatmul.f32.vlgmr.msrb.gmra.mxu1 %v11304_v21  ;;  %9807 = vmatpush.msk.msra.mxu3 %vm10591_vm7, %v10351_v49  ;;  %v11431_v33 = vand.u32 4294901760, %v3992_v19 }
 0x1ff   : > { %4101 = vmatpush.msrb.mxu0 %v10607_v42  ;;  %9808 = vmatpush.msk.msrb.mxu1 %vm10577_vm4, %v10351_v49 }
 0x200   : > { %v1661_v29 = vadd.f32 %v1660_v63, %v1638_v10 }
 0x201   : > { %9809 = vmatpush.msk.msrb.mxu1 %vm10591_vm7, %v10351_v49  ;;  %v11428_v13 = vpop.f32.mrf.mxu0 }
 0x202   : > { %v11426_v21 = vrot.slane %v1661_v29, 6  ;;  %3755 = vmatmul.f32.vlgmr.msra.gmra.mxu2 %v11330_v31  ;;  %3887 = vmatmul.f32.vlgmr.msrb.gmra.mxu3 %v11270_v15 }
 0x203   : > { %4045 = vmatpush.msra.mxu2 %v10587_v36  ;;  %v11443_v35 = vpop.f32.mrf.mxu1  ;;  %4176 = vmatpush.msrb.mxu3 %v10674_v58 }
 0x204   : > { %v1669_v23 = vsel %vm1105_vm9, %v1668_v5, %v11426_v21  ;;  %3994 = vmatmul.f32.vlgmr.msra.gmra.mxu0 %v11431_v33  ;;  %v1671_v31 = vsel %vm1109_vm11, %v1670_v34, %v11426_v21  ;;  %v1676_v5 = vsel %vm1117_vm15, %v11421_v30, %v11414_v28 }
 0x205   : > { %v1679_v11 = vperm.slane %v1669_v23, 0  ;;  %4048 = vmatpush.msra.mxu2 %v10602_v40  ;;  %v1680_v39 = vperm.slane %v1669_v23, 1  ;;  %v1681_v41 = vperm.slane %v1669_v23, 2  ;;  %v11450_v56 = vpop.f32.mrf.mxu2  ;;  %v1957_v59 = vpop.f32.mrf.mxu3  ;;  %4204 = vmatpush.msra.mxu0 %v10645_v52  ;;  %v1672_v61 = vrot.slane %v1671_v31, 1 }
 0x206   : > { %4025 = vmatmul.f32.vlgmr.msra.gmra.mxu1 %v11354_v46  ;;  %4182 = vmatpush.msrb.mxu3 %v10679_v62 }
 0x207   : > { %1703 = vst [vmem:[%s11007_s27 + $0x30] sm:$0xfc] %v1679_v11  ;;  %9812 = vmatpush.msk.msra.mxu1 %vm10620_vm10, %v10351_v49  ;;  %4207 = vmatpush.msra.mxu0 %v10665_v55  ;;  %v1682_v1 = vperm.slane %v1672_v61, 0  ;;  %v1683_v3 = vperm.slane %v1672_v61, 1  ;;  %v1684_v14 = vperm.slane %v1672_v61, 2 }
 0x208   : > { %1704 = vst [vmem:[%s11007_s27 + $0x38] sm:$0xfc] %v1680_v39 }
 0x209   : > { %1705 = vst [vmem:[%s11007_s27 + $0x40] sm:$0xfc] %v1681_v41  ;;  %9813 = vmatpush.msk.msra.mxu1 %vm10641_vm13, %v10351_v49  ;;  %v11466_v63 = vpop.f32.mrf.mxu0 }
 0x20a   : > { %1706 = vst [vmem:[%s11007_s27 + $0x48] sm:$0xff] %v1679_v11  ;;  %3864 = vmatmul.f32.vlgmr.msrb.gmra.mxu2 %v11270_v15  ;;  %4076 = vmatmul.f32.vlgmr.msra.gmra.mxu3 %v11390_v12  ;;  %v1673_v15 = vsel %vm1112_vm12, %v11421_v30, %v11414_v28  ;;  %v1799_v28 = vadd.f32 %v11359_v60, %v11349_v45  ;;  %v4525_v30 = vpop.permute.xlu1 %4524 }
 0x20b   : > { %1707 = vst [vmem:[%s11007_s27 + $0x50] sm:$0xff] %v1680_v39  ;;  %9810 = vmatpush.msk.msrb.mxu2 %vm10620_vm10, %v10351_v49  ;;  %v11475_v2 = vpop.f32.mrf.mxu1  ;;  %9814 = vmatpush.msk.msra.mxu3 %vm10620_vm10, %v10351_v49  ;;  %v1674_v4 = vsel %vm1114_vm14, %v1673_v15, %v11426_v21 }
 0x20c   : > { %1708 = vst [vmem:[%s11007_s27 + $0x58] sm:$0xff] %v1681_v41  ;;  %4103 = vmatmul.f32.vlgmr.msrb.gmra.mxu0 %v11354_v46  ;;  %v1675_v22 = vrot.slane %v1674_v4, 2 }
 0x20d   : > { %1709 = vst [vmem:[%s11007_s27 + $0x60] sm:$0xf] %v1679_v11  ;;  %9811 = vmatpush.msk.msrb.mxu2 %vm10641_vm13, %v10351_v49  ;;  %9816 = vmatpush.msk.msrb.mxu0 %vm10686_vm2, %v10351_v49  ;;  %v1926_v6 = vpop.f32.mrf.mxu2  ;;  %v11494_v18 = vpop.f32.mrf.mxu3 }
 0x20e   : > { %1710 = vst [vmem:[%s11007_s27 + $0x68] sm:$0xf] %v1680_v39  ;;  %4126 = vmatmul.f32.vlgmr.msrb.gmra.mxu1 %v11354_v46  ;;  %9815 = vmatpush.msk.msra.mxu3 %vm10641_vm13, %v10351_v49  ;;  %v1958_v24 = vadd.f32 %v1957_v59, %v1926_v6  ;;  %v1685_v29 = vperm.slane %v1675_v22, 0  ;;  %v1686_v23 = vperm.slane %v1675_v22, 1  ;;  %v1677_v39 = vsel %vm1119_vm0, %v1676_v5, %v11426_v21 }
 0x20f   : > { %1711 = vst [vmem:[%s11007_s27 + $0x70] sm:$0xf] %v1681_v41  ;;  %9817 = vmatpush.msk.msrb.mxu0 %vm10690_vm3, %v10351_v49  ;;  %4335 = vmatpush.msrb.mxu1 %v10738_v44  ;;  %v1687_v41 = vperm.slane %v1675_v22, 2  ;;  %v1678_v21 = vrot.slane %v1677_v39, 3 }
 0x210   : > { %1712 = vst [vmem:[%s11007_s27 + $0x390] sm:$0xfc] %v1682_v1  ;;  %v1984_v34 = vadd.f32 %v11428_v13, %v1958_v24  ;;  %v1825_v13 = vadd.f32 %v11450_v56, %v1799_v28  ;;  %v2117_v56 = vadd.f32 %v11475_v2, %v11466_v63 }
 0x211   : > { %1713 = vst [vmem:[%s11007_s27 + $0x398] sm:$0xfc] %v1683_v3  ;;  %4341 = vmatpush.msrb.mxu1 %v10744_v50  ;;  %v11509_v10 = vpop.f32.mrf.mxu0  ;;  %v1690_v2 = vperm.slane %v1678_v21, 2 }
 0x212   : > { %1714 = vst [vmem:[%s11007_s27 + $0x3a0] sm:$0xfc] %v1684_v14  ;;  %4051 = vmatmul.f32.vlgmr.msra.gmra.mxu2 %v11375_v0  ;;  %4184 = vmatmul.f32.vlgmr.msrb.gmra.mxu3 %v11354_v46  ;;  %v2009_v59 = vadd.f32 %v11443_v35, %v1984_v34  ;;  %v4526_v35 = vsel %vm617_vm5, %v4525_v30, 0  ;;  %v1850_v15 = vadd.f32 %v11406_v26, %v1825_v13 }
 0x213   : > { %1715 = vst [vmem:[%s11007_s27 + $0x3a8] sm:$0xff] %v1682_v1  ;;  %4256 = vmatpush.msra.mxu2 %v10663_v54  ;;  %v11516_v19 = vpop.f32.mrf.mxu1  ;;  %9818 = vmatpush.msk.msrb.mxu3 %vm10686_vm2, %v10351_v49  ;;  %v11575_v63 = vand.u32 4294901760, %v4526_v35 }
 0x214   : > { %1716 = vst [vmem:[%s11007_s27 + $0x3b0] sm:$0xff] %v1683_v3  ;;  %4210 = vmatmul.f32.vlgmr.msra.gmra.mxu0 %v11375_v0  ;;  %v1877_v22 = vadd.f32 %v11386_v8, %v1850_v15 }
 0x215   : > { %1717 = vst [vmem:[%s11007_s27 + $0x3b8] sm:$0xff] %v1684_v14  ;;  %4260 = vmatpush.msra.mxu2 %v10671_v57  ;;  %4415 = vmatpush.msra.mxu0 %v10711_v25  ;;  %v2035_v31 = vpop.f32.mrf.mxu2  ;;  %v2167_v11 = vpop.f32.mrf.mxu3  ;;  %v11599_v8 = vsub.f32 %v4526_v35, %v11575_v63 }
 0x216   : > { %1718 = vst [vmem:[%s11007_s27 + $0x3c0] sm:$0xf] %v1682_v1  ;;  %4235 = vmatmul.f32.vlgmr.msra.gmra.mxu1 %v11390_v12  ;;  %9819 = vmatpush.msk.msrb.mxu3 %vm10690_vm3, %v10351_v49  ;;  %v2036_v45 = vadd.f32 %v2035_v31, %v2009_v59  ;;  %v1688_v1 = vperm.slane %v1678_v21, 0  ;;  %v11620_v5 = vadd.f32 %v11396_v16, %v1877_v22 }
 0x217   : > { %1719 = vst [vmem:[%s11007_s27 + $0x3c8] sm:$0xf] %v1683_v3  ;;  %4419 = vmatpush.msra.mxu0 %v10718_v27  ;;  %9820 = vmatpush.msk.msra.mxu1 %vm10686_vm2, %v10351_v49  ;;  %v11642_v16 = vand.u32 4294901760, %v11599_v8 }
 0x218   : > { %1720 = vst [vmem:[%s11007_s27 + $0x3d0] sm:$0xf] %v1684_v14  ;;  %v2059_v26 = vadd.f32 %v11494_v18, %v2036_v45 }
 0x219   : > { %1721 = vst [vmem:[%s11007_s27 + $0x6f0] sm:$0xfc] %v1685_v29  ;;  %9821 = vmatpush.msk.msra.mxu1 %vm10690_vm3, %v10351_v49  ;;  %v11551_v61 = vpop.f32.mrf.mxu0  ;;  %v4549_v13 = vsub.f32 %v11599_v8, %v11642_v16 }
 0x21a   : > { %1722 = vst [vmem:[%s11007_s27 + $0x6f8] sm:$0xfc] %v1686_v23  ;;  %4153 = vmatmul.f32.vlgmr.msrb.gmra.mxu2 %v11431_v33  ;;  %4285 = vmatmul.f32.vlgmr.msra.gmra.mxu3 %v11354_v46 }
 0x21b   : > { %1723 = vst [vmem:[%s11007_s27 + $0x700] sm:$0xfc] %v1687_v41  ;;  %4363 = vmatpush.msrb.mxu2 %v10700_v17  ;;  %v11558_v60 = vpop.f32.mrf.mxu1  ;;  %4574 = vmatpush.msra.mxu3 %v10610_v43 }
 0x21c   : > { %1724 = vst [vmem:[%s11007_s27 + $0x708] sm:$0xff] %v1685_v29  ;;  %4312 = vmatmul.f32.vlgmr.msrb.gmra.mxu0 %v11431_v33  ;;  %v1689_v33 = vperm.slane %v1678_v21, 1 }
 0x21d   : > { %1725 = vst [vmem:[%s11007_s27 + $0x710] sm:$0xff] %v1686_v23  ;;  %v2142_v3 = vpop.f32.mrf.mxu2  ;;  %4366 = vmatpush.msrb.mxu2 %v10702_v20  ;;  %v11571_v14 = vpop.f32.mrf.mxu3  ;;  %4580 = vmatpush.msra.mxu3 %v10615_v47 }
 0x21e   : > { %1726 = vst [vmem:[%s11007_s27 + $0x718] sm:$0xff] %v1687_v41  ;;  %4343 = vmatmul.f32.vlgmr.msrb.gmra.mxu1 %v11354_v46  ;;  %v2143_v4 = vadd.f32 %v2142_v3, %v2117_v56  ;;  %4602 = vmatpush.msrb.mxu0 %v10587_v36  ;;  %v11684_v56 = vand.u32 4294901760, %v4549_v13 }
 0x21f   : > { %1727 = vst [vmem:[%s11007_s27 + $0x720] sm:$0xf] %v1685_v29  ;;  %9824 = vmatpush.msk.msrb.mxu1 %vm10577_vm4, %v10351_v49  ;;  %v11602_v29 = vrot.slane %v2059_v26, 7 }
 0x220   : > { %1728 = vst [vmem:[%s11007_s27 + $0x728] sm:$0xf] %v1686_v23  ;;  %v2168_v6 = vadd.f32 %v2167_v11, %v2143_v4  ;;  %4605 = vmatpush.msrb.mxu0 %v10602_v40 }
 0x221   : > { %1729 = vst [vmem:[%s11007_s27 + $0x730] sm:$0xf] %v1687_v41  ;;  %9825 = vmatpush.msk.msrb.mxu1 %vm10591_vm7, %v10351_v49  ;;  %v11592_v24 = vpop.f32.mrf.mxu0  ;;  %v2227_v31 = vsel %vm1107_vm8, %v11620_v5, %v11602_v29  ;;  %v2230_v15 = vsel %vm1112_vm12, %v11620_v5, %v11602_v29 }
 0x222   : > { %1730 = vst [vmem:[%s11007_s27 + $0xa50] sm:$0xfc] %v1688_v1  ;;  %4262 = vmatmul.f32.vlgmr.msra.gmra.mxu2 %v11354_v46  ;;  %v2195_v18 = vadd.f32 %v11509_v10, %v2168_v6  ;;  %4394 = vmatmul.f32.vlgmr.msrb.gmra.mxu3 %v11390_v12 }
 0x223   : > { %1731 = vst [vmem:[%s11007_s27 + $0xa58] sm:$0xfc] %v1689_v33  ;;  %9822 = vmatpush.msk.msra.mxu2 %vm10577_vm4, %v10351_v49  ;;  %9826 = vmatpush.msk.msrb.mxu3 %vm10577_vm4, %v10351_v49  ;;  %v11610_v10 = vpop.f32.mrf.mxu1 }
 0x224   : > { %1732 = vst [vmem:[%s11007_s27 + $0xa60] sm:$0xfc] %v1690_v2  ;;  %4421 = vmatmul.f32.vlgmr.msra.gmra.mxu0 %v11354_v46  ;;  %v2218_v12 = vadd.f32 %v11516_v19, %v2195_v18  ;;  %v2515_v22 = vadd.f32 %v11610_v10, %v11592_v24 }
 0x225   : > { %1733 = vst [vmem:[%s11007_s27 + $0xa68] sm:$0xff] %v1688_v1  ;;  %9823 = vmatpush.msk.msra.mxu2 %vm10591_vm7, %v10351_v49  ;;  %9828 = vmatpush.msk.msra.mxu0 %vm10620_vm10, %v10351_v49  ;;  %v11629_v23 = vpop.f32.mrf.mxu2  ;;  %v11631_v34 = vpop.f32.mrf.mxu3 }
 0x226   : > { %1734 = vst [vmem:[%s11007_s27 + $0xa70] sm:$0xff] %v1689_v33  ;;  %4444 = vmatmul.f32.vlgmr.msra.gmra.mxu1 %v11354_v46  ;;  %9827 = vmatpush.msk.msrb.mxu3 %vm10591_vm7, %v10351_v49  ;;  %v11627_v19 = vrot.slane %v2218_v12, 6  ;;  %v2225_v46 = vsel %vm1103_vm6, %v11620_v5, %v11602_v29 }
 0x227   : > { %1735 = vst [vmem:[%s11007_s27 + $0xa78] sm:$0xff] %v1690_v2  ;;  %9829 = vmatpush.msk.msra.mxu0 %vm10641_vm13, %v10351_v49  ;;  %4733 = vmatpush.msra.mxu1 %v10674_v58 }
 0x228   : > { %1736 = vst [vmem:[%s11007_s27 + $0xa80] sm:$0xf] %v1688_v1  ;;  %v2226_v11 = vsel %vm1105_vm9, %v2225_v46, %v11627_v19  ;;  %v2228_v39 = vsel %vm1109_vm11, %v2227_v31, %v11627_v19  ;;  %v5082_v46 = vsel %vm617_vm5, %v10751_v53, 0 }
 0x229   : > { %1737 = vst [vmem:[%s11007_s27 + $0xa88] sm:$0xf] %v1689_v33  ;;  %v2236_v41 = vperm.slane %v2226_v11, 0  ;;  %4739 = vmatpush.msra.mxu1 %v10679_v62  ;;  %v2237_v28 = vperm.slane %v2226_v11, 1  ;;  %v2238_v30 = vperm.slane %v2226_v11, 2  ;;  %v11655_v21 = vpop.f32.mrf.mxu0  ;;  %v2231_v33 = vsel %vm1114_vm14, %v2230_v15, %v11627_v19 }
 0x22a   : > { %1738 = vst [vmem:[%s11007_s27 + $0xa90] sm:$0xf] %v1690_v2  ;;  %4369 = vmatmul.f32.vlgmr.msrb.gmra.mxu2 %v11375_v0  ;;  %4582 = vmatmul.f32.vlgmr.msra.gmra.mxu3 %v11575_v63  ;;  %v2229_v0 = vrot.slane %v2228_v39, 1  ;;  %v2232_v6 = vrot.slane %v2231_v33, 2  ;;  %v11729_v10 = vand.u32 4294901760, %v5082_v46  ;;  %v2233_v11 = vsel %vm1117_vm15, %v11620_v5, %v11602_v29 }
 0x22b   : > { %4654 = vmatpush.msrb.mxu2 %v10596_v38  ;;  %2260 = vst [vmem:[%s11007_s27 + $0x60] sm:$0xf0] %v2236_v41  ;;  %9830 = vmatpush.msk.msra.mxu3 %vm10620_vm10, %v10351_v49  ;;  %v11667_v59 = vpop.f32.mrf.mxu1  ;;  %v2356_v29 = vadd.f32 %v11571_v14, %v11629_v23 }
 0x22c   : > { %4608 = vmatmul.f32.vlgmr.msrb.gmra.mxu0 %v11599_v8  ;;  %2261 = vst [vmem:[%s11007_s27 + $0x68] sm:$0xf0] %v2237_v28  ;;  %v2239_v1 = vperm.slane %v2229_v0, 0  ;;  %v2240_v3 = vperm.slane %v2229_v0, 1  ;;  %v2241_v4 = vperm.slane %v2229_v0, 2  ;;  %v2242_v24 = vperm.slane %v2232_v6, 0 }
 0x22d   : > { %4658 = vmatpush.msrb.mxu2 %v10607_v42  ;;  %4813 = vmatpush.msrb.mxu0 %v10663_v54  ;;  %2262 = vst [vmem:[%s11007_s27 + $0x70] sm:$0xf0] %v2238_v30  ;;  %v11677_v45 = vpop.f32.mrf.mxu2  ;;  %v2565_v35 = vpop.f32.mrf.mxu3  ;;  %v2243_v53 = vperm.slane %v2232_v6, 1  ;;  %v11765_v14 = vsub.f32 %v5082_v46, %v11729_v10 }
 0x22e   : > { %4633 = vmatmul.f32.vlgmr.msrb.gmra.mxu1 %v11642_v16  ;;  %9831 = vmatpush.msk.msra.mxu3 %vm10641_vm13, %v10351_v49  ;;  %2263 = vst [vmem:[%s11007_s27 + $0x78] sm:$0xff] %v2236_v41 }
 0x22f   : > { %4817 = vmatpush.msrb.mxu0 %v10671_v57  ;;  %9832 = vmatpush.msk.msrb.mxu1 %vm10620_vm10, %v10351_v49  ;;  %2264 = vst [vmem:[%s11007_s27 + $0x80] sm:$0xff] %v2237_v28 }
 0x230   : > { %2265 = vst [vmem:[%s11007_s27 + $0x88] sm:$0xff] %v2238_v30 }
 0x231   : > { %9833 = vmatpush.msk.msrb.mxu1 %vm10641_vm13, %v10351_v49  ;;  %2266 = vst [vmem:[%s11007_s27 + $0x90] sm:$0x3f] %v2236_v41  ;;  %v11698_v2 = vpop.f32.mrf.mxu0  ;;  %v2234_v41 = vsel %vm1119_vm0, %v2233_v11, %v11627_v19 }
 0x232   : > { %4551 = vmatmul.f32.vlgmr.msra.gmra.mxu2 %v11684_v56  ;;  %2267 = vst [vmem:[%s11007_s27 + $0x98] sm:$0x3f] %v2237_v28  ;;  %4683 = vmatmul.f32.vlgmr.msrb.gmra.mxu3 %v11575_v63  ;;  %v2244_v28 = vperm.slane %v2232_v6, 2  ;;  %v2235_v19 = vrot.slane %v2234_v41, 3 }
 0x233   : > { %4761 = vmatpush.msra.mxu2 %v10645_v52  ;;  %2268 = vst [vmem:[%s11007_s27 + $0xa0] sm:$0x3f] %v2238_v30  ;;  %4892 = vmatpush.msrb.mxu3 %v10738_v44  ;;  %v11706_v26 = vpop.f32.mrf.mxu1 }
 0x234   : > { %4710 = vmatmul.f32.vlgmr.msra.gmra.mxu0 %v11684_v56  ;;  %2269 = vst [vmem:[%s11007_s27 + $0x3c0] sm:$0xf0] %v2239_v1  ;;  %v2245_v33 = vperm.slane %v2235_v19, 0 }
 0x235   : > { %4764 = vmatpush.msra.mxu2 %v10665_v55  ;;  %4920 = vmatpush.msra.mxu0 %v10700_v17  ;;  %2270 = vst [vmem:[%s11007_s27 + $0x3c8] sm:$0xf0] %v2240_v3  ;;  %v2540_v18 = vpop.f32.mrf.mxu2  ;;  %v2673_v12 = vpop.f32.mrf.mxu3 }
 0x236   : > { %4741 = vmatmul.f32.vlgmr.msra.gmra.mxu1 %v11575_v63  ;;  %4898 = vmatpush.msrb.mxu3 %v10744_v50  ;;  %2271 = vst [vmem:[%s11007_s27 + $0x3d0] sm:$0xf0] %v2241_v4  ;;  %v2541_v31 = vadd.f32 %v2540_v18, %v2515_v22 }
 0x237   : > { %4923 = vmatpush.msra.mxu0 %v10702_v20  ;;  %9836 = vmatpush.msk.msra.mxu1 %vm10686_vm2, %v10351_v49  ;;  %2272 = vst [vmem:[%s11007_s27 + $0x3d8] sm:$0xff] %v2239_v1 }
 0x238   : > { %2273 = vst [vmem:[%s11007_s27 + $0x3e0] sm:$0xff] %v2240_v3  ;;  %v2566_v5 = vadd.f32 %v2565_v35, %v2541_v31  ;;  %v2382_v35 = vadd.f32 %v11551_v61, %v2356_v29  ;;  %v2246_v61 = vperm.slane %v2235_v19, 1 }
 0x239   : > { %9837 = vmatpush.msk.msra.mxu1 %vm10690_vm3, %v10351_v49  ;;  %2274 = vst [vmem:[%s11007_s27 + $0x3e8] sm:$0xff] %v2241_v4  ;;  %v11735_v39 = vpop.f32.mrf.mxu0 }
 0x23a   : > { %4660 = vmatmul.f32.vlgmr.msrb.gmra.mxu2 %v11575_v63  ;;  %2275 = vst [vmem:[%s11007_s27 + $0x3f0] sm:$0x3f] %v2239_v1  ;;  %4792 = vmatmul.f32.vlgmr.msra.gmra.mxu3 %v11642_v16  ;;  %v2593_v1 = vadd.f32 %v11655_v21, %v2566_v5  ;;  %v2247_v21 = vperm.slane %v2235_v19, 2 }
 0x23b   : > { %9834 = vmatpush.msk.msrb.mxu2 %vm10686_vm2, %v10351_v49  ;;  %2276 = vst [vmem:[%s11007_s27 + $0x3f8] sm:$0x3f] %v2240_v3  ;;  %9838 = vmatpush.msk.msra.mxu3 %vm10686_vm2, %v10351_v49  ;;  %v11751_v30 = vpop.f32.mrf.mxu1  ;;  %v11781_v3 = vand.u32 4294901760, %v11765_v14 }
 0x23c   : > { %4819 = vmatmul.f32.vlgmr.msrb.gmra.mxu0 %v11575_v63  ;;  %2277 = vst [vmem:[%s11007_s27 + $0x400] sm:$0x3f] %v2241_v4  ;;  %v2616_v6 = vadd.f32 %v11667_v59, %v2593_v1 }
 0x23d   : > { %9835 = vmatpush.msk.msrb.mxu2 %vm10690_vm3, %v10351_v49  ;;  %9840 = vmatpush.msk.msrb.mxu0 %vm10577_vm4, %v10351_v49  ;;  %2278 = vst [vmem:[%s11007_s27 + $0x720] sm:$0xf0] %v2242_v24  ;;  %v2642_v23 = vpop.f32.mrf.mxu2  ;;  %v2774_v13 = vpop.f32.mrf.mxu3  ;;  %v5105_v18 = vsub.f32 %v11765_v14, %v11781_v3 }
 0x23e   : > { %4842 = vmatmul.f32.vlgmr.msrb.gmra.mxu1 %v11575_v63  ;;  %9839 = vmatpush.msk.msra.mxu3 %vm10690_vm3, %v10351_v49  ;;  %2279 = vst [vmem:[%s11007_s27 + $0x728] sm:$0xf0] %v2243_v53  ;;  %v2674_v0 = vadd.f32 %v2673_v12, %v2642_v23  ;;  %v11818_v12 = vrot.slane %v2616_v6, 7 }
 0x23f   : > { %9841 = vmatpush.msk.msrb.mxu0 %vm10591_vm7, %v10351_v49  ;;  %5130 = vmatpush.msrb.mxu1 %v10610_v43  ;;  %2280 = vst [vmem:[%s11007_s27 + $0x730] sm:$0xf0] %v2244_v28  ;;  %v11825_v46 = vand.u32 4294901760, %v5105_v18 }
 0x240   : > { %2281 = vst [vmem:[%s11007_s27 + $0x738] sm:$0xff] %v2242_v24  ;;  %v2700_v15 = vadd.f32 %v11698_v2, %v2674_v0  ;;  %v2407_v2 = vadd.f32 %v11558_v60, %v2382_v35 }
 0x241   : > { %5136 = vmatpush.msrb.mxu1 %v10615_v47  ;;  %2282 = vst [vmem:[%s11007_s27 + $0x740] sm:$0xff] %v2243_v53  ;;  %v11784_v4 = vpop.f32.mrf.mxu0 }
 0x242   : > { %4767 = vmatmul.f32.vlgmr.msra.gmra.mxu2 %v11599_v8  ;;  %2283 = vst [vmem:[%s11007_s27 + $0x748] sm:$0xff] %v2244_v28  ;;  %4900 = vmatmul.f32.vlgmr.msrb.gmra.mxu3 %v11575_v63  ;;  %v2434_v60 = vadd.f32 %v11677_v45, %v2407_v2 }
 0x243   : > { %4972 = vmatpush.msra.mxu2 %v10711_v25  ;;  %2284 = vst [vmem:[%s11007_s27 + $0x750] sm:$0x3f] %v2242_v24  ;;  %9842 = vmatpush.msk.msrb.mxu3 %vm10577_vm4, %v10351_v49  ;;  %v11796_v22 = vpop.f32.mrf.mxu1 }
 0x244   : > { %4926 = vmatmul.f32.vlgmr.msra.gmra.mxu0 %v11599_v8  ;;  %2285 = vst [vmem:[%s11007_s27 + $0x758] sm:$0x3f] %v2243_v53  ;;  %v2725_v8 = vadd.f32 %v11706_v26, %v2700_v15  ;;  %v11829_v31 = vadd.f32 %v11631_v34, %v2434_v60 }
 0x245   : > { %4976 = vmatpush.msra.mxu2 %v10718_v27  ;;  %5210 = vmatpush.msra.mxu0 %v10596_v38  ;;  %2286 = vst [vmem:[%s11007_s27 + $0x760] sm:$0x3f] %v2244_v28  ;;  %v2751_v59 = vpop.f32.mrf.mxu2  ;;  %v11815_v26 = vpop.f32.mrf.mxu3 }
 0x246   : > { %4951 = vmatmul.f32.vlgmr.msra.gmra.mxu1 %v11642_v16  ;;  %9843 = vmatpush.msk.msrb.mxu3 %vm10591_vm7, %v10351_v49  ;;  %2287 = vst [vmem:[%s11007_s27 + $0xa80] sm:$0xf0] %v2245_v33  ;;  %v2752_v16 = vadd.f32 %v2751_v59, %v2725_v8  ;;  %v2782_v34 = vsel %vm1103_vm6, %v11829_v31, %v11818_v12 }
 0x247   : > { %5214 = vmatpush.msra.mxu0 %v10607_v42  ;;  %9844 = vmatpush.msk.msra.mxu1 %vm10577_vm4, %v10351_v49  ;;  %2288 = vst [vmem:[%s11007_s27 + $0xa88] sm:$0xf0] %v2246_v61  ;;  %v2784_v53 = vsel %vm1107_vm8, %v11829_v31, %v11818_v12  ;;  %v2787_v15 = vsel %vm1112_vm12, %v11829_v31, %v11818_v12 }
 0x248   : > { %2289 = vst [vmem:[%s11007_s27 + $0xa90] sm:$0xf0] %v2247_v21  ;;  %v2775_v45 = vadd.f32 %v2774_v13, %v2752_v16 }
 0x249   : > { %9845 = vmatpush.msk.msra.mxu1 %vm10591_vm7, %v10351_v49  ;;  %2290 = vst [vmem:[%s11007_s27 + $0xa98] sm:$0xff] %v2245_v33  ;;  %v11836_v11 = vpop.f32.mrf.mxu0 }
 0x24a   : > { %4869 = vmatmul.f32.vlgmr.msrb.gmra.mxu2 %v11684_v56  ;;  %2291 = vst [vmem:[%s11007_s27 + $0xaa0] sm:$0xff] %v2246_v61  ;;  %5001 = vmatmul.f32.vlgmr.msra.gmra.mxu3 %v11575_v63  ;;  %v11834_v24 = vrot.slane %v2775_v45, 6  ;;  %v2790_v45 = vsel %vm1117_vm15, %v11829_v31, %v11818_v12  ;;  %v2913_v12 = vadd.f32 %v11751_v30, %v11735_v39 }
 0x24b   : > { %5158 = vmatpush.msrb.mxu2 %v10587_v36  ;;  %2292 = vst [vmem:[%s11007_s27 + $0xaa8] sm:$0xff] %v2247_v21  ;;  %5289 = vmatpush.msra.mxu3 %v10674_v58  ;;  %v11852_v41 = vpop.f32.mrf.mxu1 }
 0x24c   : > { %5107 = vmatmul.f32.vlgmr.msrb.gmra.mxu0 %v11825_v46  ;;  %2293 = vst [vmem:[%s11007_s27 + $0xab0] sm:$0x3f] %v2245_v33  ;;  %v2783_v56 = vsel %vm1105_vm9, %v2782_v34, %v11834_v24  ;;  %v2785_v28 = vsel %vm1109_vm11, %v2784_v53, %v11834_v24 }
 0x24d   : > { %5161 = vmatpush.msrb.mxu2 %v10602_v40  ;;  %5317 = vmatpush.msrb.mxu0 %v10645_v52  ;;  %2294 = vst [vmem:[%s11007_s27 + $0xab8] sm:$0x3f] %v2246_v61  ;;  %v2793_v29 = vperm.slane %v2783_v56, 0  ;;  %v2794_v5 = vperm.slane %v2783_v56, 1  ;;  %v2795_v19 = vperm.slane %v2783_v56, 2  ;;  %v11859_v23 = vpop.f32.mrf.mxu2  ;;  %v3071_v13 = vpop.f32.mrf.mxu3  ;;  %v2786_v0 = vrot.slane %v2785_v28, 1 }
 0x24e   : > { %2295 = vst [vmem:[%s11007_s27 + $0xac0] sm:$0x3f] %v2247_v21  ;;  %5138 = vmatmul.f32.vlgmr.msrb.gmra.mxu1 %v11729_v10  ;;  %5295 = vmatpush.msra.mxu3 %v10679_v62  ;;  %v2788_v61 = vsel %vm1114_vm14, %v2787_v15, %v11834_v24 }
 0x24f   : > { %5320 = vmatpush.msrb.mxu0 %v10665_v55  ;;  %9848 = vmatpush.msk.msrb.mxu1 %vm10620_vm10, %v10351_v49  ;;  %2817 = vst [vmem:[%s11007_s27 + $0x90] sm:$0xc0] %v2793_v29  ;;  %v2797_v33 = vperm.slane %v2786_v0, 1  ;;  %v2798_v21 = vperm.slane %v2786_v0, 2  ;;  %v2789_v8 = vrot.slane %v2788_v61, 2 }
 0x250   : > { %2818 = vst [vmem:[%s11007_s27 + $0x98] sm:$0xc0] %v2794_v5 }
 0x251   : > { %9849 = vmatpush.msk.msrb.mxu1 %vm10641_vm13, %v10351_v49  ;;  %2819 = vst [vmem:[%s11007_s27 + $0xa0] sm:$0xc0] %v2795_v19  ;;  %v11877_v35 = vpop.f32.mrf.mxu0  ;;  %v2799_v16 = vperm.slane %v2789_v8, 0  ;;  %v2800_v34 = vperm.slane %v2789_v8, 1 }
 0x252   : > { %4978 = vmatmul.f32.vlgmr.msra.gmra.mxu2 %v11575_v63  ;;  %5189 = vmatmul.f32.vlgmr.msrb.gmra.mxu3 %v11781_v3  ;;  %2820 = vst [vmem:[%s11007_s27 + $0xa8] sm:$0xff] %v2793_v29  ;;  %v2796_v63 = vperm.slane %v2786_v0, 0 }
 0x253   : > { %9846 = vmatpush.msk.msra.mxu2 %vm10620_vm10, %v10351_v49  ;;  %9850 = vmatpush.msk.msrb.mxu3 %vm10620_vm10, %v10351_v49  ;;  %2821 = vst [vmem:[%s11007_s27 + $0xb0] sm:$0xff] %v2794_v5  ;;  %v11891_v1 = vpop.f32.mrf.mxu1 }
 0x254   : > { %5216 = vmatmul.f32.vlgmr.msra.gmra.mxu0 %v11729_v10  ;;  %2822 = vst [vmem:[%s11007_s27 + $0xb8] sm:$0xff] %v2795_v19 }
 0x255   : > { %9847 = vmatpush.msk.msra.mxu2 %vm10641_vm13, %v10351_v49  ;;  %9852 = vmatpush.msk.msra.mxu0 %vm10686_vm2, %v10351_v49  ;;  %2823 = vst [vmem:[%s11007_s27 + $0xc0] sm:$0xff] %v2793_v29  ;;  %v3040_v2 = vpop.f32.mrf.mxu2  ;;  %v11907_v6 = vpop.f32.mrf.mxu3  ;;  %v2791_v29 = vsel %vm1119_vm0, %v2790_v45, %v11834_v24  ;;  %v2939_v24 = vadd.f32 %v11859_v23, %v2913_v12 }
 0x256   : > { %9851 = vmatpush.msk.msrb.mxu3 %vm10641_vm13, %v10351_v49  ;;  %5239 = vmatmul.f32.vlgmr.msra.gmra.mxu1 %v11729_v10  ;;  %2824 = vst [vmem:[%s11007_s27 + $0xc8] sm:$0xff] %v2794_v5  ;;  %v3072_v18 = vadd.f32 %v3071_v13, %v3040_v2  ;;  %v2801_v5 = vperm.slane %v2789_v8, 2  ;;  %v2792_v31 = vrot.slane %v2791_v29, 3 }
 0x257   : > { %9853 = vmatpush.msk.msra.mxu0 %vm10690_vm3, %v10351_v49  ;;  %5448 = vmatpush.msra.mxu1 %v10738_v44  ;;  %2825 = vst [vmem:[%s11007_s27 + $0xd0] sm:$0xff] %v2795_v19  ;;  %v5638_v19 = vpop.permute.xlu2 %5637 }
 0x258   : > { %2826 = vst [vmem:[%s11007_s27 + $0x3f0] sm:$0xc0] %v2796_v63  ;;  %v3098_v56 = vadd.f32 %v11836_v11, %v3072_v18  ;;  %v5639_v11 = vsel %vm617_vm5, %v5638_v19, 0  ;;  %v2802_v0 = vperm.slane %v2792_v31, 0 }
 0x259   : > { %5454 = vmatpush.msra.mxu1 %v10744_v50  ;;  %2827 = vst [vmem:[%s11007_s27 + $0x3f8] sm:$0xc0] %v2797_v33  ;;  %v11918_v60 = vpop.f32.mrf.mxu0 }
 0x25a   : > { %5164 = vmatmul.f32.vlgmr.msrb.gmra.mxu2 %v11765_v14  ;;  %5297 = vmatmul.f32.vlgmr.msra.gmra.mxu3 %v11729_v10  ;;  %2828 = vst [vmem:[%s11007_s27 + $0x400] sm:$0xc0] %v2798_v21  ;;  %v3123_v39 = vadd.f32 %v11852_v41, %v3098_v56  ;;  %v11975_v41 = vand.u32 4294901760, %v5639_v11 }
 0x25b   : > { %5369 = vmatpush.msrb.mxu2 %v10663_v54  ;;  %9854 = vmatpush.msk.msra.mxu3 %vm10686_vm2, %v10351_v49  ;;  %2829 = vst [vmem:[%s11007_s27 + $0x408] sm:$0xff] %v2796_v63  ;;  %v11928_v59 = vpop.f32.mrf.mxu1 }
 0x25c   : > { %5323 = vmatmul.f32.vlgmr.msrb.gmra.mxu0 %v11765_v14  ;;  %2830 = vst [vmem:[%s11007_s27 + $0x410] sm:$0xff] %v2797_v33  ;;  %v11996_v2 = vsub.f32 %v5639_v11, %v11975_v41 }
 0x25d   : > { %5373 = vmatpush.msrb.mxu2 %v10671_v57  ;;  %5528 = vmatpush.msrb.mxu0 %v10711_v25  ;;  %2831 = vst [vmem:[%s11007_s27 + $0x418] sm:$0xff] %v2798_v21  ;;  %v3149_v53 = vpop.f32.mrf.mxu2  ;;  %v3281_v28 = vpop.f32.mrf.mxu3 }
 0x25e   : > { %9855 = vmatpush.msk.msra.mxu3 %vm10690_vm3, %v10351_v49  ;;  %5348 = vmatmul.f32.vlgmr.msrb.gmra.mxu1 %v11781_v3  ;;  %2832 = vst [vmem:[%s11007_s27 + $0x420] sm:$0xff] %v2796_v63  ;;  %v3150_v13 = vadd.f32 %v3149_v53, %v3123_v39  ;;  %v2964_v63 = vadd.f32 %v11815_v26, %v2939_v24  ;;  %v12033_v45 = vand.u32 4294901760, %v11996_v2 }
 0x25f   : > { %5532 = vmatpush.msrb.mxu0 %v10718_v27  ;;  %9856 = vmatpush.msk.msrb.mxu1 %vm10686_vm2, %v10351_v49  ;;  %2833 = vst [vmem:[%s11007_s27 + $0x428] sm:$0xff] %v2797_v33  ;;  %v2803_v33 = vperm.slane %v2792_v31, 1 }
 0x260   : > { %2834 = vst [vmem:[%s11007_s27 + $0x430] sm:$0xff] %v2798_v21  ;;  %v3173_v26 = vadd.f32 %v11907_v6, %v3150_v13  ;;  %v2991_v8 = vadd.f32 %v11784_v4, %v2964_v63 }
 0x261   : > { %9857 = vmatpush.msk.msrb.mxu1 %vm10690_vm3, %v10351_v49  ;;  %2835 = vst [vmem:[%s11007_s27 + $0x750] sm:$0xc0] %v2799_v16  ;;  %v11960_v30 = vpop.f32.mrf.mxu0 }
 0x262   : > { %5266 = vmatmul.f32.vlgmr.msra.gmra.mxu2 %v11825_v46  ;;  %5398 = vmatmul.f32.vlgmr.msrb.gmra.mxu3 %v11729_v10  ;;  %2836 = vst [vmem:[%s11007_s27 + $0x758] sm:$0xc0] %v2800_v34  ;;  %v12015_v4 = vrot.slane %v3173_v26, 7 }
 0x263   : > { %5476 = vmatpush.msra.mxu2 %v10700_v17  ;;  %5687 = vmatpush.msrb.mxu3 %v10610_v43  ;;  %2837 = vst [vmem:[%s11007_s27 + $0x760] sm:$0xc0] %v2801_v5  ;;  %v11969_v23 = vpop.f32.mrf.mxu1 }
 0x264   : > { %5425 = vmatmul.f32.vlgmr.msra.gmra.mxu0 %v11825_v46  ;;  %2838 = vst [vmem:[%s11007_s27 + $0x768] sm:$0xff] %v2799_v16  ;;  %v3231_v46 = vadd.f32 %v11891_v1, %v11877_v35  ;;  %v2804_v35 = vperm.slane %v2792_v31, 2 }
 0x265   : > { %5479 = vmatpush.msra.mxu2 %v10702_v20  ;;  %5715 = vmatpush.msra.mxu0 %v10587_v36  ;;  %2839 = vst [vmem:[%s11007_s27 + $0x770] sm:$0xff] %v2800_v34  ;;  %v3256_v15 = vpop.f32.mrf.mxu2  ;;  %v11982_v21 = vpop.f32.mrf.mxu3 }
 0x266   : > { %5693 = vmatpush.msrb.mxu3 %v10615_v47  ;;  %2840 = vst [vmem:[%s11007_s27 + $0x778] sm:$0xff] %v2801_v5  ;;  %5456 = vmatmul.f32.vlgmr.msra.gmra.mxu1 %v11729_v10  ;;  %v3257_v61 = vadd.f32 %v3256_v15, %v3231_v46 }
 0x267   : > { %5718 = vmatpush.msra.mxu0 %v10602_v40  ;;  %2841 = vst [vmem:[%s11007_s27 + $0x780] sm:$0xff] %v2799_v16  ;;  %9860 = vmatpush.msk.msra.mxu1 %vm10577_vm4, %v10351_v49  ;;  %v12029_v16 = vadd.f32 %v11796_v22, %v2991_v8 }
 0x268   : > { %2842 = vst [vmem:[%s11007_s27 + $0x788] sm:$0xff] %v2800_v34  ;;  %v3282_v1 = vadd.f32 %v3281_v28, %v3257_v61 }
 0x269   : > { %2843 = vst [vmem:[%s11007_s27 + $0x790] sm:$0xff] %v2801_v5  ;;  %9861 = vmatpush.msk.msra.mxu1 %vm10591_vm7, %v10351_v49  ;;  %v12006_v6 = vpop.f32.mrf.mxu0  ;;  %v3341_v22 = vsel %vm1107_vm8, %v12029_v16, %v12015_v4  ;;  %v3344_v63 = vsel %vm1112_vm12, %v12029_v16, %v12015_v4 }
 0x26a   : > { %5375 = vmatmul.f32.vlgmr.msrb.gmra.mxu2 %v11729_v10  ;;  %5507 = vmatmul.f32.vlgmr.msra.gmra.mxu3 %v11781_v3  ;;  %2844 = vst [vmem:[%s11007_s27 + $0xab0] sm:$0xc0] %v2802_v0  ;;  %v3309_v3 = vadd.f32 %v11918_v60, %v3282_v1 }
 0x26b   : > { %9858 = vmatpush.msk.msrb.mxu2 %vm10577_vm4, %v10351_v49  ;;  %2845 = vst [vmem:[%s11007_s27 + $0xab8] sm:$0xc0] %v2803_v33  ;;  %9862 = vmatpush.msk.msra.mxu3 %vm10577_vm4, %v10351_v49  ;;  %v12022_v60 = vpop.f32.mrf.mxu1 }
 0x26c   : > { %5534 = vmatmul.f32.vlgmr.msrb.gmra.mxu0 %v11729_v10  ;;  %2846 = vst [vmem:[%s11007_s27 + $0xac0] sm:$0xc0] %v2804_v35  ;;  %v3332_v18 = vadd.f32 %v11928_v59, %v3309_v3  ;;  %v3629_v3 = vadd.f32 %v12022_v60, %v12006_v6  ;;  %v3347_v60 = vsel %vm1117_vm15, %v12029_v16, %v12015_v4 }
 0x26d   : > { %9859 = vmatpush.msk.msrb.mxu2 %vm10591_vm7, %v10351_v49  ;;  %9864 = vmatpush.msk.msrb.mxu0 %vm10620_vm10, %v10351_v49  ;;  %2847 = vst [vmem:[%s11007_s27 + $0xac8] sm:$0xff] %v2802_v0  ;;  %v12041_v34 = vpop.f32.mrf.mxu2  ;;  %v12043_v56 = vpop.f32.mrf.mxu3 }
 0x26e   : > { %9863 = vmatpush.msk.msra.mxu3 %vm10591_vm7, %v10351_v49  ;;  %2848 = vst [vmem:[%s11007_s27 + $0xad0] sm:$0xff] %v2803_v33  ;;  %5557 = vmatmul.f32.vlgmr.msrb.gmra.mxu1 %v11729_v10  ;;  %v12039_v59 = vrot.slane %v3332_v18, 6  ;;  %v3339_v10 = vsel %vm1103_vm6, %v12029_v16, %v12015_v4 }
 0x26f   : > { %9865 = vmatpush.msk.msrb.mxu0 %vm10641_vm13, %v10351_v49  ;;  %2849 = vst [vmem:[%s11007_s27 + $0xad8] sm:$0xff] %v2804_v35  ;;  %5846 = vmatpush.msrb.mxu1 %v10674_v58 }
 0x270   : > { %2850 = vst [vmem:[%s11007_s27 + $0xae0] sm:$0xff] %v2802_v0  ;;  %v3340_v53 = vsel %vm1105_vm9, %v3339_v10, %v12039_v59  ;;  %v3342_v28 = vsel %vm1109_vm11, %v3341_v22, %v12039_v59  ;;  %v6195_v0 = vpop.permute.xlu0 %6194  ;;  %v3348_v4 = vsel %vm1119_vm0, %v3347_v60, %v12039_v59 }
 0x271   : > { %2851 = vst [vmem:[%s11007_s27 + $0xae8] sm:$0xff] %v2803_v33  ;;  %v3350_v29 = vperm.slane %v3340_v53, 0  ;;  %v3351_v5 = vperm.slane %v3340_v53, 1  ;;  %v3352_v19 = vperm.slane %v3340_v53, 2  ;;  %v12064_v12 = vpop.f32.mrf.mxu0  ;;  %5852 = vmatpush.msrb.mxu1 %v10679_v62  ;;  %v3343_v31 = vrot.slane %v3342_v28, 1 }
 0x272   : > { %5482 = vmatmul.f32.vlgmr.msra.gmra.mxu2 %v11765_v14  ;;  %2852 = vst [vmem:[%s11007_s27 + $0xaf0] sm:$0xff] %v2804_v35  ;;  %5695 = vmatmul.f32.vlgmr.msrb.gmra.mxu3 %v11975_v41  ;;  %v5662_v14 = vsub.f32 %v11996_v2, %v12033_v45  ;;  %v3345_v33 = vsel %vm1114_vm14, %v3344_v63, %v12039_v59  ;;  %v6196_v26 = vsel %vm617_vm5, %v6195_v0, 0  ;;  %v3349_v59 = vrot.slane %v3348_v4, 3 }
 0x273   : > { %5767 = vmatpush.msra.mxu2 %v10596_v38  ;;  %3374 = vst [vmem:[%s11007_s27 + $0xd8] sm:$0xff] %v3350_v29  ;;  %9866 = vmatpush.msk.msrb.mxu3 %vm10620_vm10, %v10351_v49  ;;  %v12074_v24 = vpop.f32.mrf.mxu1  ;;  %v3353_v46 = vperm.slane %v3343_v31, 0  ;;  %v3354_v15 = vperm.slane %v3343_v31, 1  ;;  %v3355_v61 = vperm.slane %v3343_v31, 2  ;;  %v3346_v8 = vrot.slane %v3345_v33, 2 }
 0x274   : > { %5721 = vmatmul.f32.vlgmr.msra.gmra.mxu0 %v11996_v2  ;;  %3375 = vst [vmem:[%s11007_s27 + $0xe0] sm:$0xff] %v3351_v5  ;;  %v12079_v39 = vand.u32 4294901760, %v5662_v14  ;;  %v12127_v22 = vand.u32 4294901760, %v6196_v26  ;;  %v3359_v33 = vperm.slane %v3349_v59, 0 }
 0x275   : > { %5926 = vmatpush.msra.mxu0 %v10663_v54  ;;  %5771 = vmatpush.msra.mxu2 %v10607_v42  ;;  %3376 = vst [vmem:[%s11007_s27 + $0xe8] sm:$0xff] %v3352_v19  ;;  %v12085_v11 = vpop.f32.mrf.mxu2  ;;  %v3679_v13 = vpop.f32.mrf.mxu3  ;;  %v3356_v6 = vperm.slane %v3346_v8, 0  ;;  %v3357_v28 = vperm.slane %v3346_v8, 1  ;;  %v3358_v16 = vperm.slane %v3346_v8, 2 }
 0x276   : > { %5746 = vmatmul.f32.vlgmr.msra.gmra.mxu1 %v12033_v45  ;;  %9867 = vmatpush.msk.msrb.mxu3 %vm10641_vm13, %v10351_v49  ;;  %3377 = vst [vmem:[%s11007_s27 + $0xf0] sm:$0xff] %v3350_v29  ;;  %v12154_v14 = vsub.f32 %v6196_v26, %v12127_v22 }
 0x277   : > { %5930 = vmatpush.msra.mxu0 %v10671_v57  ;;  %9868 = vmatpush.msk.msra.mxu1 %vm10620_vm10, %v10351_v49  ;;  %3378 = vst [vmem:[%s11007_s27 + $0xf8] sm:$0xff] %v3351_v5 }
 0x278   : > { %3379 = vst [vmem:[%s11007_s27 + $0x100] sm:$0xff] %v3352_v19 }
 0x279   : > { %9869 = vmatpush.msk.msra.mxu1 %vm10641_vm13, %v10351_v49  ;;  %3380 = vst [vmem:[%s11007_s27 + $0x108] sm:$0x3] %v3350_v29  ;;  %v12107_v35 = vpop.f32.mrf.mxu0 }
 0x27a   : > { %5664 = vmatmul.f32.vlgmr.msrb.gmra.mxu2 %v12079_v39  ;;  %5796 = vmatmul.f32.vlgmr.msra.gmra.mxu3 %v11975_v41  ;;  %3381 = vst [vmem:[%s11007_s27 + $0x110] sm:$0x3] %v3351_v5  ;;  %v3470_v5 = vadd.f32 %v11982_v21, %v12041_v34  ;;  %v12178_v34 = vand.u32 4294901760, %v12154_v14 }
 0x27b   : > { %5874 = vmatpush.msrb.mxu2 %v10645_v52  ;;  %6005 = vmatpush.msra.mxu3 %v10738_v44  ;;  %3382 = vst [vmem:[%s11007_s27 + $0x118] sm:$0x3] %v3352_v19  ;;  %v12115_v1 = vpop.f32.mrf.mxu1 }
 0x27c   : > { %5823 = vmatmul.f32.vlgmr.msrb.gmra.mxu0 %v12079_v39  ;;  %3383 = vst [vmem:[%s11007_s27 + $0x438] sm:$0xff] %v3353_v46  ;;  %v3496_v0 = vadd.f32 %v11960_v30, %v3470_v5  ;;  %v3360_v30 = vperm.slane %v3349_v59, 1 }
 0x27d   : > { %5877 = vmatpush.msrb.mxu2 %v10665_v55  ;;  %6033 = vmatpush.msrb.mxu0 %v10700_v17  ;;  %3384 = vst [vmem:[%s11007_s27 + $0x440] sm:$0xff] %v3354_v15  ;;  %v3654_v18 = vpop.f32.mrf.mxu2  ;;  %v3787_v10 = vpop.f32.mrf.mxu3 }
 0x27e   : > { %6011 = vmatpush.msra.mxu3 %v10744_v50  ;;  %5854 = vmatmul.f32.vlgmr.msrb.gmra.mxu1 %v11975_v41  ;;  %3385 = vst [vmem:[%s11007_s27 + $0x448] sm:$0xff] %v3355_v61  ;;  %v3655_v53 = vadd.f32 %v3654_v18, %v3629_v3 }
 0x27f   : > { %6036 = vmatpush.msrb.mxu0 %v10702_v20  ;;  %9872 = vmatpush.msk.msrb.mxu1 %vm10686_vm2, %v10351_v49  ;;  %3386 = vst [vmem:[%s11007_s27 + $0x450] sm:$0xff] %v3353_v46 }
 0x280   : > { %3387 = vst [vmem:[%s11007_s27 + $0x458] sm:$0xff] %v3354_v15  ;;  %v3680_v19 = vadd.f32 %v3679_v13, %v3655_v53 }
 0x281   : > { %9873 = vmatpush.msk.msrb.mxu1 %vm10690_vm3, %v10351_v49  ;;  %3388 = vst [vmem:[%s11007_s27 + $0x460] sm:$0xff] %v3355_v61  ;;  %v12145_v29 = vpop.f32.mrf.mxu0 }
 0x282   : > { %5773 = vmatmul.f32.vlgmr.msra.gmra.mxu2 %v11975_v41  ;;  %5905 = vmatmul.f32.vlgmr.msrb.gmra.mxu3 %v12033_v45  ;;  %3389 = vst [vmem:[%s11007_s27 + $0x468] sm:$0x3] %v3353_v46  ;;  %v3707_v63 = vadd.f32 %v12064_v12, %v3680_v19  ;;  %v6219_v12 = vsub.f32 %v12154_v14, %v12178_v34 }
 0x283   : > { %9870 = vmatpush.msk.msra.mxu2 %vm10686_vm2, %v10351_v49  ;;  %9874 = vmatpush.msk.msrb.mxu3 %vm10686_vm2, %v10351_v49  ;;  %3390 = vst [vmem:[%s11007_s27 + $0x470] sm:$0x3] %v3354_v15  ;;  %v12165_v31 = vpop.f32.mrf.mxu1 }
 0x284   : > { %5932 = vmatmul.f32.vlgmr.msra.gmra.mxu0 %v11975_v41  ;;  %3391 = vst [vmem:[%s11007_s27 + $0x478] sm:$0x3] %v3355_v61  ;;  %v3730_v26 = vadd.f32 %v12074_v24, %v3707_v63 }
 0x285   : > { %9871 = vmatpush.msk.msra.mxu2 %vm10690_vm3, %v10351_v49  ;;  %9876 = vmatpush.msk.msra.mxu0 %vm10577_vm4, %v10351_v49  ;;  %3392 = vst [vmem:[%s11007_s27 + $0x798] sm:$0xff] %v3356_v6  ;;  %v3756_v46 = vpop.f32.mrf.mxu2  ;;  %v3888_v21 = vpop.f32.mrf.mxu3 }
 0x286   : > { %9875 = vmatpush.msk.msrb.mxu3 %vm10690_vm3, %v10351_v49  ;;  %5955 = vmatmul.f32.vlgmr.msra.gmra.mxu1 %v11975_v41  ;;  %3393 = vst [vmem:[%s11007_s27 + $0x7a0] sm:$0xff] %v3357_v28  ;;  %v3788_v13 = vadd.f32 %v3787_v10, %v3756_v46 }
 0x287   : > { %9877 = vmatpush.msk.msra.mxu0 %vm10591_vm7, %v10351_v49  ;;  %6244 = vmatpush.msra.mxu1 %v10610_v43  ;;  %3394 = vst [vmem:[%s11007_s27 + $0x7a8] sm:$0xff] %v3358_v16 }
 0x288   : > { %3395 = vst [vmem:[%s11007_s27 + $0x7b0] sm:$0xff] %v3356_v6  ;;  %v3814_v15 = vadd.f32 %v12107_v35, %v3788_v13  ;;  %v3521_v35 = vadd.f32 %v11969_v23, %v3496_v0 }
 0x289   : > { %6250 = vmatpush.msra.mxu1 %v10615_v47  ;;  %3396 = vst [vmem:[%s11007_s27 + $0x7b8] sm:$0xff] %v3357_v28  ;;  %v12192_v61 = vpop.f32.mrf.mxu0 }
 0x28a   : > { %5880 = vmatmul.f32.vlgmr.msrb.gmra.mxu2 %v11996_v2  ;;  %6013 = vmatmul.f32.vlgmr.msra.gmra.mxu3 %v11975_v41  ;;  %3397 = vst [vmem:[%s11007_s27 + $0x7c0] sm:$0xff] %v3358_v16  ;;  %v3839_v3 = vadd.f32 %v12115_v1, %v3814_v15  ;;  %v3548_v23 = vadd.f32 %v12085_v11, %v3521_v35  ;;  %v12223_v1 = vand.u32 4294901760, %v6219_v12 }
 0x28b   : > { %6085 = vmatpush.msrb.mxu2 %v10711_v25  ;;  %9878 = vmatpush.msk.msra.mxu3 %vm10577_vm4, %v10351_v49  ;;  %3398 = vst [vmem:[%s11007_s27 + $0x7c8] sm:$0x3] %v3356_v6  ;;  %v12205_v8 = vpop.f32.mrf.mxu1 }
 0x28c   : > { %6039 = vmatmul.f32.vlgmr.msrb.gmra.mxu0 %v11996_v2  ;;  %v3361_v2 = vperm.slane %v3349_v59, 2  ;;  %3399 = vst [vmem:[%s11007_s27 + $0x7d0] sm:$0x3] %v3357_v28 }
 0x28d   : > { %6089 = vmatpush.msrb.mxu2 %v10718_v27  ;;  %6324 = vmatpush.msrb.mxu0 %v10596_v38  ;;  %3400 = vst [vmem:[%s11007_s27 + $0x7d8] sm:$0x3] %v3358_v16  ;;  %v3865_v24 = vpop.f32.mrf.mxu2  ;;  %v12220_v10 = vpop.f32.mrf.mxu3 }
 0x28e   : > { %9879 = vmatpush.msk.msra.mxu3 %vm10591_vm7, %v10351_v49  ;;  %6064 = vmatmul.f32.vlgmr.msrb.gmra.mxu1 %v12033_v45  ;;  %3401 = vst [vmem:[%s11007_s27 + $0xaf8] sm:$0xff] %v3359_v33  ;;  %v3866_v18 = vadd.f32 %v3865_v24, %v3839_v3  ;;  %v12226_v45 = vrot.slane %v3730_v26, 7 }
 0x28f   : > { %6328 = vmatpush.msrb.mxu0 %v10607_v42  ;;  %9880 = vmatpush.msk.msrb.mxu1 %vm10577_vm4, %v10351_v49  ;;  %3402 = vst [vmem:[%s11007_s27 + $0xb00] sm:$0xff] %v3360_v30 }
 0x290   : > { %3403 = vst [vmem:[%s11007_s27 + $0xb08] sm:$0xff] %v3361_v2  ;;  %v3889_v11 = vadd.f32 %v3888_v21, %v3866_v18  ;;  %v6752_v18 = vpop.permute.xlu1 %6751 }
 0x291   : > { %9881 = vmatpush.msk.msrb.mxu1 %vm10591_vm7, %v10351_v49  ;;  %3404 = vst [vmem:[%s11007_s27 + $0xb10] sm:$0xff] %v3359_v33  ;;  %v12244_v6 = vpop.f32.mrf.mxu0 }
 0x292   : > { %5982 = vmatmul.f32.vlgmr.msra.gmra.mxu2 %v12079_v39  ;;  %6114 = vmatmul.f32.vlgmr.msrb.gmra.mxu3 %v11975_v41  ;;  %3405 = vst [vmem:[%s11007_s27 + $0xb18] sm:$0xff] %v3360_v30  ;;  %v12237_v39 = vadd.f32 %v12043_v56, %v3548_v23  ;;  %v12242_v53 = vrot.slane %v3889_v11, 6 }
 0x293   : > { %6272 = vmatpush.msra.mxu2 %v10587_v36  ;;  %6403 = vmatpush.msrb.mxu3 %v10674_v58  ;;  %3406 = vst [vmem:[%s11007_s27 + $0xb20] sm:$0xff] %v3361_v2  ;;  %v12258_v4 = vpop.f32.mrf.mxu1 }
 0x294   : > { %6221 = vmatmul.f32.vlgmr.msra.gmra.mxu0 %v12223_v1  ;;  %3407 = vst [vmem:[%s11007_s27 + $0xb28] sm:$0x3] %v3359_v33  ;;  %v3896_v60 = vsel %vm1103_vm6, %v12237_v39, %v12226_v45  ;;  %v3898_v28 = vsel %vm1107_vm8, %v12237_v39, %v12226_v45  ;;  %v3901_v15 = vsel %vm1112_vm12, %v12237_v39, %v12226_v45 }
 0x295   : > { %6275 = vmatpush.msra.mxu2 %v10602_v40  ;;  %6431 = vmatpush.msra.mxu0 %v10645_v52  ;;  %3408 = vst [vmem:[%s11007_s27 + $0xb30] sm:$0x3] %v3360_v30  ;;  %v3897_v56 = vsel %vm1105_vm9, %v3896_v60, %v12242_v53  ;;  %v3899_v16 = vsel %vm1109_vm11, %v3898_v28, %v12242_v53  ;;  %v12265_v46 = vpop.f32.mrf.mxu2  ;;  %v4185_v21 = vpop.f32.mrf.mxu3 }
 0x296   : > { %6409 = vmatpush.msrb.mxu3 %v10679_v62  ;;  %3409 = vst [vmem:[%s11007_s27 + $0xb38] sm:$0x3] %v3361_v2  ;;  %v3907_v5 = vperm.slane %v3897_v56, 0  ;;  %6252 = vmatmul.f32.vlgmr.msra.gmra.mxu1 %v12127_v22  ;;  %v3908_v19 = vperm.slane %v3897_v56, 1  ;;  %v3909_v59 = vperm.slane %v3897_v56, 2  ;;  %v3900_v13 = vrot.slane %v3899_v16, 1 }
 0x297   : > { %6434 = vmatpush.msra.mxu0 %v10665_v55  ;;  %9884 = vmatpush.msk.msra.mxu1 %vm10620_vm10, %v10351_v49  ;;  %v3902_v30 = vsel %vm1114_vm14, %v3901_v15, %v12242_v53  ;;  %v3904_v60 = vsel %vm1117_vm15, %v12237_v39, %v12226_v45  ;;  %v4027_v45 = vadd.f32 %v12165_v31, %v12145_v29  ;;  %v6753_v39 = vsel %vm617_vm5, %v6752_v18, 0 }
 0x298   : > { %3931 = vst [vmem:[%s11007_s27 + $0x108] sm:$0xfc] %v3907_v5  ;;  %v3910_v0 = vperm.slane %v3900_v13, 0  ;;  %v3911_v33 = vperm.slane %v3900_v13, 1  ;;  %v3912_v12 = vperm.slane %v3900_v13, 2  ;;  %v3903_v26 = vrot.slane %v3902_v30, 2 }
 0x299   : > { %3932 = vst [vmem:[%s11007_s27 + $0x110] sm:$0xfc] %v3908_v19  ;;  %9885 = vmatpush.msk.msra.mxu1 %vm10641_vm13, %v10351_v49  ;;  %v4053_v29 = vadd.f32 %v12265_v46, %v4027_v45 }
 0x29a   : > { %6091 = vmatmul.f32.vlgmr.msrb.gmra.mxu2 %v11975_v41  ;;  %6303 = vmatmul.f32.vlgmr.msra.gmra.mxu3 %v12178_v34  ;;  %3933 = vst [vmem:[%s11007_s27 + $0x118] sm:$0xfc] %v3909_v59  ;;  %v12286_v41 = vpop.f32.mrf.mxu0  ;;  %v3913_v11 = vperm.slane %v3903_v26, 0  ;;  %v3914_v56 = vperm.slane %v3903_v26, 1 }
 0x29b   : > { %9882 = vmatpush.msk.msrb.mxu2 %vm10620_vm10, %v10351_v49  ;;  %3934 = vst [vmem:[%s11007_s27 + $0x120] sm:$0xff] %v3907_v5  ;;  %9886 = vmatpush.msk.msra.mxu3 %vm10620_vm10, %v10351_v49  ;;  %v12296_v63 = vpop.f32.mrf.mxu1 }
 0x29c   : > { %6330 = vmatmul.f32.vlgmr.msrb.gmra.mxu0 %v12127_v22  ;;  %3935 = vst [vmem:[%s11007_s27 + $0x128] sm:$0xff] %v3908_v19 }
 0x29d   : > { %9883 = vmatpush.msk.msrb.mxu2 %vm10641_vm13, %v10351_v49  ;;  %9888 = vmatpush.msk.msrb.mxu0 %vm10686_vm2, %v10351_v49  ;;  %3936 = vst [vmem:[%s11007_s27 + $0x130] sm:$0xff] %v3909_v59  ;;  %v4154_v2 = vpop.f32.mrf.mxu2  ;;  %v12312_v35 = vpop.f32.mrf.mxu3 }
 0x29e   : > { %9887 = vmatpush.msk.msra.mxu3 %vm10641_vm13, %v10351_v49  ;;  %3937 = vst [vmem:[%s11007_s27 + $0x138] sm:$0xf] %v3907_v5  ;;  %6353 = vmatmul.f32.vlgmr.msrb.gmra.mxu1 %v12127_v22  ;;  %v4186_v3 = vadd.f32 %v4185_v21, %v4154_v2 }
 0x29f   : > { %9889 = vmatpush.msk.msrb.mxu0 %vm10690_vm3, %v10351_v49  ;;  %3938 = vst [vmem:[%s11007_s27 + $0x140] sm:$0xf] %v3908_v19  ;;  %6562 = vmatpush.msrb.mxu1 %v10738_v44  ;;  %v3905_v19 = vsel %vm1119_vm0, %v3904_v60, %v12242_v53 }
 0x2a0   : > { %3939 = vst [vmem:[%s11007_s27 + $0x148] sm:$0xf] %v3909_v59  ;;  %v4212_v28 = vadd.f32 %v12244_v6, %v4186_v3  ;;  %v3915_v59 = vperm.slane %v3903_v26, 2  ;;  %v3906_v53 = vrot.slane %v3905_v19, 3 }
 0x2a1   : > { %3940 = vst [vmem:[%s11007_s27 + $0x468] sm:$0xfc] %v3910_v0  ;;  %6568 = vmatpush.msrb.mxu1 %v10744_v50 }
 0x2a2   : > { %6278 = vmatmul.f32.vlgmr.msra.gmra.mxu2 %v12154_v14  ;;  %6411 = vmatmul.f32.vlgmr.msrb.gmra.mxu3 %v12127_v22  ;;  %3941 = vst [vmem:[%s11007_s27 + $0x470] sm:$0xfc] %v3911_v33  ;;  %v12325_v23 = vpop.f32.mrf.mxu0  ;;  %v4237_v31 = vadd.f32 %v12258_v4, %v4212_v28  ;;  %v4345_v4 = vadd.f32 %v12296_v63, %v12286_v41  ;;  %v3916_v46 = vperm.slane %v3906_v53, 0  ;;  %v3918_v41 = vperm.slane %v3906_v53, 2 }
 0x2a3   : > { %6483 = vmatpush.msra.mxu2 %v10663_v54  ;;  %3942 = vst [vmem:[%s11007_s27 + $0x478] sm:$0xfc] %v3912_v12  ;;  %9890 = vmatpush.msk.msrb.mxu3 %vm10686_vm2, %v10351_v49  ;;  %v12333_v24 = vpop.f32.mrf.mxu1 }
 0x2a4   : > { %6437 = vmatmul.f32.vlgmr.msra.gmra.mxu0 %v12154_v14  ;;  %3943 = vst [vmem:[%s11007_s27 + $0x480] sm:$0xff] %v3910_v0 }
 0x2a5   : > { %6487 = vmatpush.msra.mxu2 %v10671_v57  ;;  %6642 = vmatpush.msra.mxu0 %v10711_v25  ;;  %3944 = vst [vmem:[%s11007_s27 + $0x488] sm:$0xff] %v3911_v33  ;;  %v4263_v16 = vpop.f32.mrf.mxu2  ;;  %v4395_v5 = vpop.f32.mrf.mxu3 }
 0x2a6   : > { %9891 = vmatpush.msk.msrb.mxu3 %vm10690_vm3, %v10351_v49  ;;  %3945 = vst [vmem:[%s11007_s27 + $0x490] sm:$0xff] %v3912_v12  ;;  %6462 = vmatmul.f32.vlgmr.msra.gmra.mxu1 %v12178_v34  ;;  %v4264_v21 = vadd.f32 %v4263_v16, %v4237_v31 }
 0x2a7   : > { %6646 = vmatpush.msra.mxu0 %v10718_v27  ;;  %3946 = vst [vmem:[%s11007_s27 + $0x498] sm:$0xf] %v3910_v0  ;;  %9892 = vmatpush.msk.msra.mxu1 %vm10686_vm2, %v10351_v49  ;;  %v4078_v0 = vadd.f32 %v12220_v10, %v4053_v29 }
 0x2a8   : > { %3947 = vst [vmem:[%s11007_s27 + $0x4a0] sm:$0xf] %v3911_v33  ;;  %v3917_v33 = vperm.slane %v3906_v53, 1  ;;  %v4287_v63 = vadd.f32 %v12312_v35, %v4264_v21 }
 0x2a9   : > { %3948 = vst [vmem:[%s11007_s27 + $0x4a8] sm:$0xf] %v3912_v12  ;;  %9893 = vmatpush.msk.msra.mxu1 %vm10690_vm3, %v10351_v49  ;;  %v4105_v26 = vadd.f32 %v12192_v61, %v4078_v0 }
 0x2aa   : > { %6380 = vmatmul.f32.vlgmr.msrb.gmra.mxu2 %v12223_v1  ;;  %6512 = vmatmul.f32.vlgmr.msra.gmra.mxu3 %v12127_v22  ;;  %3949 = vst [vmem:[%s11007_s27 + $0x7c8] sm:$0xfc] %v3913_v11  ;;  %v12368_v6 = vpop.f32.mrf.mxu0  ;;  %v12423_v3 = vrot.slane %v4287_v63, 7 }
 0x2ab   : > { %6590 = vmatpush.msrb.mxu2 %v10700_v17  ;;  %3950 = vst [vmem:[%s11007_s27 + $0x7d0] sm:$0xfc] %v3914_v56  ;;  %6801 = vmatpush.msra.mxu3 %v10610_v43  ;;  %v12376_v13 = vpop.f32.mrf.mxu1 }
 0x2ac   : > { %6539 = vmatmul.f32.vlgmr.msrb.gmra.mxu0 %v12223_v1  ;;  %3951 = vst [vmem:[%s11007_s27 + $0x7d8] sm:$0xfc] %v3915_v59  ;;  %v12373_v1 = vand.u32 4294901760, %v6753_v39 }
 0x2ad   : > { %6593 = vmatpush.msrb.mxu2 %v10702_v20  ;;  %6829 = vmatpush.msrb.mxu0 %v10587_v36  ;;  %3952 = vst [vmem:[%s11007_s27 + $0x7e0] sm:$0xff] %v3913_v11  ;;  %v4370_v15 = vpop.f32.mrf.mxu2  ;;  %v12388_v12 = vpop.f32.mrf.mxu3 }
 0x2ae   : > { %6807 = vmatpush.msra.mxu3 %v10615_v47  ;;  %3953 = vst [vmem:[%s11007_s27 + $0x7e8] sm:$0xff] %v3914_v56  ;;  %6570 = vmatmul.f32.vlgmr.msrb.gmra.mxu1 %v12127_v22  ;;  %v4371_v30 = vadd.f32 %v4370_v15, %v4345_v4  ;;  %v12397_v10 = vsub.f32 %v6753_v39, %v12373_v1  ;;  %v7309_v4 = vpop.permute.xlu2 %7308 }
 0x2af   : > { %6832 = vmatpush.msrb.mxu0 %v10602_v40  ;;  %3954 = vst [vmem:[%s11007_s27 + $0x7f0] sm:$0xff] %v3915_v59  ;;  %9896 = vmatpush.msk.msrb.mxu1 %vm10577_vm4, %v10351_v49 }
 0x2b0   : > { %3955 = vst [vmem:[%s11007_s27 + $0x7f8] sm:$0xf] %v3913_v11  ;;  %v4396_v2 = vadd.f32 %v4395_v5, %v4371_v30  ;;  %v12426_v18 = vand.u32 4294901760, %v12397_v10  ;;  %v12440_v11 = vadd.f32 %v12205_v8, %v4105_v26 }
 0x2b1   : > { %3956 = vst [vmem:[%s11007_s27 + $0x800] sm:$0xf] %v3914_v56  ;;  %9897 = vmatpush.msk.msrb.mxu1 %vm10591_vm7, %v10351_v49 }
 0x2b2   : > { %6489 = vmatmul.f32.vlgmr.msra.gmra.mxu2 %v12127_v22  ;;  %6621 = vmatmul.f32.vlgmr.msrb.gmra.mxu3 %v12178_v34  ;;  %3957 = vst [vmem:[%s11007_s27 + $0x808] sm:$0xf] %v3915_v59  ;;  %v4423_v34 = vadd.f32 %v12325_v23, %v4396_v2  ;;  %v12420_v35 = vpop.f32.mrf.mxu0  ;;  %v4453_v8 = vsel %vm1103_vm6, %v12440_v11, %v12423_v3 }
 0x2b3   : > { %9894 = vmatpush.msk.msra.mxu2 %vm10577_vm4, %v10351_v49  ;;  %3958 = vst [vmem:[%s11007_s27 + $0xb28] sm:$0xfc] %v3916_v46  ;;  %9898 = vmatpush.msk.msrb.mxu3 %vm10577_vm4, %v10351_v49  ;;  %v12436_v23 = vpop.f32.mrf.mxu1  ;;  %v4458_v0 = vsel %vm1112_vm12, %v12440_v11, %v12423_v3 }
 0x2b4   : > { %6648 = vmatmul.f32.vlgmr.msra.gmra.mxu0 %v12127_v22  ;;  %3959 = vst [vmem:[%s11007_s27 + $0xb30] sm:$0xfc] %v3917_v33  ;;  %v4446_v61 = vadd.f32 %v12333_v24, %v4423_v34 }
 0x2b5   : > { %9895 = vmatpush.msk.msra.mxu2 %vm10591_vm7, %v10351_v49  ;;  %9900 = vmatpush.msk.msra.mxu0 %vm10620_vm10, %v10351_v49  ;;  %3960 = vst [vmem:[%s11007_s27 + $0xb38] sm:$0xfc] %v3918_v41  ;;  %v12447_v56 = vpop.f32.mrf.mxu2  ;;  %v12449_v28 = vpop.f32.mrf.mxu3 }
 0x2b6   : > { %9899 = vmatpush.msk.msrb.mxu3 %vm10591_vm7, %v10351_v49  ;;  %3961 = vst [vmem:[%s11007_s27 + $0xb40] sm:$0xff] %v3916_v46  ;;  %6671 = vmatmul.f32.vlgmr.msra.gmra.mxu1 %v12127_v22  ;;  %v12445_v60 = vrot.slane %v4446_v61, 6  ;;  %v6776_v22 = vsub.f32 %v12397_v10, %v12426_v18  ;;  %v4743_v61 = vadd.f32 %v12436_v23, %v12420_v35 }
 0x2b7   : > { %9901 = vmatpush.msk.msra.mxu0 %vm10641_vm13, %v10351_v49  ;;  %3962 = vst [vmem:[%s11007_s27 + $0xb48] sm:$0xff] %v3917_v33  ;;  %6960 = vmatpush.msra.mxu1 %v10674_v58 }
 0x2b8   : > { %3963 = vst [vmem:[%s11007_s27 + $0xb50] sm:$0xff] %v3918_v41  ;;  %v4454_v24 = vsel %vm1105_vm9, %v4453_v8, %v12445_v60  ;;  %v12479_v39 = vand.u32 4294901760, %v6776_v22  ;;  %v4459_v30 = vsel %vm1114_vm14, %v4458_v0, %v12445_v60 }
 0x2b9   : > { %3964 = vst [vmem:[%s11007_s27 + $0xb58] sm:$0xf] %v3916_v46  ;;  %v4464_v5 = vperm.slane %v4454_v24, 0  ;;  %6966 = vmatpush.msra.mxu1 %v10679_v62  ;;  %v4465_v19 = vperm.slane %v4454_v24, 1  ;;  %v4466_v59 = vperm.slane %v4454_v24, 2  ;;  %v4460_v34 = vrot.slane %v4459_v30, 2 }
 0x2ba   : > { %6596 = vmatmul.f32.vlgmr.msrb.gmra.mxu2 %v12154_v14  ;;  %6809 = vmatmul.f32.vlgmr.msra.gmra.mxu3 %v12373_v1  ;;  %3965 = vst [vmem:[%s11007_s27 + $0xb60] sm:$0xf] %v3917_v33  ;;  %v4455_v14 = vsel %vm1107_vm8, %v12440_v11, %v12423_v3  ;;  %v12472_v45 = vpop.f32.mrf.mxu0  ;;  %v7310_v33 = vsel %vm617_vm5, %v7309_v4, 0  ;;  %v4461_v24 = vsel %vm1117_vm15, %v12440_v11, %v12423_v3 }
 0x2bb   : > { %6881 = vmatpush.msrb.mxu2 %v10596_v38  ;;  %3966 = vst [vmem:[%s11007_s27 + $0xb68] sm:$0xf] %v3918_v41  ;;  %v4456_v16 = vsel %vm1109_vm11, %v4455_v14, %v12445_v60  ;;  %9902 = vmatpush.msk.msra.mxu3 %vm10620_vm10, %v10351_v49  ;;  %v12482_v29 = vpop.f32.mrf.mxu1  ;;  %v12522_v26 = vand.u32 4294901760, %v7310_v33  ;;  %v4470_v23 = vperm.slane %v4460_v34, 0  ;;  %v4584_v3 = vadd.f32 %v12388_v12, %v12447_v56 }
 0x2bc   : > { %6835 = vmatmul.f32.vlgmr.msrb.gmra.mxu0 %v12397_v10  ;;  %4488 = vst [vmem:[%s11007_s27 + $0x138] sm:$0xf0] %v4464_v5  ;;  %v4457_v53 = vrot.slane %v4456_v16, 1  ;;  %v4471_v16 = vperm.slane %v4460_v34, 1 }
 0x2bd   : > { %6885 = vmatpush.msrb.mxu2 %v10607_v42  ;;  %7040 = vmatpush.msrb.mxu0 %v10663_v54  ;;  %4489 = vst [vmem:[%s11007_s27 + $0x140] sm:$0xf0] %v4465_v19  ;;  %v12492_v31 = vpop.f32.mrf.mxu2  ;;  %v4793_v21 = vpop.f32.mrf.mxu3  ;;  %v12547_v35 = vsub.f32 %v7310_v33, %v12522_v26  ;;  %v4610_v56 = vadd.f32 %v12368_v6, %v4584_v3 }
 0x2be   : > { %9903 = vmatpush.msk.msra.mxu3 %vm10641_vm13, %v10351_v49  ;;  %4490 = vst [vmem:[%s11007_s27 + $0x148] sm:$0xf0] %v4466_v59  ;;  %6860 = vmatmul.f32.vlgmr.msrb.gmra.mxu1 %v12426_v18  ;;  %v4467_v46 = vperm.slane %v4457_v53, 0  ;;  %v4468_v15 = vperm.slane %v4457_v53, 1  ;;  %v4469_v41 = vperm.slane %v4457_v53, 2 }
 0x2bf   : > { %7044 = vmatpush.msrb.mxu0 %v10671_v57  ;;  %4491 = vst [vmem:[%s11007_s27 + $0x150] sm:$0xff] %v4464_v5  ;;  %9904 = vmatpush.msk.msrb.mxu1 %vm10620_vm10, %v10351_v49 }
 0x2c0   : > { %4492 = vst [vmem:[%s11007_s27 + $0x158] sm:$0xff] %v4465_v19 }
 0x2c1   : > { %4493 = vst [vmem:[%s11007_s27 + $0x160] sm:$0xff] %v4466_v59  ;;  %9905 = vmatpush.msk.msrb.mxu1 %vm10641_vm13, %v10351_v49 }
 0x2c2   : > { %6778 = vmatmul.f32.vlgmr.msra.gmra.mxu2 %v12479_v39  ;;  %6910 = vmatmul.f32.vlgmr.msrb.gmra.mxu3 %v12373_v1  ;;  %4494 = vst [vmem:[%s11007_s27 + $0x168] sm:$0x3f] %v4464_v5  ;;  %v4927_v63 = vpop.f32.mrf.mxu0 }
 0x2c3   : > { %6988 = vmatpush.msra.mxu2 %v10645_v52  ;;  %7119 = vmatpush.msrb.mxu3 %v10738_v44  ;;  %4495 = vst [vmem:[%s11007_s27 + $0x170] sm:$0x3f] %v4465_v19  ;;  %v12520_v2 = vpop.f32.mrf.mxu1  ;;  %v4462_v19 = vsel %vm1119_vm0, %v4461_v24, %v12445_v60  ;;  %v12577_v60 = vand.u32 4294901760, %v12547_v35 }
 0x2c4   : > { %6937 = vmatmul.f32.vlgmr.msra.gmra.mxu0 %v12479_v39  ;;  %4496 = vst [vmem:[%s11007_s27 + $0x178] sm:$0x3f] %v4466_v59  ;;  %v4472_v59 = vperm.slane %v4460_v34, 2  ;;  %v4463_v4 = vrot.slane %v4462_v19, 3 }
 0x2c5   : > { %6991 = vmatpush.msra.mxu2 %v10665_v55  ;;  %7147 = vmatpush.msra.mxu0 %v10700_v17  ;;  %4497 = vst [vmem:[%s11007_s27 + $0x498] sm:$0xf0] %v4467_v46  ;;  %v4768_v8 = vpop.f32.mrf.mxu2  ;;  %v4901_v22 = vpop.f32.mrf.mxu3  ;;  %v7333_v33 = vsub.f32 %v12547_v35, %v12577_v60 }
 0x2c6   : > { %7125 = vmatpush.msrb.mxu3 %v10744_v50  ;;  %4498 = vst [vmem:[%s11007_s27 + $0x4a0] sm:$0xf0] %v4468_v15  ;;  %6968 = vmatmul.f32.vlgmr.msra.gmra.mxu1 %v12373_v1  ;;  %v4769_v14 = vadd.f32 %v4768_v8, %v4743_v61  ;;  %v4473_v30 = vperm.slane %v4463_v4, 0  ;;  %v4474_v6 = vperm.slane %v4463_v4, 1 }
 0x2c7   : > { %7150 = vmatpush.msra.mxu0 %v10702_v20  ;;  %4499 = vst [vmem:[%s11007_s27 + $0x4a8] sm:$0xf0] %v4469_v41  ;;  %9908 = vmatpush.msk.msra.mxu1 %vm10686_vm2, %v10351_v49 }
 0x2c8   : > { %4500 = vst [vmem:[%s11007_s27 + $0x4b0] sm:$0xff] %v4467_v46  ;;  %v4794_v11 = vadd.f32 %v4793_v21, %v4769_v14 }
 0x2c9   : > { %4501 = vst [vmem:[%s11007_s27 + $0x4b8] sm:$0xff] %v4468_v15  ;;  %9909 = vmatpush.msk.msra.mxu1 %vm10690_vm3, %v10351_v49 }
 0x2ca   : > { %6887 = vmatmul.f32.vlgmr.msrb.gmra.mxu2 %v12373_v1  ;;  %7019 = vmatmul.f32.vlgmr.msra.gmra.mxu3 %v12426_v18  ;;  %4502 = vst [vmem:[%s11007_s27 + $0x4c0] sm:$0xff] %v4469_v41  ;;  %v12560_v5 = vpop.f32.mrf.mxu0  ;;  %v4821_v21 = vadd.f32 %v12472_v45, %v4794_v11  ;;  %v4635_v45 = vadd.f32 %v12376_v13, %v4610_v56  ;;  %v12617_v13 = vand.u32 4294901760, %v7333_v33 }
 0x2cb   : > { %9906 = vmatpush.msk.msrb.mxu2 %vm10686_vm2, %v10351_v49  ;;  %9910 = vmatpush.msk.msra.mxu3 %vm10686_vm2, %v10351_v49  ;;  %4503 = vst [vmem:[%s11007_s27 + $0x4c8] sm:$0x3f] %v4467_v46  ;;  %v12574_v53 = vpop.f32.mrf.mxu1 }
 0x2cc   : > { %7046 = vmatmul.f32.vlgmr.msrb.gmra.mxu0 %v12373_v1  ;;  %4504 = vst [vmem:[%s11007_s27 + $0x4d0] sm:$0x3f] %v4468_v15 }
 0x2cd   : > { %9907 = vmatpush.msk.msrb.mxu2 %vm10690_vm3, %v10351_v49  ;;  %9912 = vmatpush.msk.msrb.mxu0 %vm10577_vm4, %v10351_v49  ;;  %4505 = vst [vmem:[%s11007_s27 + $0x4d8] sm:$0x3f] %v4469_v41  ;;  %v4870_v46 = vpop.f32.mrf.mxu2  ;;  %v5002_v0 = vpop.f32.mrf.mxu3 }
 0x2ce   : > { %9911 = vmatpush.msk.msra.mxu3 %vm10690_vm3, %v10351_v49  ;;  %4506 = vst [vmem:[%s11007_s27 + $0x7f8] sm:$0xf0] %v4470_v23  ;;  %7069 = vmatmul.f32.vlgmr.msrb.gmra.mxu1 %v12373_v1  ;;  %v4902_v12 = vadd.f32 %v4901_v22, %v4870_v46 }
 0x2cf   : > { %9913 = vmatpush.msk.msrb.mxu0 %vm10591_vm7, %v10351_v49  ;;  %4507 = vst [vmem:[%s11007_s27 + $0x800] sm:$0xf0] %v4471_v16  ;;  %7358 = vmatpush.msrb.mxu1 %v10610_v43 }
 0x2d0   : > { %4508 = vst [vmem:[%s11007_s27 + $0x808] sm:$0xf0] %v4472_v59  ;;  %v4928_v15 = vadd.f32 %v4927_v63, %v4902_v12  ;;  %v4844_v63 = vadd.f32 %v12482_v29, %v4821_v21  ;;  %v4662_v29 = vadd.f32 %v12492_v31, %v4635_v45 }
 0x2d1   : > { %4509 = vst [vmem:[%s11007_s27 + $0x810] sm:$0xff] %v4470_v23  ;;  %7364 = vmatpush.msrb.mxu1 %v10615_v47 }
 0x2d2   : > { %6994 = vmatmul.f32.vlgmr.msra.gmra.mxu2 %v12397_v10  ;;  %7127 = vmatmul.f32.vlgmr.msrb.gmra.mxu3 %v12373_v1  ;;  %4510 = vst [vmem:[%s11007_s27 + $0x818] sm:$0xff] %v4471_v16  ;;  %v12597_v41 = vpop.f32.mrf.mxu0  ;;  %v4953_v61 = vadd.f32 %v12520_v2, %v4928_v15  ;;  %v12642_v22 = vadd.f32 %v12449_v28, %v4662_v29 }
 0x2d3   : > { %7199 = vmatpush.msra.mxu2 %v10711_v25  ;;  %4511 = vst [vmem:[%s11007_s27 + $0x820] sm:$0xff] %v4472_v59  ;;  %9914 = vmatpush.msk.msrb.mxu3 %vm10577_vm4, %v10351_v49  ;;  %v12607_v34 = vpop.f32.mrf.mxu1 }
 0x2d4   : > { %7153 = vmatmul.f32.vlgmr.msra.gmra.mxu0 %v12397_v10  ;;  %4512 = vst [vmem:[%s11007_s27 + $0x828] sm:$0x3f] %v4470_v23  ;;  %v4475_v10 = vperm.slane %v4463_v4, 2 }
 0x2d5   : > { %7203 = vmatpush.msra.mxu2 %v10718_v27  ;;  %7438 = vmatpush.msra.mxu0 %v10596_v38  ;;  %4513 = vst [vmem:[%s11007_s27 + $0x830] sm:$0x3f] %v4471_v16  ;;  %v4979_v8 = vpop.f32.mrf.mxu2 }
 0x2d6   : > { %9915 = vmatpush.msk.msrb.mxu3 %vm10591_vm7, %v10351_v49  ;;  %4514 = vst [vmem:[%s11007_s27 + $0x838] sm:$0x3f] %v4472_v59  ;;  %7178 = vmatmul.f32.vlgmr.msra.gmra.mxu1 %v12426_v18  ;;  %v4980_v2 = vadd.f32 %v4979_v8, %v4953_v61  ;;  %v12626_v18 = vpop.f32.mrf.mxu3 }
 0x2d7   : > { %7442 = vmatpush.msra.mxu0 %v10607_v42  ;;  %4515 = vst [vmem:[%s11007_s27 + $0xb58] sm:$0xf0] %v4473_v30  ;;  %9916 = vmatpush.msk.msra.mxu1 %vm10577_vm4, %v10351_v49 }
 0x2d8   : > { %4516 = vst [vmem:[%s11007_s27 + $0xb60] sm:$0xf0] %v4474_v6  ;;  %v5003_v31 = vadd.f32 %v5002_v0, %v4980_v2  ;;  %v7866_v2 = vpop.permute.xlu0 %7865 }
 0x2d9   : > { %4517 = vst [vmem:[%s11007_s27 + $0xb68] sm:$0xf0] %v4475_v10  ;;  %9917 = vmatpush.msk.msra.mxu1 %vm10591_vm7, %v10351_v49 }
 0x2da   : > { %7096 = vmatmul.f32.vlgmr.msrb.gmra.mxu2 %v12479_v39  ;;  %7228 = vmatmul.f32.vlgmr.msra.gmra.mxu3 %v12373_v1  ;;  %v12631_v39 = vrot.slane %v4844_v63, 7  ;;  %4518 = vst [vmem:[%s11007_s27 + $0xb70] sm:$0xff] %v4473_v30  ;;  %v12645_v14 = vrot.slane %v5003_v31, 6  ;;  %v12647_v23 = vpop.f32.mrf.mxu0 }
 0x2db   : > { %7386 = vmatpush.msrb.mxu2 %v10587_v36  ;;  %7517 = vmatpush.msra.mxu3 %v10674_v58  ;;  %4519 = vst [vmem:[%s11007_s27 + $0xb78] sm:$0xff] %v4474_v6  ;;  %v12661_v19 = vpop.f32.mrf.mxu1 }
 0x2dc   : > { %7335 = vmatmul.f32.vlgmr.msrb.gmra.mxu0 %v12617_v13  ;;  %4520 = vst [vmem:[%s11007_s27 + $0xb80] sm:$0xff] %v4475_v10  ;;  %v5010_v24 = vsel %vm1103_vm6, %v12642_v22, %v12631_v39  ;;  %v5012_v16 = vsel %vm1107_vm8, %v12642_v22, %v12631_v39  ;;  %v5015_v15 = vsel %vm1112_vm12, %v12642_v22, %v12631_v39 }
 0x2dd   : > { %7389 = vmatpush.msrb.mxu2 %v10602_v40  ;;  %7545 = vmatpush.msrb.mxu0 %v10645_v52  ;;  %4521 = vst [vmem:[%s11007_s27 + $0xb88] sm:$0x3f] %v4473_v30  ;;  %v5011_v28 = vsel %vm1105_vm9, %v5010_v24, %v12645_v14  ;;  %v5013_v59 = vsel %vm1109_vm11, %v5012_v16, %v12645_v14  ;;  %v12668_v46 = vpop.f32.mrf.mxu2 }
 0x2de   : > { %7523 = vmatpush.msra.mxu3 %v10679_v62  ;;  %4522 = vst [vmem:[%s11007_s27 + $0xb90] sm:$0x3f] %v4474_v6  ;;  %v5021_v3 = vperm.slane %v5011_v28, 0  ;;  %7366 = vmatmul.f32.vlgmr.msrb.gmra.mxu1 %v12522_v26  ;;  %v5022_v11 = vperm.slane %v5011_v28, 1  ;;  %v5023_v4 = vperm.slane %v5011_v28, 2  ;;  %v5298_v0 = vpop.f32.mrf.mxu3  ;;  %v5016_v30 = vsel %vm1114_vm14, %v5015_v15, %v12645_v14 }
 0x2df   : > { %7548 = vmatpush.msrb.mxu0 %v10665_v55  ;;  %4523 = vst [vmem:[%s11007_s27 + $0xb98] sm:$0x3f] %v4475_v10  ;;  %9920 = vmatpush.msk.msrb.mxu1 %vm10620_vm10, %v10351_v49  ;;  %v5017_v63 = vrot.slane %v5016_v30, 2  ;;  %v5018_v24 = vsel %vm1117_vm15, %v12642_v22, %v12631_v39  ;;  %v5140_v39 = vadd.f32 %v12574_v53, %v12560_v5 }
 0x2e0   : > { %5045 = vst [vmem:[%s11007_s27 + $0x168] sm:$0xc0] %v5021_v3 }
 0x2e1   : > { %5046 = vst [vmem:[%s11007_s27 + $0x170] sm:$0xc0] %v5022_v11  ;;  %9921 = vmatpush.msk.msrb.mxu1 %vm10641_vm13, %v10351_v49  ;;  %v5027_v31 = vperm.slane %v5017_v63, 0  ;;  %v5028_v28 = vperm.slane %v5017_v63, 1  ;;  %v5166_v5 = vadd.f32 %v12668_v46, %v5140_v39 }
 0x2e2   : > { %7205 = vmatmul.f32.vlgmr.msra.gmra.mxu2 %v12373_v1  ;;  %7417 = vmatmul.f32.vlgmr.msrb.gmra.mxu3 %v12577_v60  ;;  %v5014_v1 = vrot.slane %v5013_v59, 1  ;;  %5047 = vst [vmem:[%s11007_s27 + $0x178] sm:$0xc0] %v5023_v4  ;;  %v12694_v12 = vpop.f32.mrf.mxu0 }
 0x2e3   : > { %9918 = vmatpush.msk.msra.mxu2 %vm10620_vm10, %v10351_v49  ;;  %9922 = vmatpush.msk.msrb.mxu3 %vm10620_vm10, %v10351_v49  ;;  %5048 = vst [vmem:[%s11007_s27 + $0x180] sm:$0xff] %v5021_v3  ;;  %v12704_v21 = vpop.f32.mrf.mxu1 }
 0x2e4   : > { %7444 = vmatmul.f32.vlgmr.msra.gmra.mxu0 %v12522_v26  ;;  %5049 = vst [vmem:[%s11007_s27 + $0x188] sm:$0xff] %v5022_v11  ;;  %v5024_v56 = vperm.slane %v5014_v1, 0  ;;  %v5025_v33 = vperm.slane %v5014_v1, 1  ;;  %v5026_v6 = vperm.slane %v5014_v1, 2  ;;  %v5458_v46 = vadd.f32 %v12704_v21, %v12694_v12 }
 0x2e5   : > { %9924 = vmatpush.msk.msra.mxu0 %vm10686_vm2, %v10351_v49  ;;  %9919 = vmatpush.msk.msra.mxu2 %vm10641_vm13, %v10351_v49  ;;  %5050 = vst [vmem:[%s11007_s27 + $0x190] sm:$0xff] %v5023_v4  ;;  %v5267_v10 = vpop.f32.mrf.mxu2 }
 0x2e6   : > { %9923 = vmatpush.msk.msrb.mxu3 %vm10641_vm13, %v10351_v49  ;;  %5051 = vst [vmem:[%s11007_s27 + $0x198] sm:$0xff] %v5021_v3  ;;  %7467 = vmatmul.f32.vlgmr.msra.gmra.mxu1 %v12522_v26  ;;  %v12715_v45 = vpop.f32.mrf.mxu3  ;;  %v5299_v61 = vadd.f32 %v5298_v0, %v5267_v10 }
 0x2e7   : > { %9925 = vmatpush.msk.msra.mxu0 %vm10690_vm3, %v10351_v49  ;;  %5052 = vst [vmem:[%s11007_s27 + $0x1a0] sm:$0xff] %v5022_v11  ;;  %7676 = vmatpush.msra.mxu1 %v10738_v44  ;;  %v5019_v11 = vsel %vm1119_vm0, %v5018_v24, %v12645_v14 }
 0x2e8   : > { %5053 = vst [vmem:[%s11007_s27 + $0x1a8] sm:$0xff] %v5023_v4  ;;  %v5325_v16 = vadd.f32 %v12647_v23, %v5299_v61  ;;  %v5029_v4 = vperm.slane %v5017_v63, 2  ;;  %v5020_v22 = vrot.slane %v5019_v11, 3 }
 0x2e9   : > { %5054 = vst [vmem:[%s11007_s27 + $0x4c8] sm:$0xc0] %v5024_v56  ;;  %7682 = vmatpush.msra.mxu1 %v10744_v50 }
 0x2ea   : > { %7392 = vmatmul.f32.vlgmr.msrb.gmra.mxu2 %v12547_v35  ;;  %7525 = vmatmul.f32.vlgmr.msra.gmra.mxu3 %v12522_v26  ;;  %5055 = vst [vmem:[%s11007_s27 + $0x4d0] sm:$0xc0] %v5025_v33  ;;  %v12731_v29 = vpop.f32.mrf.mxu0  ;;  %v5350_v53 = vadd.f32 %v12661_v19, %v5325_v16  ;;  %v5030_v19 = vperm.slane %v5020_v22, 0 }
 0x2eb   : > { %7597 = vmatpush.msrb.mxu2 %v10663_v54  ;;  %9926 = vmatpush.msk.msra.mxu3 %vm10686_vm2, %v10351_v49  ;;  %5056 = vst [vmem:[%s11007_s27 + $0x4d8] sm:$0xc0] %v5026_v6  ;;  %v12739_v8 = vpop.f32.mrf.mxu1 }
 0x2ec   : > { %7551 = vmatmul.f32.vlgmr.msrb.gmra.mxu0 %v12547_v35  ;;  %5057 = vst [vmem:[%s11007_s27 + $0x4e0] sm:$0xff] %v5024_v56 }
 0x2ed   : > { %7756 = vmatpush.msrb.mxu0 %v10711_v25  ;;  %7601 = vmatpush.msrb.mxu2 %v10671_v57  ;;  %5058 = vst [vmem:[%s11007_s27 + $0x4e8] sm:$0xff] %v5025_v33  ;;  %v5376_v59 = vpop.f32.mrf.mxu2 }
 0x2ee   : > { %9927 = vmatpush.msk.msra.mxu3 %vm10690_vm3, %v10351_v49  ;;  %5059 = vst [vmem:[%s11007_s27 + $0x4f0] sm:$0xff] %v5026_v6  ;;  %7576 = vmatmul.f32.vlgmr.msrb.gmra.mxu1 %v12577_v60  ;;  %v5508_v3 = vpop.f32.mrf.mxu3  ;;  %v5377_v0 = vadd.f32 %v5376_v59, %v5350_v53  ;;  %v8423_v53 = vpop.permute.xlu1 %8422 }
 0x2ef   : > { %7760 = vmatpush.msrb.mxu0 %v10718_v27  ;;  %5060 = vst [vmem:[%s11007_s27 + $0x4f8] sm:$0xff] %v5024_v56  ;;  %9928 = vmatpush.msk.msrb.mxu1 %vm10686_vm2, %v10351_v49  ;;  %v5191_v56 = vadd.f32 %v12626_v18, %v5166_v5  ;;  %v5032_v18 = vperm.slane %v5020_v22, 2 }
 0x2f0   : > { %5061 = vst [vmem:[%s11007_s27 + $0x500] sm:$0xff] %v5025_v33  ;;  %v5031_v33 = vperm.slane %v5020_v22, 1  ;;  %v5400_v21 = vadd.f32 %v12715_v45, %v5377_v0 }
 0x2f1   : > { %5062 = vst [vmem:[%s11007_s27 + $0x508] sm:$0xff] %v5026_v6  ;;  %9929 = vmatpush.msk.msrb.mxu1 %vm10690_vm3, %v10351_v49  ;;  %v5218_v10 = vadd.f32 %v12597_v41, %v5191_v56  ;;  %v8424_v56 = vsel %vm617_vm5, %v8423_v53, 0 }
 0x2f2   : > { %7494 = vmatmul.f32.vlgmr.msra.gmra.mxu2 %v12617_v13  ;;  %7626 = vmatmul.f32.vlgmr.msrb.gmra.mxu3 %v12522_v26  ;;  %5063 = vst [vmem:[%s11007_s27 + $0x828] sm:$0xc0] %v5027_v31  ;;  %v12772_v14 = vpop.f32.mrf.mxu0  ;;  %v12831_v41 = vrot.slane %v5400_v21, 7 }
 0x2f3   : > { %7704 = vmatpush.msra.mxu2 %v10700_v17  ;;  %7915 = vmatpush.msrb.mxu3 %v10610_v43  ;;  %5064 = vst [vmem:[%s11007_s27 + $0x830] sm:$0xc0] %v5028_v28  ;;  %v12780_v1 = vpop.f32.mrf.mxu1 }
 0x2f4   : > { %7653 = vmatmul.f32.vlgmr.msra.gmra.mxu0 %v12617_v13  ;;  %v7867_v13 = vsel %vm617_vm5, %v7866_v2, 0  ;;  %5065 = vst [vmem:[%s11007_s27 + $0x838] sm:$0xc0] %v5029_v4 }
 0x2f5   : > { %7943 = vmatpush.msra.mxu0 %v10587_v36  ;;  %7707 = vmatpush.msra.mxu2 %v10702_v20  ;;  %v12777_v23 = vand.u32 4294901760, %v7867_v13  ;;  %5066 = vst [vmem:[%s11007_s27 + $0x840] sm:$0xff] %v5027_v31  ;;  %v5483_v15 = vpop.f32.mrf.mxu2 }
 0x2f6   : > { %7921 = vmatpush.msrb.mxu3 %v10615_v47  ;;  %5067 = vst [vmem:[%s11007_s27 + $0x848] sm:$0xff] %v5028_v28  ;;  %7684 = vmatmul.f32.vlgmr.msra.gmra.mxu1 %v12522_v26  ;;  %v5484_v30 = vadd.f32 %v5483_v15, %v5458_v46  ;;  %v12790_v6 = vpop.f32.mrf.mxu3 }
 0x2f7   : > { %7946 = vmatpush.msra.mxu0 %v10602_v40  ;;  %5068 = vst [vmem:[%s11007_s27 + $0x850] sm:$0xff] %v5029_v4  ;;  %v12795_v12 = vsub.f32 %v7867_v13, %v12777_v23  ;;  %9932 = vmatpush.msk.msra.mxu1 %vm10577_vm4, %v10351_v49 }
 0x2f8   : > { %5069 = vst [vmem:[%s11007_s27 + $0x858] sm:$0xff] %v5027_v31  ;;  %v12842_v31 = vadd.f32 %v12607_v34, %v5218_v10 }
 0x2f9   : > { %5070 = vst [vmem:[%s11007_s27 + $0x860] sm:$0xff] %v5028_v28  ;;  %9933 = vmatpush.msk.msra.mxu1 %vm10591_vm7, %v10351_v49  ;;  %v12834_v61 = vand.u32 4294901760, %v12795_v12 }
 0x2fa   : > { %7603 = vmatmul.f32.vlgmr.msrb.gmra.mxu2 %v12522_v26  ;;  %7735 = vmatmul.f32.vlgmr.msra.gmra.mxu3 %v12577_v60  ;;  %5071 = vst [vmem:[%s11007_s27 + $0x868] sm:$0xff] %v5029_v4  ;;  %v5509_v60 = vadd.f32 %v5508_v3, %v5484_v30  ;;  %v12822_v63 = vpop.f32.mrf.mxu0  ;;  %v5566_v34 = vsel %vm1103_vm6, %v12842_v31, %v12831_v41 }
 0x2fb   : > { %9930 = vmatpush.msk.msrb.mxu2 %vm10577_vm4, %v10351_v49  ;;  %9934 = vmatpush.msk.msra.mxu3 %vm10577_vm4, %v10351_v49  ;;  %5072 = vst [vmem:[%s11007_s27 + $0xb88] sm:$0xc0] %v5030_v19  ;;  %v12838_v2 = vpop.f32.mrf.mxu1  ;;  %v5571_v15 = vsel %vm1112_vm12, %v12842_v31, %v12831_v41 }
 0x2fc   : > { %7762 = vmatmul.f32.vlgmr.msrb.gmra.mxu0 %v12522_v26  ;;  %5073 = vst [vmem:[%s11007_s27 + $0xb90] sm:$0xc0] %v5031_v33  ;;  %v5536_v45 = vadd.f32 %v12731_v29, %v5509_v60  ;;  %v12923_v60 = vand.u32 4294901760, %v8424_v56 }
 0x2fd   : > { %9936 = vmatpush.msk.msrb.mxu0 %vm10620_vm10, %v10351_v49  ;;  %9931 = vmatpush.msk.msrb.mxu2 %vm10591_vm7, %v10351_v49  ;;  %5074 = vst [vmem:[%s11007_s27 + $0xb98] sm:$0xc0] %v5032_v18  ;;  %v12849_v28 = vpop.f32.mrf.mxu2 }
 0x2fe   : > { %9935 = vmatpush.msk.msra.mxu3 %vm10591_vm7, %v10351_v49  ;;  %5075 = vst [vmem:[%s11007_s27 + $0xba0] sm:$0xff] %v5030_v19  ;;  %v5559_v29 = vadd.f32 %v12739_v8, %v5536_v45  ;;  %7785 = vmatmul.f32.vlgmr.msrb.gmra.mxu1 %v12522_v26  ;;  %v12851_v16 = vpop.f32.mrf.mxu3  ;;  %v7890_v26 = vsub.f32 %v12795_v12, %v12834_v61 }
 0x2ff   : > { %9937 = vmatpush.msk.msrb.mxu0 %vm10641_vm13, %v10351_v49  ;;  %5076 = vst [vmem:[%s11007_s27 + $0xba8] sm:$0xff] %v5031_v33  ;;  %8074 = vmatpush.msrb.mxu1 %v10674_v58 }
 0x300   : > { %5077 = vst [vmem:[%s11007_s27 + $0xbb0] sm:$0xff] %v5032_v18  ;;  %v12847_v24 = vrot.slane %v5559_v29, 6  ;;  %v12881_v13 = vand.u32 4294901760, %v7890_v26  ;;  %v5856_v29 = vadd.f32 %v12838_v2, %v12822_v63 }
 0x301   : > { %5078 = vst [vmem:[%s11007_s27 + $0xbb8] sm:$0xff] %v5030_v19  ;;  %8080 = vmatpush.msrb.mxu1 %v10679_v62 }
 0x302   : > { %7710 = vmatmul.f32.vlgmr.msra.gmra.mxu2 %v12547_v35  ;;  %7923 = vmatmul.f32.vlgmr.msrb.gmra.mxu3 %v12777_v23  ;;  %5079 = vst [vmem:[%s11007_s27 + $0xbc0] sm:$0xff] %v5031_v33  ;;  %v5568_v35 = vsel %vm1107_vm8, %v12842_v31, %v12831_v41  ;;  %v5567_v8 = vsel %vm1105_vm9, %v5566_v34, %v12847_v24  ;;  %v12874_v39 = vpop.f32.mrf.mxu0 }
 0x303   : > { %7995 = vmatpush.msra.mxu2 %v10596_v38  ;;  %5080 = vst [vmem:[%s11007_s27 + $0xbc8] sm:$0xff] %v5032_v18  ;;  %v5569_v59 = vsel %vm1109_vm11, %v5568_v35, %v12847_v24  ;;  %v5577_v3 = vperm.slane %v5567_v8, 0  ;;  %v5578_v11 = vperm.slane %v5567_v8, 1  ;;  %v5579_v4 = vperm.slane %v5567_v8, 2  ;;  %9938 = vmatpush.msk.msrb.mxu3 %vm10620_vm10, %v10351_v49  ;;  %v12884_v5 = vpop.f32.mrf.mxu1 }
 0x304   : > { %7949 = vmatmul.f32.vlgmr.msra.gmra.mxu0 %v12795_v12  ;;  %v5570_v22 = vrot.slane %v5569_v59, 1  ;;  %v5572_v30 = vsel %vm1114_vm14, %v5571_v15, %v12847_v24  ;;  %v12944_v35 = vsub.f32 %v8424_v56, %v12923_v60  ;;  %v5574_v8 = vsel %vm1117_vm15, %v12842_v31, %v12831_v41 }
 0x305   : > { %7999 = vmatpush.msra.mxu2 %v10607_v42  ;;  %8154 = vmatpush.msra.mxu0 %v10663_v54  ;;  %5601 = vst [vmem:[%s11007_s27 + $0x1b0] sm:$0xff] %v5577_v3  ;;  %v12894_v0 = vpop.f32.mrf.mxu2  ;;  %v5573_v45 = vrot.slane %v5572_v30, 2  ;;  %v5697_v31 = vadd.f32 %v12790_v6, %v12849_v28 }
 0x306   : > { %5602 = vst [vmem:[%s11007_s27 + $0x1b8] sm:$0xff] %v5578_v11  ;;  %9939 = vmatpush.msk.msrb.mxu3 %vm10641_vm13, %v10351_v49  ;;  %7974 = vmatmul.f32.vlgmr.msra.gmra.mxu1 %v12834_v61  ;;  %v5906_v46 = vpop.f32.mrf.mxu3  ;;  %v5580_v19 = vperm.slane %v5570_v22, 0  ;;  %v5581_v33 = vperm.slane %v5570_v22, 1  ;;  %v5582_v18 = vperm.slane %v5570_v22, 2  ;;  %v12976_v41 = vand.u32 4294901760, %v12944_v35 }
 0x307   : > { %8158 = vmatpush.msra.mxu0 %v10671_v57  ;;  %5603 = vst [vmem:[%s11007_s27 + $0x1c0] sm:$0xff] %v5579_v4  ;;  %9940 = vmatpush.msk.msra.mxu1 %vm10620_vm10, %v10351_v49  ;;  %v5583_v2 = vperm.slane %v5573_v45, 0  ;;  %v5584_v59 = vperm.slane %v5573_v45, 1  ;;  %v5723_v28 = vadd.f32 %v12772_v14, %v5697_v31 }
 0x308   : > { %5604 = vst [vmem:[%s11007_s27 + $0x1c8] sm:$0xff] %v5577_v3  ;;  %v8447_v15 = vsub.f32 %v12944_v35, %v12976_v41 }
 0x309   : > { %5605 = vst [vmem:[%s11007_s27 + $0x1d0] sm:$0xff] %v5578_v11  ;;  %9941 = vmatpush.msk.msra.mxu1 %vm10641_vm13, %v10351_v49 }
 0x30a   : > { %7892 = vmatmul.f32.vlgmr.msrb.gmra.mxu2 %v12881_v13  ;;  %8024 = vmatmul.f32.vlgmr.msra.gmra.mxu3 %v12777_v23  ;;  %5606 = vst [vmem:[%s11007_s27 + $0x1d8] sm:$0xff] %v5579_v4  ;;  %v12918_v21 = vpop.f32.mrf.mxu0 }
 0x30b   : > { %8102 = vmatpush.msrb.mxu2 %v10645_v52  ;;  %8233 = vmatpush.msra.mxu3 %v10738_v44  ;;  %5607 = vst [vmem:[%s11007_s27 + $0x1e0] sm:$0x3] %v5577_v3  ;;  %v12926_v10 = vpop.f32.mrf.mxu1 }
 0x30c   : > { %8051 = vmatmul.f32.vlgmr.msrb.gmra.mxu0 %v12881_v13  ;;  %5608 = vst [vmem:[%s11007_s27 + $0x1e8] sm:$0x3] %v5578_v11  ;;  %v5575_v11 = vsel %vm1119_vm0, %v5574_v8, %v12847_v24 }
 0x30d   : > { %8261 = vmatpush.msrb.mxu0 %v10700_v17  ;;  %8105 = vmatpush.msrb.mxu2 %v10665_v55  ;;  %5609 = vst [vmem:[%s11007_s27 + $0x1f0] sm:$0x3] %v5579_v4  ;;  %v5881_v34 = vpop.f32.mrf.mxu2  ;;  %v5585_v4 = vperm.slane %v5573_v45, 2  ;;  %v5576_v24 = vrot.slane %v5575_v11, 3 }
 0x30e   : > { %8239 = vmatpush.msra.mxu3 %v10744_v50  ;;  %5610 = vst [vmem:[%s11007_s27 + $0x510] sm:$0xff] %v5580_v19  ;;  %8082 = vmatmul.f32.vlgmr.msrb.gmra.mxu1 %v12777_v23  ;;  %v6014_v26 = vpop.f32.mrf.mxu3  ;;  %v5882_v63 = vadd.f32 %v5881_v34, %v5856_v29  ;;  %v13018_v29 = vand.u32 4294901760, %v8447_v15 }
 0x30f   : > { %8264 = vmatpush.msrb.mxu0 %v10702_v20  ;;  %5611 = vst [vmem:[%s11007_s27 + $0x518] sm:$0xff] %v5581_v33  ;;  %9944 = vmatpush.msk.msrb.mxu1 %vm10686_vm2, %v10351_v49  ;;  %v5587_v14 = vperm.slane %v5576_v24, 1 }
 0x310   : > { %5612 = vst [vmem:[%s11007_s27 + $0x520] sm:$0xff] %v5582_v18  ;;  %v5907_v22 = vadd.f32 %v5906_v46, %v5882_v63 }
 0x311   : > { %5613 = vst [vmem:[%s11007_s27 + $0x528] sm:$0xff] %v5580_v19  ;;  %9945 = vmatpush.msk.msrb.mxu1 %vm10690_vm3, %v10351_v49 }
 0x312   : > { %8001 = vmatmul.f32.vlgmr.msra.gmra.mxu2 %v12777_v23  ;;  %8133 = vmatmul.f32.vlgmr.msrb.gmra.mxu3 %v12834_v61  ;;  %5614 = vst [vmem:[%s11007_s27 + $0x530] sm:$0xff] %v5581_v33  ;;  %v12964_v3 = vpop.f32.mrf.mxu0  ;;  %v5934_v46 = vadd.f32 %v12874_v39, %v5907_v22  ;;  %v5588_v39 = vperm.slane %v5576_v24, 2 }
 0x313   : > { %9942 = vmatpush.msk.msra.mxu2 %vm10686_vm2, %v10351_v49  ;;  %9946 = vmatpush.msk.msrb.mxu3 %vm10686_vm2, %v10351_v49  ;;  %5615 = vst [vmem:[%s11007_s27 + $0x538] sm:$0xff] %v5582_v18  ;;  %v12981_v53 = vpop.f32.mrf.mxu1 }
 0x314   : > { %8160 = vmatmul.f32.vlgmr.msra.gmra.mxu0 %v12777_v23  ;;  %5616 = vst [vmem:[%s11007_s27 + $0x540] sm:$0x3] %v5580_v19 }
 0x315   : > { %9948 = vmatpush.msk.msra.mxu0 %vm10577_vm4, %v10351_v49  ;;  %9943 = vmatpush.msk.msra.mxu2 %vm10690_vm3, %v10351_v49  ;;  %5617 = vst [vmem:[%s11007_s27 + $0x548] sm:$0x3] %v5581_v33  ;;  %v5983_v19 = vpop.f32.mrf.mxu2  ;;  %v5586_v33 = vperm.slane %v5576_v24, 0 }
 0x316   : > { %9947 = vmatpush.msk.msrb.mxu3 %vm10690_vm3, %v10351_v49  ;;  %5618 = vst [vmem:[%s11007_s27 + $0x550] sm:$0x3] %v5582_v18  ;;  %8183 = vmatmul.f32.vlgmr.msra.gmra.mxu1 %v12777_v23  ;;  %v6115_v56 = vpop.f32.mrf.mxu3  ;;  %v6015_v6 = vadd.f32 %v6014_v26, %v5983_v19  ;;  %v5748_v18 = vadd.f32 %v12780_v1, %v5723_v28 }
 0x317   : > { %9949 = vmatpush.msk.msra.mxu0 %vm10591_vm7, %v10351_v49  ;;  %5619 = vst [vmem:[%s11007_s27 + $0x870] sm:$0xff] %v5583_v2  ;;  %8472 = vmatpush.msra.mxu1 %v10610_v43 }
 0x318   : > { %5620 = vst [vmem:[%s11007_s27 + $0x878] sm:$0xff] %v5584_v59  ;;  %v5775_v26 = vadd.f32 %v12894_v0, %v5748_v18 }
 0x319   : > { %5621 = vst [vmem:[%s11007_s27 + $0x880] sm:$0xff] %v5585_v4  ;;  %8478 = vmatpush.msra.mxu1 %v10615_v47 }
 0x31a   : > { %8108 = vmatmul.f32.vlgmr.msrb.gmra.mxu2 %v12795_v12  ;;  %8241 = vmatmul.f32.vlgmr.msra.gmra.mxu3 %v12777_v23  ;;  %5622 = vst [vmem:[%s11007_s27 + $0x888] sm:$0xff] %v5583_v2  ;;  %v13004_v30 = vpop.f32.mrf.mxu0  ;;  %v13047_v0 = vadd.f32 %v12851_v16, %v5775_v26 }
 0x31b   : > { %8313 = vmatpush.msrb.mxu2 %v10711_v25  ;;  %9950 = vmatpush.msk.msra.mxu3 %vm10577_vm4, %v10351_v49  ;;  %5623 = vst [vmem:[%s11007_s27 + $0x890] sm:$0xff] %v5584_v59  ;;  %v13016_v45 = vpop.f32.mrf.mxu1 }
 0x31c   : > { %8267 = vmatmul.f32.vlgmr.msrb.gmra.mxu0 %v12795_v12  ;;  %v6041_v12 = vadd.f32 %v12918_v21, %v6015_v6  ;;  %5624 = vst [vmem:[%s11007_s27 + $0x898] sm:$0xff] %v5585_v4  ;;  %v5957_v21 = vadd.f32 %v12884_v5, %v5934_v46 }
 0x31d   : > { %8552 = vmatpush.msrb.mxu0 %v10596_v38  ;;  %8317 = vmatpush.msrb.mxu2 %v10718_v27  ;;  %5625 = vst [vmem:[%s11007_s27 + $0x8a0] sm:$0x3] %v5583_v2  ;;  %v6092_v63 = vpop.f32.mrf.mxu2 }
 0x31e   : > { %9951 = vmatpush.msk.msra.mxu3 %vm10591_vm7, %v10351_v49  ;;  %5626 = vst [vmem:[%s11007_s27 + $0x8a8] sm:$0x3] %v5584_v59  ;;  %v6066_v34 = vadd.f32 %v12926_v10, %v6041_v12  ;;  %8292 = vmatmul.f32.vlgmr.msrb.gmra.mxu1 %v12834_v61  ;;  %v13029_v5 = vpop.f32.mrf.mxu3  ;;  %v13036_v61 = vrot.slane %v5957_v21, 7 }
 0x31f   : > { %8556 = vmatpush.msrb.mxu0 %v10607_v42  ;;  %5627 = vst [vmem:[%s11007_s27 + $0x8b0] sm:$0x3] %v5585_v4  ;;  %9952 = vmatpush.msk.msrb.mxu1 %vm10577_vm4, %v10351_v49 }
 0x320   : > { %5628 = vst [vmem:[%s11007_s27 + $0xbd0] sm:$0xff] %v5586_v33  ;;  %v6093_v1 = vadd.f32 %v6092_v63, %v6066_v34  ;;  %v6123_v8 = vsel %vm1103_vm6, %v13047_v0, %v13036_v61  ;;  %v6125_v59 = vsel %vm1107_vm8, %v13047_v0, %v13036_v61  ;;  %v6128_v15 = vsel %vm1112_vm12, %v13047_v0, %v13036_v61 }
 0x321   : > { %5629 = vst [vmem:[%s11007_s27 + $0xbd8] sm:$0xff] %v5587_v14  ;;  %9953 = vmatpush.msk.msrb.mxu1 %vm10591_vm7, %v10351_v49 }
 0x322   : > { %8210 = vmatmul.f32.vlgmr.msra.gmra.mxu2 %v12881_v13  ;;  %8342 = vmatmul.f32.vlgmr.msrb.gmra.mxu3 %v12777_v23  ;;  %5630 = vst [vmem:[%s11007_s27 + $0xbe0] sm:$0xff] %v5588_v39  ;;  %v6116_v13 = vadd.f32 %v6115_v56, %v6093_v1  ;;  %v13054_v2 = vpop.f32.mrf.mxu0  ;;  %v8980_v1 = vpop.permute.xlu2 %8979 }
 0x323   : > { %8500 = vmatpush.msra.mxu2 %v10587_v36  ;;  %8631 = vmatpush.msrb.mxu3 %v10674_v58  ;;  %5631 = vst [vmem:[%s11007_s27 + $0xbe8] sm:$0xff] %v5586_v33  ;;  %v13066_v11 = vpop.f32.mrf.mxu1 }
 0x324   : > { %8449 = vmatmul.f32.vlgmr.msra.gmra.mxu0 %v13018_v29  ;;  %5632 = vst [vmem:[%s11007_s27 + $0xbf0] sm:$0xff] %v5587_v14  ;;  %v13052_v10 = vrot.slane %v6116_v13, 6 }
 0x325   : > { %8659 = vmatpush.msra.mxu0 %v10645_v52  ;;  %8503 = vmatpush.msra.mxu2 %v10602_v40  ;;  %5633 = vst [vmem:[%s11007_s27 + $0xbf8] sm:$0xff] %v5588_v39  ;;  %v13073_v19 = vpop.f32.mrf.mxu2 }
 0x326   : > { %8637 = vmatpush.msrb.mxu3 %v10679_v62  ;;  %5634 = vst [vmem:[%s11007_s27 + $0xc00] sm:$0x3] %v5586_v33  ;;  %v6124_v16 = vsel %vm1105_vm9, %v6123_v8, %v13052_v10  ;;  %v6126_v4 = vsel %vm1109_vm11, %v6125_v59, %v13052_v10  ;;  %8480 = vmatmul.f32.vlgmr.msra.gmra.mxu1 %v12923_v60  ;;  %v6412_v56 = vpop.f32.mrf.mxu3 }
 0x327   : > { %8662 = vmatpush.msra.mxu0 %v10665_v55  ;;  %5635 = vst [vmem:[%s11007_s27 + $0xc08] sm:$0x3] %v5587_v14  ;;  %v6134_v31 = vperm.slane %v6124_v16, 0  ;;  %v6135_v22 = vperm.slane %v6124_v16, 1  ;;  %v6136_v24 = vperm.slane %v6124_v16, 2  ;;  %9956 = vmatpush.msk.msra.mxu1 %vm10620_vm10, %v10351_v49  ;;  %v6129_v33 = vsel %vm1114_vm14, %v6128_v15, %v13052_v10 }
 0x328   : > { %5636 = vst [vmem:[%s11007_s27 + $0xc10] sm:$0x3] %v5588_v39  ;;  %v6130_v21 = vrot.slane %v6129_v33, 2  ;;  %v6131_v8 = vsel %vm1117_vm15, %v13047_v0, %v13036_v61  ;;  %v6254_v61 = vadd.f32 %v12981_v53, %v12964_v3 }
 0x329   : > { %6158 = vst [vmem:[%s11007_s27 + $0x1e0] sm:$0xfc] %v6134_v31  ;;  %9957 = vmatpush.msk.msra.mxu1 %vm10641_vm13, %v10351_v49 }
 0x32a   : > { %8319 = vmatmul.f32.vlgmr.msrb.gmra.mxu2 %v12777_v23  ;;  %8531 = vmatmul.f32.vlgmr.msra.gmra.mxu3 %v12976_v41  ;;  %v6127_v23 = vrot.slane %v6126_v4, 1  ;;  %6159 = vst [vmem:[%s11007_s27 + $0x1e8] sm:$0xfc] %v6135_v22  ;;  %v13099_v6 = vpop.f32.mrf.mxu0  ;;  %v6140_v13 = vperm.slane %v6130_v21, 0  ;;  %v6141_v16 = vperm.slane %v6130_v21, 1  ;;  %v6280_v3 = vadd.f32 %v13073_v19, %v6254_v61 }
 0x32b   : > { %9954 = vmatpush.msk.msrb.mxu2 %vm10620_vm10, %v10351_v49  ;;  %9958 = vmatpush.msk.msra.mxu3 %vm10620_vm10, %v10351_v49  ;;  %6160 = vst [vmem:[%s11007_s27 + $0x1f0] sm:$0xfc] %v6136_v24  ;;  %v13109_v46 = vpop.f32.mrf.mxu1 }
 0x32c   : > { %8558 = vmatmul.f32.vlgmr.msrb.gmra.mxu0 %v12923_v60  ;;  %6161 = vst [vmem:[%s11007_s27 + $0x1f8] sm:$0xff] %v6134_v31  ;;  %v6137_v28 = vperm.slane %v6127_v23, 0  ;;  %v6138_v12 = vperm.slane %v6127_v23, 1  ;;  %v6139_v14 = vperm.slane %v6127_v23, 2  ;;  %v6572_v19 = vadd.f32 %v13109_v46, %v13099_v6 }
 0x32d   : > { %9960 = vmatpush.msk.msrb.mxu0 %vm10686_vm2, %v10351_v49  ;;  %9955 = vmatpush.msk.msrb.mxu2 %vm10641_vm13, %v10351_v49  ;;  %6162 = vst [vmem:[%s11007_s27 + $0x200] sm:$0xff] %v6135_v22  ;;  %v6381_v39 = vpop.f32.mrf.mxu2 }
 0x32e   : > { %9959 = vmatpush.msk.msra.mxu3 %vm10641_vm13, %v10351_v49  ;;  %6163 = vst [vmem:[%s11007_s27 + $0x208] sm:$0xff] %v6136_v24  ;;  %8581 = vmatmul.f32.vlgmr.msrb.gmra.mxu1 %v12923_v60  ;;  %v13120_v18 = vpop.f32.mrf.mxu3  ;;  %v6413_v34 = vadd.f32 %v6412_v56, %v6381_v39  ;;  %v6305_v56 = vadd.f32 %v13029_v5, %v6280_v3 }
 0x32f   : > { %9961 = vmatpush.msk.msrb.mxu0 %vm10690_vm3, %v10351_v49  ;;  %6164 = vst [vmem:[%s11007_s27 + $0x210] sm:$0xf] %v6134_v31  ;;  %8790 = vmatpush.msrb.mxu1 %v10738_v44 }
 0x330   : > { %6165 = vst [vmem:[%s11007_s27 + $0x218] sm:$0xf] %v6135_v22  ;;  %v6439_v59 = vadd.f32 %v13054_v2, %v6413_v34  ;;  %v6132_v22 = vsel %vm1119_vm0, %v6131_v8, %v13052_v10  ;;  %v6332_v15 = vadd.f32 %v13004_v30, %v6305_v56 }
 0x331   : > { %6166 = vst [vmem:[%s11007_s27 + $0x220] sm:$0xf] %v6136_v24  ;;  %8796 = vmatpush.msrb.mxu1 %v10744_v50  ;;  %v6142_v24 = vperm.slane %v6130_v21, 2  ;;  %v6133_v0 = vrot.slane %v6132_v22, 3 }
 0x332   : > { %8506 = vmatmul.f32.vlgmr.msra.gmra.mxu2 %v12944_v35  ;;  %8639 = vmatmul.f32.vlgmr.msrb.gmra.mxu3 %v12923_v60  ;;  %6167 = vst [vmem:[%s11007_s27 + $0x540] sm:$0xfc] %v6137_v28  ;;  %v13136_v26 = vpop.f32.mrf.mxu0  ;;  %v6464_v53 = vadd.f32 %v13066_v11, %v6439_v59  ;;  %v13247_v37 = vadd.f32 %v13016_v45, %v6332_v15 }
 0x333   : > { %8711 = vmatpush.msra.mxu2 %v10663_v54  ;;  %9962 = vmatpush.msk.msrb.mxu3 %vm10686_vm2, %v10351_v49  ;;  %6168 = vst [vmem:[%s11007_s27 + $0x548] sm:$0xfc] %v6138_v12  ;;  %v13144_v63 = vpop.f32.mrf.mxu1  ;;  %v6143_v11 = vperm.slane %v6133_v0, 0  ;;  %v6145_v5 = vperm.slane %v6133_v0, 2 }
 0x334   : > { %8665 = vmatmul.f32.vlgmr.msra.gmra.mxu0 %v12944_v35  ;;  %6169 = vst [vmem:[%s11007_s27 + $0x550] sm:$0xfc] %v6139_v14 }
 0x335   : > { %8870 = vmatpush.msra.mxu0 %v10711_v25  ;;  %8715 = vmatpush.msra.mxu2 %v10671_v57  ;;  %6170 = vst [vmem:[%s11007_s27 + $0x558] sm:$0xff] %v6137_v28  ;;  %v6490_v4 = vpop.f32.mrf.mxu2 }
 0x336   : > { %9963 = vmatpush.msk.msrb.mxu3 %vm10690_vm3, %v10351_v49  ;;  %6171 = vst [vmem:[%s11007_s27 + $0x560] sm:$0xff] %v6138_v12  ;;  %8690 = vmatmul.f32.vlgmr.msra.gmra.mxu1 %v12976_v41  ;;  %v6622_v31 = vpop.f32.mrf.mxu3  ;;  %v6491_v10 = vadd.f32 %v6490_v4, %v6464_v53 }
 0x337   : > { %8874 = vmatpush.msra.mxu0 %v10718_v27  ;;  %6172 = vst [vmem:[%s11007_s27 + $0x568] sm:$0xff] %v6139_v14  ;;  %9964 = vmatpush.msk.msra.mxu1 %vm10686_vm2, %v10351_v49 }
 0x338   : > { %6173 = vst [vmem:[%s11007_s27 + $0x570] sm:$0xf] %v6137_v28  ;;  %v6514_v46 = vadd.f32 %v13120_v18, %v6491_v10 }
 0x339   : > { %6174 = vst [vmem:[%s11007_s27 + $0x578] sm:$0xf] %v6138_v12  ;;  %9965 = vmatpush.msk.msra.mxu1 %vm10690_vm3, %v10351_v49 }
 0x33a   : > { %8608 = vmatmul.f32.vlgmr.msrb.gmra.mxu2 %v13018_v29  ;;  %8740 = vmatmul.f32.vlgmr.msra.gmra.mxu3 %v12923_v60  ;;  %6175 = vst [vmem:[%s11007_s27 + $0x580] sm:$0xf] %v6139_v14  ;;  %v13236_v30 = vrot.slane %v6514_v46, 7 }
 0x33b   : > { %8818 = vmatpush.msrb.mxu2 %v10700_v17  ;;  %9029 = vmatpush.msra.mxu3 %v10610_v43  ;;  %6176 = vst [vmem:[%s11007_s27 + $0x8a0] sm:$0xfc] %v6140_v13  ;;  %v13177_v43 = vpop.f32.mrf.mxu0  ;;  %v13185_v2 = vpop.f32.mrf.mxu1 }
 0x33c   : > { %8767 = vmatmul.f32.vlgmr.msrb.gmra.mxu0 %v13018_v29  ;;  %v8981_v29 = vsel %vm617_vm5, %v8980_v1, 0  ;;  %6177 = vst [vmem:[%s11007_s27 + $0x8a8] sm:$0xfc] %v6141_v16  ;;  %v6680_v45 = vsel %vm1103_vm6, %v13247_v37, %v13236_v30  ;;  %v6685_v59 = vsel %vm1112_vm12, %v13247_v37, %v13236_v30 }
 0x33d   : > { %9057 = vmatpush.msrb.mxu0 %v10587_v36  ;;  %8821 = vmatpush.msrb.mxu2 %v10702_v20  ;;  %6178 = vst [vmem:[%s11007_s27 + $0x8b0] sm:$0xfc] %v6142_v24  ;;  %v13182_v36 = vand.u32 4294901760, %v8981_v29 }
 0x33e   : > { %9035 = vmatpush.msra.mxu3 %v10615_v47  ;;  %6179 = vst [vmem:[%s11007_s27 + $0x8b8] sm:$0xff] %v6140_v13  ;;  %v6597_v47 = vpop.f32.mrf.mxu2  ;;  %8798 = vmatmul.f32.vlgmr.msrb.gmra.mxu1 %v12923_v60  ;;  %v13195_v28 = vpop.f32.mrf.mxu3 }
 0x33f   : > { %9060 = vmatpush.msrb.mxu0 %v10602_v40  ;;  %6180 = vst [vmem:[%s11007_s27 + $0x8c0] sm:$0xff] %v6141_v16  ;;  %v6144_v40 = vperm.slane %v6133_v0, 1  ;;  %v6598_v23 = vadd.f32 %v6597_v47, %v6572_v19  ;;  %v13200_v6 = vsub.f32 %v8981_v29, %v13182_v36  ;;  %9968 = vmatpush.msk.msrb.mxu1 %vm10577_vm4, %v10351_v49 }
 0x340   : > { %6181 = vst [vmem:[%s11007_s27 + $0x8c8] sm:$0xff] %v6142_v24 }
 0x341   : > { %6182 = vst [vmem:[%s11007_s27 + $0x8d0] sm:$0xf] %v6140_v13  ;;  %9969 = vmatpush.msk.msrb.mxu1 %vm10591_vm7, %v10351_v49  ;;  %v13239_v33 = vand.u32 4294901760, %v13200_v6 }
 0x342   : > { %8717 = vmatmul.f32.vlgmr.msra.gmra.mxu2 %v12923_v60  ;;  %8849 = vmatmul.f32.vlgmr.msrb.gmra.mxu3 %v12976_v41  ;;  %6183 = vst [vmem:[%s11007_s27 + $0x8d8] sm:$0xf] %v6141_v16  ;;  %v6623_v41 = vadd.f32 %v6622_v31, %v6598_v23 }
 0x343   : > { %9966 = vmatpush.msk.msra.mxu2 %vm10577_vm4, %v10351_v49  ;;  %6184 = vst [vmem:[%s11007_s27 + $0x8e0] sm:$0xf] %v6142_v24  ;;  %9970 = vmatpush.msk.msrb.mxu3 %vm10577_vm4, %v10351_v49  ;;  %v13227_v12 = vpop.f32.mrf.mxu0  ;;  %v13243_v39 = vpop.f32.mrf.mxu1  ;;  %v6688_v24 = vsel %vm1117_vm15, %v13247_v37, %v13236_v30 }
 0x344   : > { %8876 = vmatmul.f32.vlgmr.msra.gmra.mxu0 %v12923_v60  ;;  %6185 = vst [vmem:[%s11007_s27 + $0xc00] sm:$0xfc] %v6143_v11  ;;  %v6650_v32 = vadd.f32 %v13136_v26, %v6623_v41 }
 0x345   : > { %9972 = vmatpush.msk.msra.mxu0 %vm10620_vm10, %v10351_v49  ;;  %9967 = vmatpush.msk.msra.mxu2 %vm10591_vm7, %v10351_v49  ;;  %6186 = vst [vmem:[%s11007_s27 + $0xc08] sm:$0xfc] %v6144_v40 }
 0x346   : > { %9971 = vmatpush.msk.msrb.mxu3 %vm10591_vm7, %v10351_v49  ;;  %6187 = vst [vmem:[%s11007_s27 + $0xc10] sm:$0xfc] %v6145_v5  ;;  %v6673_v14 = vadd.f32 %v13144_v63, %v6650_v32  ;;  %8899 = vmatmul.f32.vlgmr.msra.gmra.mxu1 %v12923_v60  ;;  %v13254_v21 = vpop.f32.mrf.mxu2  ;;  %v13256_v34 = vpop.f32.mrf.mxu3  ;;  %v9004_v60 = vsub.f32 %v13200_v6, %v13239_v33 }
 0x347   : > { %9973 = vmatpush.msk.msra.mxu0 %vm10641_vm13, %v10351_v49  ;;  %6188 = vst [vmem:[%s11007_s27 + $0xc18] sm:$0xff] %v6143_v11  ;;  %9188 = vmatpush.msra.mxu1 %v10674_v58  ;;  %v6811_v3 = vadd.f32 %v13195_v28, %v13254_v21 }
 0x348   : > { %6189 = vst [vmem:[%s11007_s27 + $0xc20] sm:$0xff] %v6144_v40  ;;  %v13252_v18 = vrot.slane %v6673_v14, 6  ;;  %v13286_v8 = vand.u32 4294901760, %v9004_v60 }
 0x349   : > { %6190 = vst [vmem:[%s11007_s27 + $0xc28] sm:$0xff] %v6145_v5  ;;  %9194 = vmatpush.msra.mxu1 %v10679_v62  ;;  %v6837_v56 = vadd.f32 %v13177_v43, %v6811_v3 }
 0x34a   : > { %8824 = vmatmul.f32.vlgmr.msrb.gmra.mxu2 %v12944_v35  ;;  %9037 = vmatmul.f32.vlgmr.msra.gmra.mxu3 %v13182_v36  ;;  %6191 = vst [vmem:[%s11007_s27 + $0xc30] sm:$0xf] %v6143_v11  ;;  %v6682_v35 = vsel %vm1107_vm8, %v13247_v37, %v13236_v30  ;;  %v6681_v26 = vsel %vm1105_vm9, %v6680_v45, %v13252_v18 }
 0x34b   : > { %9109 = vmatpush.msrb.mxu2 %v10596_v38  ;;  %6192 = vst [vmem:[%s11007_s27 + $0xc38] sm:$0xf] %v6144_v40  ;;  %v6683_v63 = vsel %vm1109_vm11, %v6682_v35, %v13252_v18  ;;  %v6691_v1 = vperm.slane %v6681_v26, 0  ;;  %v6692_v38 = vperm.slane %v6681_v26, 1  ;;  %v6693_v58 = vperm.slane %v6681_v26, 2  ;;  %v13279_v13 = vpop.f32.mrf.mxu0  ;;  %9974 = vmatpush.msk.msra.mxu3 %vm10620_vm10, %v10351_v49  ;;  %v13289_v62 = vpop.f32.mrf.mxu1 }
 0x34c   : > { %9063 = vmatmul.f32.vlgmr.msrb.gmra.mxu0 %v13200_v6  ;;  %6193 = vst [vmem:[%s11007_s27 + $0xc40] sm:$0xf] %v6145_v5  ;;  %v6684_v16 = vrot.slane %v6683_v63, 1  ;;  %v6686_v48 = vsel %vm1114_vm14, %v6685_v59, %v13252_v18  ;;  %v6689_v29 = vsel %vm1119_vm0, %v6688_v24, %v13252_v18 }
 0x34d   : > { %9113 = vmatpush.msrb.mxu2 %v10607_v42  ;;  %9268 = vmatpush.msrb.mxu0 %v10663_v54  ;;  %6715 = vst [vmem:[%s11007_s27 + $0x210] sm:$0xf0] %v6691_v1  ;;  %v6687_v51 = vrot.slane %v6686_v48, 2 }
 0x34e   : > { %6716 = vst [vmem:[%s11007_s27 + $0x218] sm:$0xf0] %v6692_v38  ;;  %9975 = vmatpush.msk.msra.mxu3 %vm10641_vm13, %v10351_v49  ;;  %9088 = vmatmul.f32.vlgmr.msrb.gmra.mxu1 %v13239_v33  ;;  %v13299_v42 = vpop.f32.mrf.mxu2  ;;  %v7020_v54 = vpop.f32.mrf.mxu3  ;;  %v6695_v4 = vperm.slane %v6684_v16, 1 }
 0x34f   : > { %9272 = vmatpush.msrb.mxu0 %v10671_v57  ;;  %6717 = vst [vmem:[%s11007_s27 + $0x220] sm:$0xf0] %v6693_v58  ;;  %9976 = vmatpush.msk.msrb.mxu1 %vm10620_vm10, %v10351_v49  ;;  %v6694_v57 = vperm.slane %v6684_v16, 0  ;;  %v6697_v22 = vperm.slane %v6687_v51, 0  ;;  %v6698_v61 = vperm.slane %v6687_v51, 1  ;;  %v6699_v0 = vperm.slane %v6687_v51, 2 }
 0x350   : > { %6718 = vst [vmem:[%s11007_s27 + $0x228] sm:$0xff] %v6691_v1 }
 0x351   : > { %6719 = vst [vmem:[%s11007_s27 + $0x230] sm:$0xff] %v6692_v38  ;;  %9977 = vmatpush.msk.msrb.mxu1 %vm10641_vm13, %v10351_v49 }
 0x352   : > { %9006 = vmatmul.f32.vlgmr.msra.gmra.mxu2 %v13286_v8  ;;  %9138 = vmatmul.f32.vlgmr.msrb.gmra.mxu3 %v13182_v36  ;;  %6720 = vst [vmem:[%s11007_s27 + $0x238] sm:$0xff] %v6693_v58 }
 0x353   : > { %9216 = vmatpush.msra.mxu2 %v10645_v52  ;;  %9347 = vmatpush.msrb.mxu3 %v10738_v44  ;;  %6721 = vst [vmem:[%s11007_s27 + $0x240] sm:$0x3f] %v6691_v1  ;;  %v6696_v52 = vperm.slane %v6684_v16, 2  ;;  %v7179_v44 = vpop.f32.mrf.mxu1 }
 0x354   : > { %9165 = vmatmul.f32.vlgmr.msra.gmra.mxu0 %v13286_v8  ;;  %6722 = vst [vmem:[%s11007_s27 + $0x248] sm:$0x3f] %v6692_v38 }
 0x355   : > { %9375 = vmatpush.msra.mxu0 %v10700_v17  ;;  %9219 = vmatpush.msra.mxu2 %v10665_v55  ;;  %v7154_v17 = vpop.f32.mrf.mxu0  ;;  %6723 = vst [vmem:[%s11007_s27 + $0x250] sm:$0x3f] %v6693_v58  ;;  %v6970_v55 = vadd.f32 %v13243_v39, %v13227_v12 }
 0x356   : > { %9353 = vmatpush.msrb.mxu3 %v10744_v50  ;;  %6724 = vst [vmem:[%s11007_s27 + $0x570] sm:$0xf0] %v6694_v57  ;;  %9196 = vmatmul.f32.vlgmr.msra.gmra.mxu1 %v13182_v36  ;;  %v6995_v31 = vpop.f32.mrf.mxu2  ;;  %v7128_v50 = vpop.f32.mrf.mxu3 }
 0x357   : > { %9378 = vmatpush.msra.mxu0 %v10702_v20  ;;  %6725 = vst [vmem:[%s11007_s27 + $0x578] sm:$0xf0] %v6695_v4  ;;  %9980 = vmatpush.msk.msra.mxu1 %vm10686_vm2, %v10351_v49  ;;  %v6996_v20 = vadd.f32 %v6995_v31, %v6970_v55 }
 0x358   : > { %6726 = vst [vmem:[%s11007_s27 + $0x580] sm:$0xf0] %v6696_v52 }
 0x359   : > { %6727 = vst [vmem:[%s11007_s27 + $0x588] sm:$0xff] %v6694_v57  ;;  %9981 = vmatpush.msk.msra.mxu1 %vm10690_vm3, %v10351_v49  ;;  %v7021_v53 = vadd.f32 %v7020_v54, %v6996_v20 }
 0x35a   : > { %9115 = vmatmul.f32.vlgmr.msrb.gmra.mxu2 %v13182_v36  ;;  %9247 = vmatmul.f32.vlgmr.msra.gmra.mxu3 %v13239_v33  ;;  %6728 = vst [vmem:[%s11007_s27 + $0x590] sm:$0xff] %v6695_v4 }
 0x35b   : > { %9978 = vmatpush.msk.msrb.mxu2 %vm10686_vm2, %v10351_v49  ;;  %9982 = vmatpush.msk.msra.mxu3 %vm10686_vm2, %v10351_v49  ;;  %6729 = vst [vmem:[%s11007_s27 + $0x598] sm:$0xff] %v6696_v52  ;;  %v13367_v10 = vpop.f32.mrf.mxu1  ;;  %v7048_v47 = vadd.f32 %v13279_v13, %v7021_v53 }
 0x35c   : > { %9274 = vmatmul.f32.vlgmr.msrb.gmra.mxu0 %v13182_v36  ;;  %6730 = vst [vmem:[%s11007_s27 + $0x5a0] sm:$0x3f] %v6694_v57 }
 0x35d   : > { %9979 = vmatpush.msk.msrb.mxu2 %vm10690_vm3, %v10351_v49  ;;  %v13356_v7 = vpop.f32.mrf.mxu0  ;;  %9983 = vmatpush.msk.msra.mxu3 %vm10690_vm3, %v10351_v49  ;;  %6731 = vst [vmem:[%s11007_s27 + $0x5a8] sm:$0x3f] %v6695_v4  ;;  %v6690_v49 = vrot.slane %v6689_v29, 3  ;;  %v7071_v43 = vadd.f32 %v13289_v62, %v7048_v47 }
 0x35e   : > { %6732 = vst [vmem:[%s11007_s27 + $0x5b0] sm:$0x3f] %v6696_v52  ;;  %9297 = vmatmul.f32.vlgmr.msrb.gmra.mxu1 %v13182_v36  ;;  %v7097_v9 = vpop.f32.mrf.mxu2  ;;  %v7229_v19 = vpop.f32.mrf.mxu3  ;;  %v7368_v24 = vadd.f32 %v13367_v10, %v13356_v7 }
 0x35f   : > { %6733 = vst [vmem:[%s11007_s27 + $0x8d0] sm:$0xf0] %v6697_v22  ;;  %v7129_v11 = vadd.f32 %v7128_v50, %v7097_v9  ;;  %v6700_v23 = vperm.slane %v6690_v49, 0  ;;  %v6702_v5 = vperm.slane %v6690_v49, 2  ;;  %v7235_v12 = vrot.slane %v7071_v43, 7 }
 0x360   : > { %6734 = vst [vmem:[%s11007_s27 + $0x8d8] sm:$0xf0] %v6698_v61 }
 0x361   : > { %6735 = vst [vmem:[%s11007_s27 + $0x8e0] sm:$0xf0] %v6699_v0  ;;  %v7155_v40 = vadd.f32 %v7154_v17, %v7129_v11 }
 0x362   : > { %9222 = vmatmul.f32.vlgmr.msra.gmra.mxu2 %v13200_v6  ;;  %9355 = vmatmul.f32.vlgmr.msrb.gmra.mxu3 %v13182_v36  ;;  %6736 = vst [vmem:[%s11007_s27 + $0x8e8] sm:$0xff] %v6697_v22 }
 0x363   : > { %9427 = vmatpush.msra.mxu2 %v10711_v25  ;;  %6737 = vst [vmem:[%s11007_s27 + $0x8f0] sm:$0xff] %v6698_v61  ;;  %v6862_v25 = vadd.f32 %v13185_v2, %v6837_v56  ;;  %v13389_v46 = vpop.f32.mrf.mxu1  ;;  %v7180_v41 = vadd.f32 %v7179_v44, %v7155_v40 }
 0x364   : > { %9381 = vmatmul.f32.vlgmr.msra.gmra.mxu0 %v13200_v6  ;;  %6738 = vst [vmem:[%s11007_s27 + $0x8f8] sm:$0xff] %v6699_v0  ;;  %v6701_v6 = vperm.slane %v6690_v49, 1 }
 0x365   : > { %v13382_v28 = vpop.f32.mrf.mxu0  ;;  %9431 = vmatpush.msra.mxu2 %v10718_v27  ;;  %6739 = vst [vmem:[%s11007_s27 + $0x900] sm:$0x3f] %v6697_v22  ;;  %v6889_v27 = vadd.f32 %v13299_v42, %v6862_v25 }
 0x366   : > { %6740 = vst [vmem:[%s11007_s27 + $0x908] sm:$0x3f] %v6698_v61  ;;  %9406 = vmatmul.f32.vlgmr.msra.gmra.mxu1 %v13239_v33  ;;  %v7206_v15 = vpop.f32.mrf.mxu2  ;;  %v13398_v32 = vpop.f32.mrf.mxu3 }
 0x367   : > { %6741 = vst [vmem:[%s11007_s27 + $0x910] sm:$0x3f] %v6699_v0  ;;  %v7207_v2 = vadd.f32 %v7206_v15, %v7180_v41  ;;  %v6912_v33 = vadd.f32 %v13256_v34, %v6889_v27 }
 0x368   : > { %6742 = vst [vmem:[%s11007_s27 + $0xc30] sm:$0xf0] %v6700_v23 }
 0x369   : > { %6743 = vst [vmem:[%s11007_s27 + $0xc38] sm:$0xf0] %v6701_v6  ;;  %v7230_v30 = vadd.f32 %v7229_v19, %v7207_v2  ;;  %v7237_v37 = vsel %vm1103_vm6, %v6912_v33, %v7235_v12  ;;  %v7239_v21 = vsel %vm1107_vm8, %v6912_v33, %v7235_v12  ;;  %v7245_v44 = vsel %vm1117_vm15, %v6912_v33, %v7235_v12 }
 0x36a   : > { %9324 = vmatmul.f32.vlgmr.msrb.gmra.mxu2 %v13286_v8  ;;  %9456 = vmatmul.f32.vlgmr.msra.gmra.mxu3 %v13182_v36  ;;  %6744 = vst [vmem:[%s11007_s27 + $0xc40] sm:$0xf0] %v6702_v5  ;;  %v7242_v8 = vsel %vm1112_vm12, %v6912_v33, %v7235_v12 }
 0x36b   : > { %6745 = vst [vmem:[%s11007_s27 + $0xc48] sm:$0xff] %v6700_v23  ;;  %v7236_v14 = vrot.slane %v7230_v30, 6  ;;  %v7577_v45 = vpop.f32.mrf.mxu1 }
 0x36c   : > { %6746 = vst [vmem:[%s11007_s27 + $0xc50] sm:$0xff] %v6701_v6 }
 0x36d   : > { %6747 = vst [vmem:[%s11007_s27 + $0xc58] sm:$0xff] %v6702_v5  ;;  %v7552_v39 = vpop.f32.mrf.mxu0  ;;  %v7238_v18 = vsel %vm1105_vm9, %v7237_v37, %v7236_v14  ;;  %v7240_v34 = vsel %vm1109_vm11, %v7239_v21, %v7236_v14  ;;  %v7243_v62 = vsel %vm1114_vm14, %v7242_v8, %v7236_v14  ;;  %v7246_v20 = vsel %vm1119_vm0, %v7245_v44, %v7236_v14 }
 0x36e   : > { %6748 = vst [vmem:[%s11007_s27 + $0xc60] sm:$0x3f] %v6700_v23  ;;  %v7248_v60 = vperm.slane %v7238_v18, 0  ;;  %v7249_v35 = vperm.slane %v7238_v18, 1  ;;  %v7250_v26 = vperm.slane %v7238_v18, 2  ;;  %v7393_v63 = vpop.f32.mrf.mxu2  ;;  %v7526_v1 = vpop.f32.mrf.mxu3  ;;  %v7241_v38 = vrot.slane %v7240_v34, 1 }
 0x36f   : > { %6749 = vst [vmem:[%s11007_s27 + $0xc68] sm:$0x3f] %v6701_v6  ;;  %v7244_v59 = vrot.slane %v7243_v62, 2  ;;  %v7247_v61 = vrot.slane %v7246_v20, 3  ;;  %v7394_v29 = vadd.f32 %v7393_v63, %v7368_v24 }
 0x370   : > { %6750 = vst [vmem:[%s11007_s27 + $0xc70] sm:$0x3f] %v6702_v5  ;;  %v7251_v13 = vperm.slane %v7241_v38, 0  ;;  %v7252_v16 = vperm.slane %v7241_v38, 1  ;;  %v7253_v42 = vperm.slane %v7241_v38, 2 }
 0x371   : > { %7272 = vst [vmem:[%s11007_s27 + $0x240] sm:$0xc0] %v7248_v60  ;;  %v7254_v17 = vperm.slane %v7244_v59, 0  ;;  %v7255_v51 = vperm.slane %v7244_v59, 1  ;;  %v7256_v22 = vperm.slane %v7244_v59, 2  ;;  %v7257_v7 = vperm.slane %v7247_v61, 0 }
 0x372   : > { %9433 = vmatmul.f32.vlgmr.msra.gmra.mxu2 %v13182_v36  ;;  %7273 = vst [vmem:[%s11007_s27 + $0x248] sm:$0xc0] %v7249_v35  ;;  %v7419_v10 = vadd.f32 %v13398_v32, %v7394_v29  ;;  %v7258_v11 = vperm.slane %v7247_v61, 1  ;;  %v7259_v40 = vperm.slane %v7247_v61, 2 }
 0x373   : > { %7274 = vst [vmem:[%s11007_s27 + $0x250] sm:$0xc0] %v7250_v26  ;;  %v7685_v36 = vpop.f32.mrf.mxu1 }
 0x374   : > { %7275 = vst [vmem:[%s11007_s27 + $0x258] sm:$0xff] %v7248_v60  ;;  %v7446_v5 = vadd.f32 %v13382_v28, %v7419_v10 }
 0x375   : > { %v7654_v58 = vpop.f32.mrf.mxu0  ;;  %7276 = vst [vmem:[%s11007_s27 + $0x260] sm:$0xff] %v7249_v35 }
 0x376   : > { %7277 = vst [vmem:[%s11007_s27 + $0x268] sm:$0xff] %v7250_v26  ;;  %v7495_v54 = vpop.f32.mrf.mxu2  ;;  %v7627_v57 = vpop.f32.mrf.mxu3  ;;  %v7686_v9 = vadd.f32 %v7685_v36, %v7654_v58  ;;  %v7469_v2 = vadd.f32 %v13389_v46, %v7446_v5 }
 0x377   : > { %7278 = vst [vmem:[%s11007_s27 + $0x270] sm:$0xff] %v7248_v60  ;;  %v7527_v4 = vadd.f32 %v7526_v1, %v7495_v54 }
 0x378   : > { %7279 = vst [vmem:[%s11007_s27 + $0x278] sm:$0xff] %v7249_v35 }
 0x379   : > { %7280 = vst [vmem:[%s11007_s27 + $0x280] sm:$0xff] %v7250_v26  ;;  %v7553_v55 = vadd.f32 %v7552_v39, %v7527_v4 }
 0x37a   : > { %7281 = vst [vmem:[%s11007_s27 + $0x5a0] sm:$0xc0] %v7251_v13 }
 0x37b   : > { %7282 = vst [vmem:[%s11007_s27 + $0x5a8] sm:$0xc0] %v7252_v16  ;;  %v7786_v52 = vpop.f32.mrf.mxu1  ;;  %v7578_v0 = vadd.f32 %v7577_v45, %v7553_v55 }
 0x37c   : > { %7283 = vst [vmem:[%s11007_s27 + $0x5b0] sm:$0xc0] %v7253_v42 }
 0x37d   : > { %v7763_v48 = vpop.f32.mrf.mxu0  ;;  %7284 = vst [vmem:[%s11007_s27 + $0x5b8] sm:$0xff] %v7251_v13 }
 0x37e   : > { %7285 = vst [vmem:[%s11007_s27 + $0x5c0] sm:$0xff] %v7252_v16  ;;  %v7604_v31 = vpop.f32.mrf.mxu2  ;;  %v7736_v50 = vpop.f32.mrf.mxu3 }
 0x37f   : > { %7286 = vst [vmem:[%s11007_s27 + $0x5c8] sm:$0xff] %v7253_v42  ;;  %v7605_v53 = vadd.f32 %v7604_v31, %v7578_v0 }
 0x380   : > { %7287 = vst [vmem:[%s11007_s27 + $0x5d0] sm:$0xff] %v7251_v13 }
 0x381   : > { %7288 = vst [vmem:[%s11007_s27 + $0x5d8] sm:$0xff] %v7252_v16  ;;  %v7628_v23 = vadd.f32 %v7627_v57, %v7605_v53 }
 0x382   : > { %7289 = vst [vmem:[%s11007_s27 + $0x5e0] sm:$0xff] %v7253_v42 }
 0x383   : > { %7290 = vst [vmem:[%s11007_s27 + $0x900] sm:$0xc0] %v7254_v17  ;;  %v13443_v49 = vpop.f32.mrf.mxu1  ;;  %v7792_v41 = vrot.slane %v7628_v23, 7 }
 0x384   : > { %7291 = vst [vmem:[%s11007_s27 + $0x908] sm:$0xc0] %v7255_v51 }
 0x385   : > { %v13439_v3 = vpop.f32.mrf.mxu0  ;;  %7292 = vst [vmem:[%s11007_s27 + $0x910] sm:$0xc0] %v7256_v22  ;;  %v7794_v28 = vsel %vm1103_vm6, %v7469_v2, %v7792_v41  ;;  %v7796_v33 = vsel %vm1107_vm8, %v7469_v2, %v7792_v41  ;;  %v7799_v63 = vsel %vm1112_vm12, %v7469_v2, %v7792_v41  ;;  %v7802_v59 = vsel %vm1117_vm15, %v7469_v2, %v7792_v41 }
 0x386   : > { %7293 = vst [vmem:[%s11007_s27 + $0x918] sm:$0xff] %v7254_v17  ;;  %v7711_v19 = vpop.f32.mrf.mxu2  ;;  %v13449_v47 = vpop.f32.mrf.mxu3 }
 0x387   : > { %7294 = vst [vmem:[%s11007_s27 + $0x920] sm:$0xff] %v7255_v51  ;;  %v7712_v56 = vadd.f32 %v7711_v19, %v7686_v9 }
 0x388   : > { %7295 = vst [vmem:[%s11007_s27 + $0x928] sm:$0xff] %v7256_v22 }
 0x389   : > { %7296 = vst [vmem:[%s11007_s27 + $0x930] sm:$0xff] %v7254_v17  ;;  %v7737_v6 = vadd.f32 %v7736_v50, %v7712_v56 }
 0x38a   : > { %7297 = vst [vmem:[%s11007_s27 + $0x938] sm:$0xff] %v7255_v51 }
 0x38b   : > { %7298 = vst [vmem:[%s11007_s27 + $0x940] sm:$0xff] %v7256_v22  ;;  %v7764_v25 = vadd.f32 %v7763_v48, %v7737_v6  ;;  %v8083_v15 = vpop.f32.mrf.mxu1 }
 0x38c   : > { %7299 = vst [vmem:[%s11007_s27 + $0xc60] sm:$0xc0] %v7257_v7 }
 0x38d   : > { %7300 = vst [vmem:[%s11007_s27 + $0xc68] sm:$0xc0] %v7258_v11  ;;  %v8052_v43 = vpop.f32.mrf.mxu0  ;;  %v7787_v27 = vadd.f32 %v7786_v52, %v7764_v25 }
 0x38e   : > { %7301 = vst [vmem:[%s11007_s27 + $0xc70] sm:$0xc0] %v7259_v40  ;;  %v7893_v12 = vpop.f32.mrf.mxu2  ;;  %v13461_v30 = vpop.f32.mrf.mxu3  ;;  %v8084_v16 = vadd.f32 %v8083_v15, %v8052_v43 }
 0x38f   : > { %7302 = vst [vmem:[%s11007_s27 + $0xc78] sm:$0xff] %v7257_v7  ;;  %v7793_v32 = vrot.slane %v7787_v27, 6  ;;  %v7925_v44 = vadd.f32 %v13449_v47, %v7893_v12 }
 0x390   : > { %7303 = vst [vmem:[%s11007_s27 + $0xc80] sm:$0xff] %v7258_v11 }
 0x391   : > { %7304 = vst [vmem:[%s11007_s27 + $0xc88] sm:$0xff] %v7259_v40  ;;  %v7795_v14 = vsel %vm1105_vm9, %v7794_v28, %v7793_v32  ;;  %v7797_v46 = vsel %vm1109_vm11, %v7796_v33, %v7793_v32  ;;  %v7800_v38 = vsel %vm1114_vm14, %v7799_v63, %v7793_v32  ;;  %v7803_v52 = vsel %vm1119_vm0, %v7802_v59, %v7793_v32 }
 0x392   : > { %7305 = vst [vmem:[%s11007_s27 + $0xc90] sm:$0xff] %v7257_v7  ;;  %v7805_v39 = vperm.slane %v7795_v14, 0  ;;  %v7806_v37 = vperm.slane %v7795_v14, 1  ;;  %v7807_v18 = vperm.slane %v7795_v14, 2  ;;  %v7798_v45 = vrot.slane %v7797_v46, 1 }
 0x393   : > { %7306 = vst [vmem:[%s11007_s27 + $0xc98] sm:$0xff] %v7258_v11  ;;  %v8184_v34 = vpop.f32.mrf.mxu1  ;;  %v7801_v8 = vrot.slane %v7800_v38, 2  ;;  %v7804_v31 = vrot.slane %v7803_v52, 3  ;;  %v7951_v24 = vadd.f32 %v13439_v3, %v7925_v44 }
 0x394   : > { %7307 = vst [vmem:[%s11007_s27 + $0xca0] sm:$0xff] %v7259_v40  ;;  %v7808_v26 = vperm.slane %v7798_v45, 0  ;;  %v7809_v1 = vperm.slane %v7798_v45, 1  ;;  %v7810_v58 = vperm.slane %v7798_v45, 2 }
 0x395   : > { %v8161_v21 = vpop.f32.mrf.mxu0  ;;  %7829 = vst [vmem:[%s11007_s27 + $0x288] sm:$0xff] %v7805_v39  ;;  %v7811_v57 = vperm.slane %v7801_v8, 0  ;;  %v7812_v4 = vperm.slane %v7801_v8, 1  ;;  %v7813_v17 = vperm.slane %v7801_v8, 2  ;;  %v7814_v0 = vperm.slane %v7804_v31, 0 }
 0x396   : > { %7830 = vst [vmem:[%s11007_s27 + $0x290] sm:$0xff] %v7806_v37  ;;  %v8002_v60 = vpop.f32.mrf.mxu2  ;;  %v8134_v35 = vpop.f32.mrf.mxu3  ;;  %v7815_v53 = vperm.slane %v7804_v31, 1  ;;  %v7816_v9 = vperm.slane %v7804_v31, 2  ;;  %v7976_v7 = vadd.f32 %v13443_v49, %v7951_v24 }
 0x397   : > { %7831 = vst [vmem:[%s11007_s27 + $0x298] sm:$0xff] %v7807_v18 }
 0x398   : > { %7832 = vst [vmem:[%s11007_s27 + $0x2a0] sm:$0xff] %v7805_v39  ;;  %v8003_v11 = vadd.f32 %v8002_v60, %v7976_v7 }
 0x399   : > { %7833 = vst [vmem:[%s11007_s27 + $0x2a8] sm:$0xff] %v7806_v37 }
 0x39a   : > { %7834 = vst [vmem:[%s11007_s27 + $0x2b0] sm:$0xff] %v7807_v18  ;;  %v8026_v5 = vadd.f32 %v13461_v30, %v8003_v11 }
 0x39b   : > { %7835 = vst [vmem:[%s11007_s27 + $0x2b8] sm:$0x3] %v7805_v39  ;;  %v8293_v36 = vpop.f32.mrf.mxu1 }
 0x39c   : > { %7836 = vst [vmem:[%s11007_s27 + $0x2c0] sm:$0x3] %v7806_v37 }
 0x39d   : > { %v8268_v13 = vpop.f32.mrf.mxu0  ;;  %7837 = vst [vmem:[%s11007_s27 + $0x2c8] sm:$0x3] %v7807_v18 }
 0x39e   : > { %7838 = vst [vmem:[%s11007_s27 + $0x5e8] sm:$0xff] %v7808_v26  ;;  %v8109_v62 = vpop.f32.mrf.mxu2  ;;  %v8242_v42 = vpop.f32.mrf.mxu3 }
 0x39f   : > { %7839 = vst [vmem:[%s11007_s27 + $0x5f0] sm:$0xff] %v7809_v1  ;;  %v8110_v54 = vadd.f32 %v8109_v62, %v8084_v16 }
 0x3a0   : > { %7840 = vst [vmem:[%s11007_s27 + $0x5f8] sm:$0xff] %v7810_v58 }
 0x3a1   : > { %7841 = vst [vmem:[%s11007_s27 + $0x600] sm:$0xff] %v7808_v26  ;;  %v8135_v51 = vadd.f32 %v8134_v35, %v8110_v54 }
 0x3a2   : > { %7842 = vst [vmem:[%s11007_s27 + $0x608] sm:$0xff] %v7809_v1 }
 0x3a3   : > { %7843 = vst [vmem:[%s11007_s27 + $0x610] sm:$0xff] %v7810_v58  ;;  %v13496_v55 = vpop.f32.mrf.mxu1  ;;  %v8162_v61 = vadd.f32 %v8161_v21, %v8135_v51 }
 0x3a4   : > { %7844 = vst [vmem:[%s11007_s27 + $0x618] sm:$0x3] %v7808_v26 }
 0x3a5   : > { %v13489_v48 = vpop.f32.mrf.mxu0  ;;  %7845 = vst [vmem:[%s11007_s27 + $0x620] sm:$0x3] %v7809_v1  ;;  %v8185_v10 = vadd.f32 %v8184_v34, %v8162_v61 }
 0x3a6   : > { %7846 = vst [vmem:[%s11007_s27 + $0x628] sm:$0x3] %v7810_v58  ;;  %v8211_v50 = vpop.f32.mrf.mxu2  ;;  %v8343_v20 = vpop.f32.mrf.mxu3  ;;  %v8482_v54 = vadd.f32 %v13496_v55, %v13489_v48 }
 0x3a7   : > { %7847 = vst [vmem:[%s11007_s27 + $0x948] sm:$0xff] %v7811_v57  ;;  %v8243_v22 = vadd.f32 %v8242_v42, %v8211_v50  ;;  %v8349_v23 = vrot.slane %v8185_v10, 7 }
 0x3a8   : > { %7848 = vst [vmem:[%s11007_s27 + $0x950] sm:$0xff] %v7812_v4 }
 0x3a9   : > { %7849 = vst [vmem:[%s11007_s27 + $0x958] sm:$0xff] %v7813_v17  ;;  %v8269_v29 = vadd.f32 %v8268_v13, %v8243_v22  ;;  %v8351_v43 = vsel %vm1103_vm6, %v8026_v5, %v8349_v23  ;;  %v8353_v27 = vsel %vm1107_vm8, %v8026_v5, %v8349_v23  ;;  %v8356_v37 = vsel %vm1112_vm12, %v8026_v5, %v8349_v23 }
 0x3aa   : > { %7850 = vst [vmem:[%s11007_s27 + $0x960] sm:$0xff] %v7811_v57  ;;  %v8359_v58 = vsel %vm1117_vm15, %v8026_v5, %v8349_v23 }
 0x3ab   : > { %7851 = vst [vmem:[%s11007_s27 + $0x968] sm:$0xff] %v7812_v4  ;;  %v8294_v3 = vadd.f32 %v8293_v36, %v8269_v29  ;;  %v13515_v49 = vpop.f32.mrf.mxu1 }
 0x3ac   : > { %7852 = vst [vmem:[%s11007_s27 + $0x970] sm:$0xff] %v7813_v17 }
 0x3ad   : > { %7853 = vst [vmem:[%s11007_s27 + $0x978] sm:$0x3] %v7811_v57  ;;  %v13507_v19 = vpop.f32.mrf.mxu0 }
 0x3ae   : > { %7854 = vst [vmem:[%s11007_s27 + $0x980] sm:$0x3] %v7812_v4  ;;  %v8320_v56 = vpop.f32.mrf.mxu2  ;;  %v13512_v40 = vpop.f32.mrf.mxu3 }
 0x3af   : > { %7855 = vst [vmem:[%s11007_s27 + $0x988] sm:$0x3] %v7813_v17  ;;  %v8321_v47 = vadd.f32 %v8320_v56, %v8294_v3 }
 0x3b0   : > { %7856 = vst [vmem:[%s11007_s27 + $0xca8] sm:$0xff] %v7814_v0 }
 0x3b1   : > { %7857 = vst [vmem:[%s11007_s27 + $0xcb0] sm:$0xff] %v7815_v53  ;;  %v8344_v6 = vadd.f32 %v8343_v20, %v8321_v47 }
 0x3b2   : > { %7858 = vst [vmem:[%s11007_s27 + $0xcb8] sm:$0xff] %v7816_v9 }
 0x3b3   : > { %7859 = vst [vmem:[%s11007_s27 + $0xcc0] sm:$0xff] %v7814_v0  ;;  %v8350_v25 = vrot.slane %v8344_v6, 6  ;;  %v8691_v46 = vpop.f32.mrf.mxu1 }
 0x3b4   : > { %7860 = vst [vmem:[%s11007_s27 + $0xcc8] sm:$0xff] %v7815_v53 }
 0x3b5   : > { %7861 = vst [vmem:[%s11007_s27 + $0xcd0] sm:$0xff] %v7816_v9  ;;  %v8352_v41 = vsel %vm1105_vm9, %v8351_v43, %v8350_v25  ;;  %v8354_v15 = vsel %vm1109_vm11, %v8353_v27, %v8350_v25  ;;  %v8666_v32 = vpop.f32.mrf.mxu0  ;;  %v8357_v21 = vsel %vm1114_vm14, %v8356_v37, %v8350_v25  ;;  %v8360_v16 = vsel %vm1119_vm0, %v8359_v58, %v8350_v25 }
 0x3b6   : > { %7862 = vst [vmem:[%s11007_s27 + $0xcd8] sm:$0x3] %v7814_v0  ;;  %v8362_v2 = vperm.slane %v8352_v41, 0  ;;  %v8363_v12 = vperm.slane %v8352_v41, 1  ;;  %v8364_v30 = vperm.slane %v8352_v41, 2  ;;  %v8507_v28 = vpop.f32.mrf.mxu2  ;;  %v8640_v33 = vpop.f32.mrf.mxu3  ;;  %v8355_v14 = vrot.slane %v8354_v15, 1 }
 0x3b7   : > { %7863 = vst [vmem:[%s11007_s27 + $0xce0] sm:$0x3] %v7815_v53  ;;  %v8358_v26 = vrot.slane %v8357_v21, 2  ;;  %v8361_v59 = vrot.slane %v8360_v16, 3  ;;  %v8508_v4 = vadd.f32 %v8507_v28, %v8482_v54 }
 0x3b8   : > { %7864 = vst [vmem:[%s11007_s27 + $0xce8] sm:$0x3] %v7816_v9  ;;  %v8365_v39 = vperm.slane %v8355_v14, 0  ;;  %v8366_v18 = vperm.slane %v8355_v14, 1  ;;  %v8367_v45 = vperm.slane %v8355_v14, 2 }
 0x3b9   : > { %8386 = vst [vmem:[%s11007_s27 + $0x2b8] sm:$0xfc] %v8362_v2  ;;  %v8368_v38 = vperm.slane %v8358_v26, 0  ;;  %v8369_v13 = vperm.slane %v8358_v26, 1  ;;  %v8370_v62 = vperm.slane %v8358_v26, 2  ;;  %v8371_v31 = vperm.slane %v8361_v59, 0 }
 0x3ba   : > { %8387 = vst [vmem:[%s11007_s27 + $0x2c0] sm:$0xfc] %v8363_v12  ;;  %v8533_v48 = vadd.f32 %v13512_v40, %v8508_v4  ;;  %v8372_v50 = vperm.slane %v8361_v59, 1  ;;  %v8373_v22 = vperm.slane %v8361_v59, 2 }
 0x3bb   : > { %8388 = vst [vmem:[%s11007_s27 + $0x2c8] sm:$0xfc] %v8364_v30  ;;  %v8799_v1 = vpop.f32.mrf.mxu1 }
 0x3bc   : > { %8389 = vst [vmem:[%s11007_s27 + $0x2d0] sm:$0xff] %v8362_v2  ;;  %v8560_v0 = vadd.f32 %v13507_v19, %v8533_v48 }
 0x3bd   : > { %8390 = vst [vmem:[%s11007_s27 + $0x2d8] sm:$0xff] %v8363_v12  ;;  %v8768_v35 = vpop.f32.mrf.mxu0 }
 0x3be   : > { %8391 = vst [vmem:[%s11007_s27 + $0x2e0] sm:$0xff] %v8364_v30  ;;  %v8609_v34 = vpop.f32.mrf.mxu2  ;;  %v8741_v60 = vpop.f32.mrf.mxu3  ;;  %v8800_v44 = vadd.f32 %v8799_v1, %v8768_v35  ;;  %v8583_v3 = vadd.f32 %v13515_v49, %v8560_v0 }
 0x3bf   : > { %8392 = vst [vmem:[%s11007_s27 + $0x2e8] sm:$0xf] %v8362_v2  ;;  %v8641_v63 = vadd.f32 %v8640_v33, %v8609_v34 }
 0x3c0   : > { %8393 = vst [vmem:[%s11007_s27 + $0x2f0] sm:$0xf] %v8363_v12 }
 0x3c1   : > { %8394 = vst [vmem:[%s11007_s27 + $0x2f8] sm:$0xf] %v8364_v30  ;;  %v8667_v36 = vadd.f32 %v8666_v32, %v8641_v63 }
 0x3c2   : > { %8395 = vst [vmem:[%s11007_s27 + $0x618] sm:$0xfc] %v8365_v39 }
 0x3c3   : > { %8396 = vst [vmem:[%s11007_s27 + $0x620] sm:$0xfc] %v8366_v18  ;;  %v8692_v52 = vadd.f32 %v8691_v46, %v8667_v36  ;;  %v8900_v51 = vpop.f32.mrf.mxu1 }
 0x3c4   : > { %8397 = vst [vmem:[%s11007_s27 + $0x628] sm:$0xfc] %v8367_v45 }
 0x3c5   : > { %8398 = vst [vmem:[%s11007_s27 + $0x630] sm:$0xff] %v8365_v39  ;;  %v8877_v57 = vpop.f32.mrf.mxu0 }
 0x3c6   : > { %8399 = vst [vmem:[%s11007_s27 + $0x638] sm:$0xff] %v8366_v18  ;;  %v8718_v8 = vpop.f32.mrf.mxu2  ;;  %v8850_v42 = vpop.f32.mrf.mxu3 }
 0x3c7   : > { %8400 = vst [vmem:[%s11007_s27 + $0x640] sm:$0xff] %v8367_v45  ;;  %v8719_v17 = vadd.f32 %v8718_v8, %v8692_v52 }
 0x3c8   : > { %8401 = vst [vmem:[%s11007_s27 + $0x648] sm:$0xf] %v8365_v39 }
 0x3c9   : > { %8402 = vst [vmem:[%s11007_s27 + $0x650] sm:$0xf] %v8366_v18  ;;  %v8742_v24 = vadd.f32 %v8741_v60, %v8719_v17 }
 0x3ca   : > { %8403 = vst [vmem:[%s11007_s27 + $0x658] sm:$0xf] %v8367_v45 }
 0x3cb   : > { %8404 = vst [vmem:[%s11007_s27 + $0x978] sm:$0xfc] %v8368_v38  ;;  %v8906_v7 = vrot.slane %v8742_v24, 7  ;;  %v13574_v11 = vpop.f32.mrf.mxu1 }
 0x3cc   : > { %8405 = vst [vmem:[%s11007_s27 + $0x980] sm:$0xfc] %v8369_v13 }
 0x3cd   : > { %8406 = vst [vmem:[%s11007_s27 + $0x988] sm:$0xfc] %v8370_v62  ;;  %v13567_v53 = vpop.f32.mrf.mxu0  ;;  %v8908_v47 = vsel %vm1103_vm6, %v8583_v3, %v8906_v7  ;;  %v8910_v40 = vsel %vm1107_vm8, %v8583_v3, %v8906_v7  ;;  %v8913_v12 = vsel %vm1112_vm12, %v8583_v3, %v8906_v7  ;;  %v8916_v34 = vsel %vm1117_vm15, %v8583_v3, %v8906_v7 }
 0x3ce   : > { %8407 = vst [vmem:[%s11007_s27 + $0x990] sm:$0xff] %v8368_v38  ;;  %v8825_v55 = vpop.f32.mrf.mxu2  ;;  %v13562_v29 = vpop.f32.mrf.mxu3 }
 0x3cf   : > { %8408 = vst [vmem:[%s11007_s27 + $0x998] sm:$0xff] %v8369_v13  ;;  %v8826_v20 = vadd.f32 %v8825_v55, %v8800_v44 }
 0x3d0   : > { %8409 = vst [vmem:[%s11007_s27 + $0x9a0] sm:$0xff] %v8370_v62 }
 0x3d1   : > { %8410 = vst [vmem:[%s11007_s27 + $0x9a8] sm:$0xf] %v8368_v38  ;;  %v8851_v61 = vadd.f32 %v8850_v42, %v8826_v20 }
 0x3d2   : > { %8411 = vst [vmem:[%s11007_s27 + $0x9b0] sm:$0xf] %v8369_v13 }
 0x3d3   : > { %8412 = vst [vmem:[%s11007_s27 + $0x9b8] sm:$0xf] %v8370_v62  ;;  %v8878_v9 = vadd.f32 %v8877_v57, %v8851_v61  ;;  %v9197_v32 = vpop.f32.mrf.mxu1 }
 0x3d4   : > { %8413 = vst [vmem:[%s11007_s27 + $0xcd8] sm:$0xfc] %v8371_v31 }
 0x3d5   : > { %8414 = vst [vmem:[%s11007_s27 + $0xce0] sm:$0xfc] %v8372_v50  ;;  %v8901_v10 = vadd.f32 %v8900_v51, %v8878_v9  ;;  %v9166_v27 = vpop.f32.mrf.mxu0 }
 0x3d6   : > { %8415 = vst [vmem:[%s11007_s27 + $0xce8] sm:$0xfc] %v8373_v22  ;;  %v9007_v19 = vpop.f32.mrf.mxu2  ;;  %v13583_v43 = vpop.f32.mrf.mxu3  ;;  %v9198_v39 = vadd.f32 %v9197_v32, %v9166_v27 }
 0x3d7   : > { %8416 = vst [vmem:[%s11007_s27 + $0xcf0] sm:$0xff] %v8371_v31  ;;  %v8907_v56 = vrot.slane %v8901_v10, 6  ;;  %v9039_v1 = vadd.f32 %v13562_v29, %v9007_v19 }
 0x3d8   : > { %8417 = vst [vmem:[%s11007_s27 + $0xcf8] sm:$0xff] %v8372_v50 }
 0x3d9   : > { %8418 = vst [vmem:[%s11007_s27 + $0xd00] sm:$0xff] %v8373_v22  ;;  %v8909_v23 = vsel %vm1105_vm9, %v8908_v47, %v8907_v56  ;;  %v8911_v49 = vsel %vm1109_vm11, %v8910_v40, %v8907_v56  ;;  %v8914_v28 = vsel %vm1114_vm14, %v8913_v12, %v8907_v56  ;;  %v8917_v26 = vsel %vm1119_vm0, %v8916_v34, %v8907_v56 }
 0x3da   : > { %8419 = vst [vmem:[%s11007_s27 + $0xd08] sm:$0xf] %v8371_v31  ;;  %v8919_v6 = vperm.slane %v8909_v23, 0  ;;  %v8920_v5 = vperm.slane %v8909_v23, 1  ;;  %v8921_v25 = vperm.slane %v8909_v23, 2  ;;  %v8912_v41 = vrot.slane %v8911_v49, 1 }
 0x3db   : > { %8420 = vst [vmem:[%s11007_s27 + $0xd10] sm:$0xf] %v8372_v50  ;;  %v8915_v46 = vrot.slane %v8914_v28, 2  ;;  %v9298_v35 = vpop.f32.mrf.mxu1  ;;  %v8918_v58 = vrot.slane %v8917_v26, 3  ;;  %v9065_v16 = vadd.f32 %v13567_v53, %v9039_v1 }
 0x3dc   : > { %8421 = vst [vmem:[%s11007_s27 + $0xd18] sm:$0xf] %v8373_v22  ;;  %v8922_v2 = vperm.slane %v8912_v41, 0  ;;  %v8923_v30 = vperm.slane %v8912_v41, 1  ;;  %v8924_v33 = vperm.slane %v8912_v41, 2 }
 0x3dd   : > { %8943 = vst [vmem:[%s11007_s27 + $0x2e8] sm:$0xf0] %v8919_v6  ;;  %v9275_v37 = vpop.f32.mrf.mxu0  ;;  %v8925_v45 = vperm.slane %v8915_v46, 0  ;;  %v8926_v60 = vperm.slane %v8915_v46, 1  ;;  %v8927_v63 = vperm.slane %v8915_v46, 2  ;;  %v8928_v57 = vperm.slane %v8918_v58, 0 }
 0x3de   : > { %8944 = vst [vmem:[%s11007_s27 + $0x2f0] sm:$0xf0] %v8920_v5  ;;  %v9116_v15 = vpop.f32.mrf.mxu2  ;;  %v9248_v14 = vpop.f32.mrf.mxu3  ;;  %v8929_v59 = vperm.slane %v8918_v58, 1  ;;  %v8930_v4 = vperm.slane %v8918_v58, 2  ;;  %v9090_v52 = vadd.f32 %v13574_v11, %v9065_v16 }
 0x3df   : > { %8945 = vst [vmem:[%s11007_s27 + $0x2f8] sm:$0xf0] %v8921_v25 }
 0x3e0   : > { %8946 = vst [vmem:[%s11007_s27 + $0x300] sm:$0xff] %v8919_v6  ;;  %v9117_v31 = vadd.f32 %v9116_v15, %v9090_v52 }
 0x3e1   : > { %8947 = vst [vmem:[%s11007_s27 + $0x308] sm:$0xff] %v8920_v5 }
 0x3e2   : > { %8948 = vst [vmem:[%s11007_s27 + $0x310] sm:$0xff] %v8921_v25  ;;  %v9140_v24 = vadd.f32 %v13583_v43, %v9117_v31 }
 0x3e3   : > { %8949 = vst [vmem:[%s11007_s27 + $0x318] sm:$0x3f] %v8919_v6  ;;  %v9407_v17 = vpop.f32.mrf.mxu1 }
 0x3e4   : > { %8950 = vst [vmem:[%s11007_s27 + $0x320] sm:$0x3f] %v8920_v5 }
 0x3e5   : > { %8951 = vst [vmem:[%s11007_s27 + $0x328] sm:$0x3f] %v8921_v25  ;;  %v9382_v62 = vpop.f32.mrf.mxu0 }
 0x3e6   : > { %8952 = vst [vmem:[%s11007_s27 + $0x648] sm:$0xf0] %v8922_v2  ;;  %v9223_v18 = vpop.f32.mrf.mxu2  ;;  %v9356_v13 = vpop.f32.mrf.mxu3 }
 0x3e7   : > { %8953 = vst [vmem:[%s11007_s27 + $0x650] sm:$0xf0] %v8923_v30  ;;  %v9224_v21 = vadd.f32 %v9223_v18, %v9198_v39 }
 0x3e8   : > { %8954 = vst [vmem:[%s11007_s27 + $0x658] sm:$0xf0] %v8924_v33 }
 0x3e9   : > { %8955 = vst [vmem:[%s11007_s27 + $0x660] sm:$0xff] %v8922_v2  ;;  %v9249_v38 = vadd.f32 %v9248_v14, %v9224_v21 }
 0x3ea   : > { %8956 = vst [vmem:[%s11007_s27 + $0x668] sm:$0xff] %v8923_v30 }
 0x3eb   : > { %8957 = vst [vmem:[%s11007_s27 + $0x670] sm:$0xff] %v8924_v33  ;;  %v9276_v42 = vadd.f32 %v9275_v37, %v9249_v38 }
 0x3ec   : > { %8958 = vst [vmem:[%s11007_s27 + $0x678] sm:$0x3f] %v8922_v2 }
 0x3ed   : > { %8959 = vst [vmem:[%s11007_s27 + $0x680] sm:$0x3f] %v8923_v30  ;;  %v9299_v44 = vadd.f32 %v9298_v35, %v9276_v42 }
 0x3ee   : > { %8960 = vst [vmem:[%s11007_s27 + $0x688] sm:$0x3f] %v8924_v33  ;;  %v9325_v36 = vpop.f32.mrf.mxu2  ;;  %v9457_v20 = vpop.f32.mrf.mxu3 }
 0x3ef   : > { %8961 = vst [vmem:[%s11007_s27 + $0x9a8] sm:$0xf0] %v8925_v45  ;;  %v9357_v8 = vadd.f32 %v9356_v13, %v9325_v36  ;;  %v9463_v50 = vrot.slane %v9299_v44, 7 }
 0x3f0   : > { %8962 = vst [vmem:[%s11007_s27 + $0x9b0] sm:$0xf0] %v8926_v60 }
 0x3f1   : > { %8963 = vst [vmem:[%s11007_s27 + $0x9b8] sm:$0xf0] %v8927_v63  ;;  %v9383_v54 = vadd.f32 %v9382_v62, %v9357_v8  ;;  %v9465_v29 = vsel %vm1103_vm6, %v9140_v24, %v9463_v50  ;;  %v9467_v53 = vsel %vm1107_vm8, %v9140_v24, %v9463_v50  ;;  %v9470_v19 = vsel %vm1112_vm12, %v9140_v24, %v9463_v50 }
 0x3f2   : > { %8964 = vst [vmem:[%s11007_s27 + $0x9c0] sm:$0xff] %v8925_v45  ;;  %v9473_v5 = vsel %vm1117_vm15, %v9140_v24, %v9463_v50 }
 0x3f3   : > { %8965 = vst [vmem:[%s11007_s27 + $0x9c8] sm:$0xff] %v8926_v60  ;;  %v9408_v51 = vadd.f32 %v9407_v17, %v9383_v54 }
 0x3f4   : > { %8966 = vst [vmem:[%s11007_s27 + $0x9d0] sm:$0xff] %v8927_v63 }
 0x3f5   : > { %8967 = vst [vmem:[%s11007_s27 + $0x9d8] sm:$0x3f] %v8925_v45 }
 0x3f6   : > { %8968 = vst [vmem:[%s11007_s27 + $0x9e0] sm:$0x3f] %v8926_v60  ;;  %v9434_v48 = vpop.f32.mrf.mxu2 }
 0x3f7   : > { %8969 = vst [vmem:[%s11007_s27 + $0x9e8] sm:$0x3f] %v8927_v63  ;;  %v9435_v55 = vadd.f32 %v9434_v48, %v9408_v51 }
 0x3f8   : > { %8970 = vst [vmem:[%s11007_s27 + $0xd08] sm:$0xf0] %v8928_v57 }
 0x3f9   : > { %8971 = vst [vmem:[%s11007_s27 + $0xd10] sm:$0xf0] %v8929_v59  ;;  %v9458_v22 = vadd.f32 %v9457_v20, %v9435_v55 }
 0x3fa   : > { %8972 = vst [vmem:[%s11007_s27 + $0xd18] sm:$0xf0] %v8930_v4 }
 0x3fb   : > { %8973 = vst [vmem:[%s11007_s27 + $0xd20] sm:$0xff] %v8928_v57  ;;  %v9464_v61 = vrot.slane %v9458_v22, 6 }
 0x3fc   : > { %8974 = vst [vmem:[%s11007_s27 + $0xd28] sm:$0xff] %v8929_v59 }
 0x3fd   : > { %8975 = vst [vmem:[%s11007_s27 + $0xd30] sm:$0xff] %v8930_v4  ;;  %v9466_v0 = vsel %vm1105_vm9, %v9465_v29, %v9464_v61  ;;  %v9468_v9 = vsel %vm1109_vm11, %v9467_v53, %v9464_v61  ;;  %v9471_v40 = vsel %vm1114_vm14, %v9470_v19, %v9464_v61  ;;  %v9474_v43 = vsel %vm1119_vm0, %v9473_v5, %v9464_v61 }
 0x3fe   : > { %8976 = vst [vmem:[%s11007_s27 + $0xd38] sm:$0x3f] %v8928_v57  ;;  %v9476_v7 = vperm.slane %v9466_v0, 0  ;;  %v9477_v10 = vperm.slane %v9466_v0, 1  ;;  %v9478_v3 = vperm.slane %v9466_v0, 2  ;;  %v9469_v11 = vrot.slane %v9468_v9, 1 }
 0x3ff   : > { %8977 = vst [vmem:[%s11007_s27 + $0xd40] sm:$0x3f] %v8929_v59  ;;  %v9472_v49 = vrot.slane %v9471_v40, 2  ;;  %v9475_v27 = vrot.slane %v9474_v43, 3 }
 0x400   : > { %8978 = vst [vmem:[%s11007_s27 + $0xd48] sm:$0x3f] %v8930_v4  ;;  %v9479_v56 = vperm.slane %v9469_v11, 0  ;;  %v9480_v47 = vperm.slane %v9469_v11, 1  ;;  %v9481_v23 = vperm.slane %v9469_v11, 2 }
 0x401   : > { %9500 = vst [vmem:[%s11007_s27 + $0x318] sm:$0xc0] %v9476_v7  ;;  %v9482_v6 = vperm.slane %v9472_v49, 0  ;;  %v9483_v25 = vperm.slane %v9472_v49, 1  ;;  %v9484_v41 = vperm.slane %v9472_v49, 2  ;;  %v9485_v15 = vperm.slane %v9475_v27, 0 }
 0x402   : > { %9501 = vst [vmem:[%s11007_s27 + $0x320] sm:$0xc0] %v9477_v10  ;;  %v9486_v2 = vperm.slane %v9475_v27, 1  ;;  %v9487_v32 = vperm.slane %v9475_v27, 2 }
 0x403   : > { %9502 = vst [vmem:[%s11007_s27 + $0x328] sm:$0xc0] %v9478_v3 }
 0x404   : > { %9503 = vst [vmem:[%s11007_s27 + $0x330] sm:$0xff] %v9476_v7 }
 0x405   : > { %9504 = vst [vmem:[%s11007_s27 + $0x338] sm:$0xff] %v9477_v10 }
 0x406   : > { %9505 = vst [vmem:[%s11007_s27 + $0x340] sm:$0xff] %v9478_v3 }
 0x407   : > { %9506 = vst [vmem:[%s11007_s27 + $0x348] sm:$0xff] %v9476_v7 }
 0x408   : > { %9507 = vst [vmem:[%s11007_s27 + $0x350] sm:$0xff] %v9477_v10 }
 0x409   : > { %9508 = vst [vmem:[%s11007_s27 + $0x358] sm:$0xff] %v9478_v3 }
 0x40a   : > { %9509 = vst [vmem:[%s11007_s27 + $0x678] sm:$0xc0] %v9479_v56 }
 0x40b   : > { %9510 = vst [vmem:[%s11007_s27 + $0x680] sm:$0xc0] %v9480_v47 }
 0x40c   : > { %9511 = vst [vmem:[%s11007_s27 + $0x688] sm:$0xc0] %v9481_v23 }
 0x40d   : > { %9512 = vst [vmem:[%s11007_s27 + $0x690] sm:$0xff] %v9479_v56 }
 0x40e   : > { %9513 = vst [vmem:[%s11007_s27 + $0x698] sm:$0xff] %v9480_v47 }
 0x40f   : > { %9514 = vst [vmem:[%s11007_s27 + $0x6a0] sm:$0xff] %v9481_v23 }
 0x410   : > { %9515 = vst [vmem:[%s11007_s27 + $0x6a8] sm:$0xff] %v9479_v56 }
 0x411   : > { %9516 = vst [vmem:[%s11007_s27 + $0x6b0] sm:$0xff] %v9480_v47 }
 0x412   : > { %9517 = vst [vmem:[%s11007_s27 + $0x6b8] sm:$0xff] %v9481_v23 }
 0x413   : > { %9518 = vst [vmem:[%s11007_s27 + $0x9d8] sm:$0xc0] %v9482_v6 }
 0x414   : > { %9519 = vst [vmem:[%s11007_s27 + $0x9e0] sm:$0xc0] %v9483_v25 }
 0x415   : > { %9520 = vst [vmem:[%s11007_s27 + $0x9e8] sm:$0xc0] %v9484_v41 }
 0x416   : > { %9521 = vst [vmem:[%s11007_s27 + $0x9f0] sm:$0xff] %v9482_v6 }
 0x417   : > { %9522 = vst [vmem:[%s11007_s27 + $0x9f8] sm:$0xff] %v9483_v25 }
 0x418   : > { %9523 = vst [vmem:[%s11007_s27 + $0xa00] sm:$0xff] %v9484_v41 }
 0x419   : > { %9524 = vst [vmem:[%s11007_s27 + $0xa08] sm:$0xff] %v9482_v6 }
 0x41a   : > { %9525 = vst [vmem:[%s11007_s27 + $0xa10] sm:$0xff] %v9483_v25 }
 0x41b   : > { %9526 = vst [vmem:[%s11007_s27 + $0xa18] sm:$0xff] %v9484_v41 }
 0x41c   : > { %9527 = vst [vmem:[%s11007_s27 + $0xd38] sm:$0xc0] %v9485_v15 }
 0x41d   : > { %9528 = vst [vmem:[%s11007_s27 + $0xd40] sm:$0xc0] %v9486_v2 }
 0x41e   : > { %9529 = vst [vmem:[%s11007_s27 + $0xd48] sm:$0xc0] %v9487_v32 }
 0x41f   : > { %9530 = vst [vmem:[%s11007_s27 + $0xd50] sm:$0xff] %v9485_v15 }
 0x420   : > { %9531 = vst [vmem:[%s11007_s27 + $0xd58] sm:$0xff] %v9486_v2 }
 0x421   : > { %9532 = vst [vmem:[%s11007_s27 + $0xd60] sm:$0xff] %v9487_v32 }
 0x422   : > { %9533 = vst [vmem:[%s11007_s27 + $0xd68] sm:$0xff] %v9485_v15 }
 0x423   : > { %9534 = vst [vmem:[%s11007_s27 + $0xd70] sm:$0xff] %v9486_v2 }
 0x424   : > { %9535 = vst [vmem:[%s11007_s27 + $0xd78] sm:$0xff] %v9487_v32 }
 0x425   : > { %10224 = shalt.err (!%p10221_p12)
}
 0x426   : > { %s10359_s2 = smov 384   ;;  %s10360_s27 = smov 24  }
 0x427   : > { %9997 = dma.vmem_to_hbm [thread:$0]  (%p10524_p1), %s9553_s0, 55296, %s9555_s7, %s9537_s18, %s10359_s2, %s10359_s2, %s10360_s27  }
 0x428 PF: > { %p10011_p3 = scmp.ge.s32.totalorder %s10347_s25, 2  ;;  %s9569_s21 = sand.u32 1, %s10295_s12  }
 0x429   : > { %s9570_s29 = scalar_lea.sflag [#allocation4], %s9569_s21 }
 0x42a   : > { %p10007_p13 = pnand %p10011_p3, %p10539_p5 }
 0x42c   : > { %p10008_p0 = pneg %p10007_p13 }
 0x42e   : > { %10290 = dma.done.wait (%p10008_p0), %s9570_s29, 55296  }
 0x42f   : > { %10292 = vsyncadd (%p10008_p0), %s9570_s29, 4294912000  ;;  %s22_s25 = sadd.s32 1, %s10347_s25   ;;  %s13789_s8 = sld [smem:[#allocation15_spill]] }
 0x430   : > { %p13696_p4 = scmp.ge.s32.totalorder %s22_s25, 6   ;;  %s13790_s22 = sld [smem:[#allocation12_spill]] }
 0x431   : > { %s13791_s30 = sld [smem:[#allocation13_spill]]  ;;  %s13793_s12 = smov %s10299_s13 }
 0x432   : > { %s13792_s24 = sld [smem:[#allocation14_spill]]  ;;  %s13794_s13 = smov %s10303_s14 }
 0x433   : > { %s13795_s14 = smov %s10536_s3  ;;  %s13796_s15 = smov %s10311_s16 }
 0x434   : > { %s13797_s16 = smov %s10315_s17  ;;  %s13799_s18 = smov %s10323_s19 }
 0x435   : > { %s13798_s17 = smov %s13789_s8  ;;  %s13800_s19 = smov %s10327_s20 }
 0x436   : > { %s13801_s20 = smov %s10533_s9  ;;  %s13802_s21 = smov %s10339_s23 }
 0x437   : > { %s13803_s23 = smov %s13791_s30  ;;  %21 = sbr.rel (!%p13696_p4) target bundleno = 16 (0x10), region = 93 }
 0x43c   :  { %9576 = vsyncpa [#allocation3], 1 }
 0x43d   :  { %9578 = vsyncpa [#allocation3 + $0x1], 1 }
 0x43e   :  { %9579 = vsyncpa [#allocation6], 1 }
 0x43f   :  { %9581 = vsyncpa [#allocation6 + $0x1], 1 }
 0x440   :  { %9582 = vsyncpa [#allocation4], 1 }
 0x441   :  { %9584 = vsyncpa [#allocation4 + $0x1], 1 }

</bundles_post_ra>
